<compile_context>
chip_gen: v7x
topology: tpu7x:2x2x1
jax: 0.10.0
libtpu: 0.0.40
codegen_flags: <defaults>
</compile_context>

<pallas_src>
import functools
import math

import jax
import jax.numpy as jnp
from jax.experimental import pallas as pl
from jax.experimental.pallas import tpu as pltpu

VMEM_SPEC = pl.BlockSpec(memory_space=pltpu.MemorySpace.VMEM)
VMEM_LIMIT = 32 * 1024 * 1024   # safe on v5e/v6e (128 MiB) and v7x (64 MiB)
N_PAD = 128                     # lane-dense classifier output slab


# --------------------------- in-kernel helpers -----------------------------

def _ln_f32(x, g, b, eps):
    mu = jnp.mean(x, axis=-1, keepdims=True)
    var = jnp.mean(jnp.square(x - mu), axis=-1, keepdims=True)
    return (x - mu) * jax.lax.rsqrt(var + eps) * g + b


def _gelu_tanh(x):
    # TODO(synk): HF BERT default GELU is the exact erf form; tanh approx used here.
    c = 0.7978845608028654  # sqrt(2/pi)
    return 0.5 * x * (1.0 + jnp.tanh(c * (x + 0.044715 * x * x * x)))


# ----------------------------- Pallas kernels ------------------------------

def _embed_ln_kernel(x_ref, g_ref, b_ref, o_ref, *, eps):
    x = x_ref[...][0].astype(jnp.float32)            # (S, H)
    y = _ln_f32(x, g_ref[...], b_ref[...], eps)
    o_ref[...] = y.astype(o_ref.dtype)[None]


def _encoder_layer_kernel(x_ref, mask_ref, wqkv_ref, bqkv_ref, wo_ref, bo_ref,
                          ln1_g_ref, ln1_b_ref, w1_ref, b1_ref, w2_ref, b2_ref,
                          ln2_g_ref, ln2_b_ref, o_ref, *, n_heads, scale, eps):
    x_bf = x_ref[...][0]                             # (S, H) bf16
    x_f32 = x_bf.astype(jnp.float32)
    S, H = x_bf.shape
    dh = H // n_heads
    add_mask = mask_ref[...][0]                      # (1, S) additive, f32

    # --- fused QKV projection: one [S,H] x [H,3H] matmul (MXU, f32 accumulate)
    qkv = jnp.dot(x_bf, wqkv_ref[...],
                  preferred_element_type=jnp.float32) + bqkv_ref[...]
    q = qkv[:, 0:H]
    k = qkv[:, H:2 * H]
    v = qkv[:, 2 * H:3 * H]

    # --- per-head attention; head-merge folded into the output projection
    # TODO(synk): for real seq lengths, tile K/V flash-attention style here.
    wo = wo_ref[...]                                 # (H, H) bf16
    attn = jnp.zeros((S, H), jnp.float32)
    for h in range(n_heads):
        sl = slice(h * dh, (h + 1) * dh)
        qh, kh, vh = q[:, sl], k[:, sl], v[:, sl]
        s = jax.lax.dot_general(qh, kh, (((1,), (1,)), ((), ())),
                                preferred_element_type=jnp.float32)
        s = s * scale + add_mask                     # (S, S)
        m = jnp.max(s, axis=-1, keepdims=True)
        p = jnp.exp(s - m)
        p = p * pl.reciprocal(jnp.sum(p, axis=-1, keepdims=True), approx=True)
        ctx_h = jnp.dot(p, vh, preferred_element_type=jnp.float32)   # (S, dh)
        attn = attn + jnp.dot(ctx_h.astype(wo.dtype), wo[sl, :],
                              preferred_element_type=jnp.float32)
    attn = attn + bo_ref[...]

    # --- residual + LN1 (f32 stats)
    h1 = _ln_f32(x_f32 + attn, ln1_g_ref[...], ln1_b_ref[...], eps)

    # --- FFN: w1 + GELU + w2 + residual + LN2, all fused
    ff = jnp.dot(h1.astype(w1_ref.dtype), w1_ref[...],
                 preferred_element_type=jnp.float32) + b1_ref[...]
    ff = _gelu_tanh(ff)
    ff2 = jnp.dot(ff.astype(w2_ref.dtype), w2_ref[...],
                  preferred_element_type=jnp.float32) + b2_ref[...]
    h2 = _ln_f32(h1 + ff2, ln2_g_ref[...], ln2_b_ref[...], eps)

    o_ref[...] = h2.astype(o_ref.dtype)[None]


def _pooler_head_kernel(x_ref, pw_ref, pb_ref, w_ref, b_ref, o_ref):
    x = x_ref[...]                                   # (B, S, H) bf16
    cls = x[:, 0, :]                                 # [CLS] token
    o2 = jnp.tanh(jnp.dot(cls, pw_ref[...],
                          preferred_element_type=jnp.float32) + pb_ref[...])
    # TODO(synk): nn.Dropout(0.3) treated as identity (inference semantics).
    out = jnp.dot(o2.astype(w_ref.dtype), w_ref[...],
                  preferred_element_type=jnp.float32) + b_ref[...]
    o_ref[...] = out                                 # (B, N_PAD) lane-dense


def _hidden_head_kernel(x_ref, w_ref, b_ref, o_ref):
    x = x_ref[...].astype(jnp.float32)               # (B, S, H)
    apool = jnp.mean(x, axis=1)                      # matches torch.mean(o1, 1)
    mpool = jnp.max(x, axis=1)                       # matches torch.max(o1, 1)
    cat = jnp.concatenate([apool, mpool], axis=-1)   # (B, 2H)
    # TODO(synk): nn.Dropout(0.3) treated as identity (inference semantics).
    out = jnp.dot(cat.astype(w_ref.dtype), w_ref[...],
                  preferred_element_type=jnp.float32) + b_ref[...]
    o_ref[...] = out                                 # (B, N_PAD) lane-dense


# ------------------------------- wrappers ----------------------------------

def embed_layernorm(x_emb, gamma, beta, eps=1e-12):
    B, S, H = x_emb.shape
    act_spec = pl.BlockSpec((1, S, H), lambda b: (b, 0, 0))
    vec_spec = pl.BlockSpec((1, H), lambda b: (0, 0))
    return pl.pallas_call(
        functools.partial(_embed_ln_kernel, eps=eps),
        grid=(B,),
        in_specs=[act_spec, vec_spec, vec_spec],
        out_specs=act_spec,
        out_shape=jax.ShapeDtypeStruct((B, S, H), jnp.bfloat16),
        compiler_params=pltpu.CompilerParams(
            dimension_semantics=("parallel",),
            vmem_limit_bytes=VMEM_LIMIT),
    )(x_emb, gamma, beta)


def encoder_layer(x, add_mask, lp, *, n_heads, scale, eps=1e-12):
    B, S, H = x.shape
    act_spec = pl.BlockSpec((1, S, H), lambda b: (b, 0, 0))
    mask_spec = pl.BlockSpec((1, 1, S), lambda b: (b, 0, 0))

    def wspec(arr):
        nd = arr.ndim
        return pl.BlockSpec(arr.shape, lambda b, _nd=nd: (0,) * _nd)

    weights = [lp["wqkv"], lp["bqkv"], lp["wo"], lp["bo"],
               lp["ln1_g"], lp["ln1_b"], lp["w1"], lp["b1"],
               lp["w2"], lp["b2"], lp["ln2_g"], lp["ln2_b"]]

    return pl.pallas_call(
        functools.partial(_encoder_layer_kernel,
                          n_heads=n_heads, scale=scale, eps=eps),
        grid=(B,),
        in_specs=[act_spec, mask_spec] + [wspec(w) for w in weights],
        out_specs=act_spec,
        out_shape=jax.ShapeDtypeStruct((B, S, H), jnp.bfloat16),
        compiler_params=pltpu.CompilerParams(
            dimension_semantics=("parallel",),
            vmem_limit_bytes=VMEM_LIMIT),
    )(x, add_mask, *weights)


def pooler_head(x, pool_w, pool_b, w_pad, b_pad):
    B = x.shape[0]
    N = w_pad.shape[1]
    return pl.pallas_call(
        _pooler_head_kernel,
        out_shape=jax.ShapeDtypeStruct((B, N), jnp.float32),
        in_specs=[VMEM_SPEC] * 5,
        out_specs=VMEM_SPEC,
        compiler_params=pltpu.CompilerParams(vmem_limit_bytes=VMEM_LIMIT),
    )(x, pool_w, pool_b, w_pad, b_pad)


def hidden_head(x, w_pad, b_pad):
    B = x.shape[0]
    N = w_pad.shape[1]
    return pl.pallas_call(
        _hidden_head_kernel,
        out_shape=jax.ShapeDtypeStruct((B, N), jnp.float32),
        in_specs=[VMEM_SPEC] * 3,
        out_specs=VMEM_SPEC,
        compiler_params=pltpu.CompilerParams(vmem_limit_bytes=VMEM_LIMIT),
    )(x, w_pad, b_pad)


# ----------------------------- parameter init ------------------------------

def init_params(key, *, vocab=128, max_pos=32, hidden=128, n_layers=2,
                n_heads=4, intermediate=256, n_classes=2):
    def nrm(k, shape, scale=0.02):
        return scale * jax.random.normal(k, shape, dtype=jnp.float32)

    keys = iter(jax.random.split(key, 16 + 16 * n_layers))
    p = {
        "n_heads": n_heads,
        "word_emb": nrm(next(keys), (vocab, hidden)),
        "pos_emb": nrm(next(keys), (max_pos, hidden)),
        "type_emb": nrm(next(keys), (2, hidden)),
        "emb_ln_g": jnp.ones((hidden,), jnp.float32),
        "emb_ln_b": jnp.zeros((hidden,), jnp.float32),
        "pool_w": nrm(next(keys), (hidden, hidden)),
        "pool_b": jnp.zeros((hidden,), jnp.float32),
        "w_hidden": nrm(next(keys), (2 * hidden, n_classes)),
        "b_hidden": jnp.zeros((n_classes,), jnp.float32),
        "w_pooler": nrm(next(keys), (hidden, n_classes)),
        "b_pooler": jnp.zeros((n_classes,), jnp.float32),
        "layers": [],
    }
    for _ in range(n_layers):
        p["layers"].append({
            "wq": nrm(next(keys), (hidden, hidden)), "bq": jnp.zeros((hidden,), jnp.float32),
            "wk": nrm(next(keys), (hidden, hidden)), "bk": jnp.zeros((hidden,), jnp.float32),
            "wv": nrm(next(keys), (hidden, hidden)), "bv": jnp.zeros((hidden,), jnp.float32),
            "wo": nrm(next(keys), (hidden, hidden)), "bo": jnp.zeros((hidden,), jnp.float32),
            "ln1_g": jnp.ones((hidden,), jnp.float32), "ln1_b": jnp.zeros((hidden,), jnp.float32),
            "w1": nrm(next(keys), (hidden, intermediate)), "b1": jnp.zeros((intermediate,), jnp.float32),
            "w2": nrm(next(keys), (intermediate, hidden)), "b2": jnp.zeros((hidden,), jnp.float32),
            "ln2_g": jnp.ones((hidden,), jnp.float32), "ln2_b": jnp.zeros((hidden,), jnp.float32),
        })
    return p


def prepare_params(p, *, n_pad=N_PAD):
    """Fuse QKV, cast matmul weights to bf16, reshape biases to (1,N),
    pad the tiny classifier heads to a 128-lane output slab."""
    H = p["word_emb"].shape[1]
    nc = p["w_pooler"].shape[1]
    bf = jnp.bfloat16

    def pad_w(w):
        return jnp.zeros((w.shape[0], n_pad), jnp.float32).at[:, :nc].set(w).astype(bf)

    def pad_b(b):
        return jnp.zeros((1, n_pad), jnp.float32).at[0, :nc].set(b)

    kp = {
        "word_emb": p["word_emb"],
        "pos_emb": p["pos_emb"],
        "type_emb": p["type_emb"],
        "emb_ln_g": p["emb_ln_g"].reshape(1, H),
        "emb_ln_b": p["emb_ln_b"].reshape(1, H),
        "pool_w": p["pool_w"].astype(bf),
        "pool_b": p["pool_b"].reshape(1, H),
        "w_pooler_pad": pad_w(p["w_pooler"]),
        "b_pooler_pad": pad_b(p["b_pooler"]),
        "w_hidden_pad": pad_w(p["w_hidden"]),
        "b_hidden_pad": pad_b(p["b_hidden"]),
        "layers": [],
    }
    for lp in p["layers"]:
        I = lp["w1"].shape[1]
        kp["layers"].append({
            "wqkv": jnp.concatenate([lp["wq"], lp["wk"], lp["wv"]], axis=1).astype(bf),
            "bqkv": jnp.concatenate([lp["bq"], lp["bk"], lp["bv"]], axis=0).reshape(1, 3 * H),
            "wo": lp["wo"].astype(bf), "bo": lp["bo"].reshape(1, H),
            "ln1_g": lp["ln1_g"].reshape(1, H), "ln1_b": lp["ln1_b"].reshape(1, H),
            "w1": lp["w1"].astype(bf), "b1": lp["b1"].reshape(1, I),
            "w2": lp["w2"].astype(bf), "b2": lp["b2"].reshape(1, H),
            "ln2_g": lp["ln2_g"].reshape(1, H), "ln2_b": lp["ln2_b"].reshape(1, H),
        })
    return kp


# ------------------------------- forward -----------------------------------

@functools.partial(jax.jit, static_argnames=("output_bert", "n_heads", "n_classes"))
def bert_base_uncased_forward(params, ids, mask, token_type_ids,
                              output_bert="pooler", n_heads=4, n_classes=2):
    B, S = ids.shape
    H = params["emb_ln_g"].shape[1]
    dh = H // n_heads
    scale = 1.0 / math.sqrt(dh)

    # embedding gathers + sum (glue in JAX; no Pallas gather needed at this scale)
    x_emb = (params["word_emb"][ids]
             + params["pos_emb"][jnp.arange(S)][None, :, :]
             + params["type_emb"][token_type_ids]).astype(jnp.float32)

    x = embed_layernorm(x_emb, params["emb_ln_g"], params["emb_ln_b"])  # bf16 (B,S,H)

    # additive attention mask (B, 1, S)
    add_mask = ((1.0 - mask.astype(jnp.float32)) * -1e9)[:, None, :]

    for lp in params["layers"]:
        x = encoder_layer(x, add_mask, lp, n_heads=n_heads, scale=scale)

    if output_bert == "hidden":
        out_pad = hidden_head(x, params["w_hidden_pad"], params["b_hidden_pad"])
    else:
        out_pad = pooler_head(x, params["pool_w"], params["pool_b"],
                              params["w_pooler_pad"], params["b_pooler_pad"])
    return out_pad[:, :n_classes]    # slice the lane-dense slab to n_classes


# --------------------------------- main -------------------------------------

if __name__ == "__main__":
    key = jax.random.PRNGKey(0)
    pkey, ikey = jax.random.split(key)

    B, S, VOCAB, HIDDEN, HEADS, CLASSES = 2, 8, 128, 128, 4, 2
    raw = init_params(pkey, vocab=VOCAB, max_pos=32, hidden=HIDDEN,
                      n_layers=2, n_heads=HEADS, intermediate=256,
                      n_classes=CLASSES)
    params = prepare_params(raw)

    ids = jax.random.randint(ikey, (B, S), 0, VOCAB, dtype=jnp.int32)
    mask = jnp.ones((B, S), dtype=jnp.int32).at[1, 6:].set(0)     # pad tail of row 1
    token_type_ids = jnp.zeros((B, S), dtype=jnp.int32).at[:, 4:].set(1)

    out_pooler = bert_base_uncased_forward(params, ids, mask, token_type_ids,
                                           output_bert="pooler",
                                           n_heads=HEADS, n_classes=CLASSES)
    out_hidden = bert_base_uncased_forward(params, ids, mask, token_type_ids,
                                           output_bert="hidden",
                                           n_heads=HEADS, n_classes=CLASSES)
    jax.block_until_ready(out_pooler)
    jax.block_until_ready(out_hidden)
    assert out_pooler.shape == (B, CLASSES) and out_hidden.shape == (B, CLASSES)
    assert bool(jnp.all(jnp.isfinite(out_pooler))) and bool(jnp.all(jnp.isfinite(out_hidden)))
    print("KERNEL_OK")
</pallas_src>

<mosaic_0001>
module attributes {stable_mosaic.version = 11 : i64} {
  func.func @_embed_ln_kernel(%arg0: i32, %arg1: memref<1x8x128xf32, #tpu.memory_space<vmem>>, %arg2: memref<1x128xf32, #tpu.memory_space<vmem>>, %arg3: memref<1x128xf32, #tpu.memory_space<vmem>>, %arg4: memref<1x8x128xbf16, #tpu.memory_space<vmem>>) attributes {dimension_semantics = [#tpu.dimension_semantics<parallel>], iteration_bounds = array<i64: 2>, scalar_prefetch = 0 : i64, scratch_operands = 0 : i64, tpu.core_type = #tpu.core_type<tc>, window_params = [{transform_indices = @transform_0, window_bounds = array<i64: 1, 8, 128>}, {pipeline_mode = #tpu.pipeline_mode<synchronous>, transform_indices = @transform_1, window_bounds = array<i64: 1, 128>}, {pipeline_mode = #tpu.pipeline_mode<synchronous>, transform_indices = @transform_2, window_bounds = array<i64: 1, 128>}, {transform_indices = @transform_3, window_bounds = array<i64: 1, 8, 128>}]} {
    %c0 = arith.constant 0 : index
    %c0_0 = arith.constant 0 : index
    %c0_1 = arith.constant 0 : index
    %0 = vector.load %arg1[%c0, %c0_0, %c0_1] : memref<1x8x128xf32, #tpu.memory_space<vmem>>, vector<1x8x128xf32>
    %1 = vector.shape_cast %0 : vector<1x8x128xf32> to vector<8x128xf32>
    %c0_2 = arith.constant 0 : index
    %c0_3 = arith.constant 0 : index
    %2 = vector.load %arg2[%c0_2, %c0_3] : memref<1x128xf32, #tpu.memory_space<vmem>>, vector<1x128xf32>
    %c0_4 = arith.constant 0 : index
    %c0_5 = arith.constant 0 : index
    %3 = vector.load %arg3[%c0_4, %c0_5] : memref<1x128xf32, #tpu.memory_space<vmem>>, vector<1x128xf32>
    %cst = arith.constant dense<0.000000e+00> : vector<8xf32>
    %4 = vector.multi_reduction <add>, %1, %cst [1] : vector<8x128xf32> to vector<8xf32>
    %5 = vector.shape_cast %4 : vector<8xf32> to vector<8x1xf32>
    %cst_6 = arith.constant 1.280000e+02 : f32
    %6 = vector.broadcast %cst_6 : f32 to vector<8x1xf32>
    %7 = arith.divf %5, %6 : vector<8x1xf32>
    %8 = vector.broadcast %7 : vector<8x1xf32> to vector<8x128xf32>
    %9 = arith.subf %1, %8 : vector<8x128xf32>
    %10 = arith.mulf %9, %9 : vector<8x128xf32>
    %cst_7 = arith.constant dense<0.000000e+00> : vector<8xf32>
    %11 = vector.multi_reduction <add>, %10, %cst_7 [1] : vector<8x128xf32> to vector<8xf32>
    %12 = vector.shape_cast %11 : vector<8xf32> to vector<8x1xf32>
    %cst_8 = arith.constant 1.280000e+02 : f32
    %13 = vector.broadcast %cst_8 : f32 to vector<8x1xf32>
    %14 = arith.divf %12, %13 : vector<8x1xf32>
    %15 = vector.broadcast %7 : vector<8x1xf32> to vector<8x128xf32>
    %16 = arith.subf %1, %15 : vector<8x128xf32>
    %cst_9 = arith.constant 9.99999996E-13 : f32
    %17 = vector.broadcast %cst_9 : f32 to vector<8x1xf32>
    %18 = arith.addf %14, %17 : vector<8x1xf32>
    %19 = math.rsqrt %18 : vector<8x1xf32>
    %20 = vector.broadcast %19 : vector<8x1xf32> to vector<8x128xf32>
    %21 = arith.mulf %16, %20 : vector<8x128xf32>
    %22 = vector.broadcast %2 : vector<1x128xf32> to vector<8x128xf32>
    %23 = arith.mulf %21, %22 : vector<8x128xf32>
    %24 = vector.broadcast %3 : vector<1x128xf32> to vector<8x128xf32>
    %25 = arith.addf %23, %24 : vector<8x128xf32>
    %26 = arith.truncf %25 : vector<8x128xf32> to vector<8x128xbf16>
    %27 = vector.shape_cast %26 : vector<8x128xbf16> to vector<1x8x128xbf16>
    %c0_10 = arith.constant 0 : index
    %c0_11 = arith.constant 0 : index
    %c0_12 = arith.constant 0 : index
    %28 = vector.load %arg4[%c0_10, %c0_11, %c0_12] : memref<1x8x128xbf16, #tpu.memory_space<vmem>>, vector<1x8x128xbf16>
    tpu.vector_store %arg4[%c0_10, %c0_11, %c0_12], %27 {strides = array<i32>} : memref<1x8x128xbf16, #tpu.memory_space<vmem>>, vector<1x8x128xbf16>,
    return
  }
  func.func @transform_0(%arg0: i32) -> (i32, i32, i32) {
    %c0_i32 = arith.constant 0 : i32
    %c0_i32_0 = arith.constant 0 : i32
    %c0_i32_1 = arith.constant 0 : i32
    return %arg0, %c0_i32, %c0_i32_0 : i32, i32, i32
  }
  func.func @transform_1(%arg0: i32) -> (i32, i32) {
    %c0_i32 = arith.constant 0 : i32
    %c0_i32_0 = arith.constant 0 : i32
    %c0_i32_1 = arith.constant 0 : i32
    return %c0_i32, %c0_i32_0 : i32, i32
  }
  func.func @transform_2(%arg0: i32) -> (i32, i32) {
    %c0_i32 = arith.constant 0 : i32
    %c0_i32_0 = arith.constant 0 : i32
    %c0_i32_1 = arith.constant 0 : i32
    return %c0_i32, %c0_i32_0 : i32, i32
  }
  func.func @transform_3(%arg0: i32) -> (i32, i32, i32) {
    %c0_i32 = arith.constant 0 : i32
    %c0_i32_0 = arith.constant 0 : i32
    %c0_i32_1 = arith.constant 0 : i32
    return %arg0, %c0_i32, %c0_i32_0 : i32, i32, i32
  }
}

module attributes {stable_mosaic.version = 11 : i64} {
  func.func @_pooler_head_kernel(%arg0: memref<2x8x128xbf16, #tpu.memory_space<vmem>>, %arg1: memref<128x128xbf16, #tpu.memory_space<vmem>>, %arg2: memref<1x128xf32, #tpu.memory_space<vmem>>, %arg3: memref<128x128xbf16, #tpu.memory_space<vmem>>, %arg4: memref<1x128xf32, #tpu.memory_space<vmem>>, %arg5: memref<2x128xf32, #tpu.memory_space<vmem>>) attributes {dimension_semantics = [], scalar_prefetch = 0 : i64, scratch_operands = 0 : i64, tpu.core_type = #tpu.core_type<tc>} {
    %c0 = arith.constant 0 : index
    %c0_0 = arith.constant 0 : index
    %c0_1 = arith.constant 0 : index
    %0 = vector.load %arg0[%c0, %c0_0, %c0_1] : memref<2x8x128xbf16, #tpu.memory_space<vmem>>, vector<2x8x128xbf16>
    %1 = vector.extract_strided_slice %0 {offsets = [0, 0, 0], sizes = [2, 1, 128], strides = [1, 1, 1]} : vector<2x8x128xbf16> to vector<2x1x128xbf16>
    %2 = vector.shape_cast %1 : vector<2x1x128xbf16> to vector<2x128xbf16>
    %c0_2 = arith.constant 0 : index
    %c0_3 = arith.constant 0 : index
    %3 = vector.load %arg1[%c0_2, %c0_3] : memref<128x128xbf16, #tpu.memory_space<vmem>>, vector<128x128xbf16>
    %cst = arith.constant dense<0.000000e+00> : vector<2x128xf32>
    %4 = tpu.matmul %2, %3, %cst {dimension_numbers = #tpu.dot_dimension_numbers<[1], [0], [0], [1], [0, 0, 1, 1], [], []>} : vector<2x128xbf16>, vector<128x128xbf16>, vector<2x128xf32> -> vector<2x128xf32>
    %c0_4 = arith.constant 0 : index
    %c0_5 = arith.constant 0 : index
    %5 = vector.load %arg2[%c0_4, %c0_5] : memref<1x128xf32, #tpu.memory_space<vmem>>, vector<1x128xf32>
    %6 = vector.broadcast %5 : vector<1x128xf32> to vector<2x128xf32>
    %7 = arith.addf %4, %6 : vector<2x128xf32>
    %8 = math.tanh %7 : vector<2x128xf32>
    %9 = arith.truncf %8 : vector<2x128xf32> to vector<2x128xbf16>
    %c0_6 = arith.constant 0 : index
    %c0_7 = arith.constant 0 : index
    %10 = vector.load %arg3[%c0_6, %c0_7] : memref<128x128xbf16, #tpu.memory_space<vmem>>, vector<128x128xbf16>
    %cst_8 = arith.constant dense<0.000000e+00> : vector<2x128xf32>
    %11 = tpu.matmul %9, %10, %cst_8 {dimension_numbers = #tpu.dot_dimension_numbers<[1], [0], [0], [1], [0, 0, 1, 1], [], []>} : vector<2x128xbf16>, vector<128x128xbf16>, vector<2x128xf32> -> vector<2x128xf32>
    %c0_9 = arith.constant 0 : index
    %c0_10 = arith.constant 0 : index
    %12 = vector.load %arg4[%c0_9, %c0_10] : memref<1x128xf32, #tpu.memory_space<vmem>>, vector<1x128xf32>
    %13 = vector.broadcast %12 : vector<1x128xf32> to vector<2x128xf32>
    %14 = arith.addf %11, %13 : vector<2x128xf32>
    %c0_11 = arith.constant 0 : index
    %c0_12 = arith.constant 0 : index
    %15 = vector.load %arg5[%c0_11, %c0_12] : memref<2x128xf32, #tpu.memory_space<vmem>>, vector<2x128xf32>
    tpu.vector_store %arg5[%c0_11, %c0_12], %14 {strides = array<i32>} : memref<2x128xf32, #tpu.memory_space<vmem>>, vector<2x128xf32>,
    return
  }
}

module attributes {stable_mosaic.version = 11 : i64} {
  func.func @_encoder_layer_kernel(%arg0: i32, %arg1: memref<1x8x128xbf16, #tpu.memory_space<vmem>>, %arg2: memref<1x1x8xf32, #tpu.memory_space<vmem>>, %arg3: memref<128x384xbf16, #tpu.memory_space<vmem>>, %arg4: memref<1x384xf32, #tpu.memory_space<vmem>>, %arg5: memref<128x128xbf16, #tpu.memory_space<vmem>>, %arg6: memref<1x128xf32, #tpu.memory_space<vmem>>, %arg7: memref<1x128xf32, #tpu.memory_space<vmem>>, %arg8: memref<1x128xf32, #tpu.memory_space<vmem>>, %arg9: memref<128x256xbf16, #tpu.memory_space<vmem>>, %arg10: memref<1x256xf32, #tpu.memory_space<vmem>>, %arg11: memref<256x128xbf16, #tpu.memory_space<vmem>>, %arg12: memref<1x128xf32, #tpu.memory_space<vmem>>, %arg13: memref<1x128xf32, #tpu.memory_space<vmem>>, %arg14: memref<1x128xf32, #tpu.memory_space<vmem>>, %arg15: memref<1x8x128xbf16, #tpu.memory_space<vmem>>) attributes {dimension_semantics = [#tpu.dimension_semantics<parallel>], iteration_bounds = array<i64: 2>, scalar_prefetch = 0 : i64, scratch_operands = 0 : i64, tpu.core_type = #tpu.core_type<tc>, window_params = [{transform_indices = @transform_0, window_bounds = array<i64: 1, 8, 128>}, {transform_indices = @transform_1, window_bounds = array<i64: 1, 1, 8>}, {pipeline_mode = #tpu.pipeline_mode<synchronous>, transform_indices = @transform_2, window_bounds = array<i64: 128, 384>}, {pipeline_mode = #tpu.pipeline_mode<synchronous>, transform_indices = @transform_3, window_bounds = array<i64: 1, 384>}, {pipeline_mode = #tpu.pipeline_mode<synchronous>, transform_indices = @transform_4, window_bounds = array<i64: 128, 128>}, {pipeline_mode = #tpu.pipeline_mode<synchronous>, transform_indices = @transform_5, window_bounds = array<i64: 1, 128>}, {pipeline_mode = #tpu.pipeline_mode<synchronous>, transform_indices = @transform_6, window_bounds = array<i64: 1, 128>}, {pipeline_mode = #tpu.pipeline_mode<synchronous>, transform_indices = @transform_7, window_bounds = array<i64: 1, 128>}, {pipeline_mode = #tpu.pipeline_mode<synchronous>, transform_indices = @transform_8, window_bounds = array<i64: 128, 256>}, {pipeline_mode = #tpu.pipeline_mode<synchronous>, transform_indices = @transform_9, window_bounds = array<i64: 1, 256>}, {pipeline_mode = #tpu.pipeline_mode<synchronous>, transform_indices = @transform_10, window_bounds = array<i64: 256, 128>}, {pipeline_mode = #tpu.pipeline_mode<synchronous>, transform_indices = @transform_11, window_bounds = array<i64: 1, 128>}, {pipeline_mode = #tpu.pipeline_mode<synchronous>, transform_indices = @transform_12, window_bounds = array<i64: 1, 128>}, {pipeline_mode = #tpu.pipeline_mode<synchronous>, transform_indices = @transform_13, window_bounds = array<i64: 1, 128>}, {transform_indices = @transform_14, window_bounds = array<i64: 1, 8, 128>}]} {
    %c0 = arith.constant 0 : index
    %c0_0 = arith.constant 0 : index
    %c0_1 = arith.constant 0 : index
    %0 = vector.load %arg1[%c0, %c0_0, %c0_1] : memref<1x8x128xbf16, #tpu.memory_space<vmem>>, vector<1x8x128xbf16>
    %1 = vector.shape_cast %0 : vector<1x8x128xbf16> to vector<8x128xbf16>
    %2 = arith.extf %1 : vector<8x128xbf16> to vector<8x128xf32>
    %c0_2 = arith.constant 0 : index
    %c0_3 = arith.constant 0 : index
    %c0_4 = arith.constant 0 : index
    %3 = vector.load %arg2[%c0_2, %c0_3, %c0_4] : memref<1x1x8xf32, #tpu.memory_space<vmem>>, vector<1x1x8xf32>
    %4 = vector.shape_cast %3 : vector<1x1x8xf32> to vector<1x8xf32>
    %c0_5 = arith.constant 0 : index
    %c0_6 = arith.constant 0 : index
    %5 = vector.load %arg3[%c0_5, %c0_6] : memref<128x384xbf16, #tpu.memory_space<vmem>>, vector<128x384xbf16>
    %cst = arith.constant dense<0.000000e+00> : vector<8x384xf32>
    %6 = tpu.matmul %1, %5, %cst {dimension_numbers = #tpu.dot_dimension_numbers<[1], [0], [0], [1], [0, 0, 1, 1], [], []>} : vector<8x128xbf16>, vector<128x384xbf16>, vector<8x384xf32> -> vector<8x384xf32>
    %c0_7 = arith.constant 0 : index
    %c0_8 = arith.constant 0 : index
    %7 = vector.load %arg4[%c0_7, %c0_8] : memref<1x384xf32, #tpu.memory_space<vmem>>, vector<1x384xf32>
    %8 = vector.broadcast %7 : vector<1x384xf32> to vector<8x384xf32>
    %9 = arith.addf %6, %8 : vector<8x384xf32>
    %10 = vector.extract_strided_slice %9 {offsets = [0, 0], sizes = [8, 128], strides = [1, 1]} : vector<8x384xf32> to vector<8x128xf32>
    %11 = vector.extract_strided_slice %9 {offsets = [0, 128], sizes = [8, 128], strides = [1, 1]} : vector<8x384xf32> to vector<8x128xf32>
    %12 = vector.extract_strided_slice %9 {offsets = [0, 256], sizes = [8, 128], strides = [1, 1]} : vector<8x384xf32> to vector<8x128xf32>
    %c0_9 = arith.constant 0 : index
    %c0_10 = arith.constant 0 : index
    %13 = vector.load %arg5[%c0_9, %c0_10] : memref<128x128xbf16, #tpu.memory_space<vmem>>, vector<128x128xbf16>
    %cst_11 = arith.constant 0.000000e+00 : f32
    %14 = vector.broadcast %cst_11 : f32 to vector<8x128xf32>
    %15 = vector.extract_strided_slice %10 {offsets = [0, 0], sizes = [8, 32], strides = [1, 1]} : vector<8x128xf32> to vector<8x32xf32>
    %16 = vector.extract_strided_slice %11 {offsets = [0, 0], sizes = [8, 32], strides = [1, 1]} : vector<8x128xf32> to vector<8x32xf32>
    %17 = vector.extract_strided_slice %12 {offsets = [0, 0], sizes = [8, 32], strides = [1, 1]} : vector<8x128xf32> to vector<8x32xf32>
    %cst_12 = arith.constant dense<0.000000e+00> : vector<8x8xf32>
    %18 = tpu.matmul %15, %16, %cst_12 {dimension_numbers = #tpu.dot_dimension_numbers<[1], [1], [0], [0], [0, 0, 1, 0], [], []>} : vector<8x32xf32>, vector<8x32xf32>, vector<8x8xf32> -> vector<8x8xf32>
    %cst_13 = arith.constant 0.176776692 : f32
    %19 = vector.broadcast %cst_13 : f32 to vector<8x8xf32>
    %20 = arith.mulf %18, %19 : vector<8x8xf32>
    %21 = vector.broadcast %4 : vector<1x8xf32> to vector<8x8xf32>
    %22 = arith.addf %20, %21 : vector<8x8xf32>
    %cst_14 = arith.constant dense<0xFF800000> : vector<8xf32>
    %23 = vector.multi_reduction <maximumf>, %22, %cst_14 [1] : vector<8x8xf32> to vector<8xf32>
    %24 = vector.shape_cast %23 : vector<8xf32> to vector<8x1xf32>
    %25 = vector.broadcast %24 : vector<8x1xf32> to vector<8x8xf32>
    %26 = arith.subf %22, %25 : vector<8x8xf32>
    %27 = math.exp %26 : vector<8x8xf32>
    %cst_15 = arith.constant dense<0.000000e+00> : vector<8xf32>
    %28 = vector.multi_reduction <add>, %27, %cst_15 [1] : vector<8x8xf32> to vector<8xf32>
    %29 = vector.shape_cast %28 : vector<8xf32> to vector<8x1xf32>
    %30 = tpu.reciprocal %29 {approx = true} : vector<8x1xf32> -> vector<8x1xf32>
    %31 = vector.broadcast %30 : vector<8x1xf32> to vector<8x8xf32>
    %32 = arith.mulf %27, %31 : vector<8x8xf32>
    %cst_16 = arith.constant dense<0.000000e+00> : vector<8x32xf32>
    %33 = tpu.matmul %32, %17, %cst_16 {dimension_numbers = #tpu.dot_dimension_numbers<[1], [0], [0], [1], [0, 0, 1, 1], [], []>} : vector<8x8xf32>, vector<8x32xf32>, vector<8x32xf32> -> vector<8x32xf32>
    %34 = arith.truncf %33 : vector<8x32xf32> to vector<8x32xbf16>
    %35 = vector.extract_strided_slice %13 {offsets = [0, 0], sizes = [32, 128], strides = [1, 1]} : vector<128x128xbf16> to vector<32x128xbf16>
    %cst_17 = arith.constant dense<0.000000e+00> : vector<8x128xf32>
    %36 = tpu.matmul %34, %35, %cst_17 {dimension_numbers = #tpu.dot_dimension_numbers<[1], [0], [0], [1], [0, 0, 1, 1], [], []>} : vector<8x32xbf16>, vector<32x128xbf16>, vector<8x128xf32> -> vector<8x128xf32>
    %37 = arith.addf %14, %36 : vector<8x128xf32>
    %38 = vector.extract_strided_slice %10 {offsets = [0, 32], sizes = [8, 32], strides = [1, 1]} : vector<8x128xf32> to vector<8x32xf32>
    %39 = vector.extract_strided_slice %11 {offsets = [0, 32], sizes = [8, 32], strides = [1, 1]} : vector<8x128xf32> to vector<8x32xf32>
    %40 = vector.extract_strided_slice %12 {offsets = [0, 32], sizes = [8, 32], strides = [1, 1]} : vector<8x128xf32> to vector<8x32xf32>
    %cst_18 = arith.constant dense<0.000000e+00> : vector<8x8xf32>
    %41 = tpu.matmul %38, %39, %cst_18 {dimension_numbers = #tpu.dot_dimension_numbers<[1], [1], [0], [0], [0, 0, 1, 0], [], []>} : vector<8x32xf32>, vector<8x32xf32>, vector<8x8xf32> -> vector<8x8xf32>
    %cst_19 = arith.constant 0.176776692 : f32
    %42 = vector.broadcast %cst_19 : f32 to vector<8x8xf32>
    %43 = arith.mulf %41, %42 : vector<8x8xf32>
    %44 = vector.broadcast %4 : vector<1x8xf32> to vector<8x8xf32>
    %45 = arith.addf %43, %44 : vector<8x8xf32>
    %cst_20 = arith.constant dense<0xFF800000> : vector<8xf32>
    %46 = vector.multi_reduction <maximumf>, %45, %cst_20 [1] : vector<8x8xf32> to vector<8xf32>
    %47 = vector.shape_cast %46 : vector<8xf32> to vector<8x1xf32>
    %48 = vector.broadcast %47 : vector<8x1xf32> to vector<8x8xf32>
    %49 = arith.subf %45, %48 : vector<8x8xf32>
    %50 = math.exp %49 : vector<8x8xf32>
    %cst_21 = arith.constant dense<0.000000e+00> : vector<8xf32>
    %51 = vector.multi_reduction <add>, %50, %cst_21 [1] : vector<8x8xf32> to vector<8xf32>
    %52 = vector.shape_cast %51 : vector<8xf32> to vector<8x1xf32>
    %53 = tpu.reciprocal %52 {approx = true} : vector<8x1xf32> -> vector<8x1xf32>
    %54 = vector.broadcast %53 : vector<8x1xf32> to vector<8x8xf32>
    %55 = arith.mulf %50, %54 : vector<8x8xf32>
    %cst_22 = arith.constant dense<0.000000e+00> : vector<8x32xf32>
    %56 = tpu.matmul %55, %40, %cst_22 {dimension_numbers = #tpu.dot_dimension_numbers<[1], [0], [0], [1], [0, 0, 1, 1], [], []>} : vector<8x8xf32>, vector<8x32xf32>, vector<8x32xf32> -> vector<8x32xf32>
    %57 = arith.truncf %56 : vector<8x32xf32> to vector<8x32xbf16>
    %58 = vector.extract_strided_slice %13 {offsets = [32, 0], sizes = [32, 128], strides = [1, 1]} : vector<128x128xbf16> to vector<32x128xbf16>
    %cst_23 = arith.constant dense<0.000000e+00> : vector<8x128xf32>
    %59 = tpu.matmul %57, %58, %cst_23 {dimension_numbers = #tpu.dot_dimension_numbers<[1], [0], [0], [1], [0, 0, 1, 1], [], []>} : vector<8x32xbf16>, vector<32x128xbf16>, vector<8x128xf32> -> vector<8x128xf32>
    %60 = arith.addf %37, %59 : vector<8x128xf32>
    %61 = vector.extract_strided_slice %10 {offsets = [0, 64], sizes = [8, 32], strides = [1, 1]} : vector<8x128xf32> to vector<8x32xf32>
    %62 = vector.extract_strided_slice %11 {offsets = [0, 64], sizes = [8, 32], strides = [1, 1]} : vector<8x128xf32> to vector<8x32xf32>
    %63 = vector.extract_strided_slice %12 {offsets = [0, 64], sizes = [8, 32], strides = [1, 1]} : vector<8x128xf32> to vector<8x32xf32>
    %cst_24 = arith.constant dense<0.000000e+00> : vector<8x8xf32>
    %64 = tpu.matmul %61, %62, %cst_24 {dimension_numbers = #tpu.dot_dimension_numbers<[1], [1], [0], [0], [0, 0, 1, 0], [], []>} : vector<8x32xf32>, vector<8x32xf32>, vector<8x8xf32> -> vector<8x8xf32>
    %cst_25 = arith.constant 0.176776692 : f32
    %65 = vector.broadcast %cst_25 : f32 to vector<8x8xf32>
    %66 = arith.mulf %64, %65 : vector<8x8xf32>
    %67 = vector.broadcast %4 : vector<1x8xf32> to vector<8x8xf32>
    %68 = arith.addf %66, %67 : vector<8x8xf32>
    %cst_26 = arith.constant dense<0xFF800000> : vector<8xf32>
    %69 = vector.multi_reduction <maximumf>, %68, %cst_26 [1] : vector<8x8xf32> to vector<8xf32>
    %70 = vector.shape_cast %69 : vector<8xf32> to vector<8x1xf32>
    %71 = vector.broadcast %70 : vector<8x1xf32> to vector<8x8xf32>
    %72 = arith.subf %68, %71 : vector<8x8xf32>
    %73 = math.exp %72 : vector<8x8xf32>
    %cst_27 = arith.constant dense<0.000000e+00> : vector<8xf32>
    %74 = vector.multi_reduction <add>, %73, %cst_27 [1] : vector<8x8xf32> to vector<8xf32>
    %75 = vector.shape_cast %74 : vector<8xf32> to vector<8x1xf32>
    %76 = tpu.reciprocal %75 {approx = true} : vector<8x1xf32> -> vector<8x1xf32>
    %77 = vector.broadcast %76 : vector<8x1xf32> to vector<8x8xf32>
    %78 = arith.mulf %73, %77 : vector<8x8xf32>
    %cst_28 = arith.constant dense<0.000000e+00> : vector<8x32xf32>
    %79 = tpu.matmul %78, %63, %cst_28 {dimension_numbers = #tpu.dot_dimension_numbers<[1], [0], [0], [1], [0, 0, 1, 1], [], []>} : vector<8x8xf32>, vector<8x32xf32>, vector<8x32xf32> -> vector<8x32xf32>
    %80 = arith.truncf %79 : vector<8x32xf32> to vector<8x32xbf16>
    %81 = vector.extract_strided_slice %13 {offsets = [64, 0], sizes = [32, 128], strides = [1, 1]} : vector<128x128xbf16> to vector<32x128xbf16>
    %cst_29 = arith.constant dense<0.000000e+00> : vector<8x128xf32>
    %82 = tpu.matmul %80, %81, %cst_29 {dimension_numbers = #tpu.dot_dimension_numbers<[1], [0], [0], [1], [0, 0, 1, 1], [], []>} : vector<8x32xbf16>, vector<32x128xbf16>, vector<8x128xf32> -> vector<8x128xf32>
    %83 = arith.addf %60, %82 : vector<8x128xf32>
    %84 = vector.extract_strided_slice %10 {offsets = [0, 96], sizes = [8, 32], strides = [1, 1]} : vector<8x128xf32> to vector<8x32xf32>
    %85 = vector.extract_strided_slice %11 {offsets = [0, 96], sizes = [8, 32], strides = [1, 1]} : vector<8x128xf32> to vector<8x32xf32>
    %86 = vector.extract_strided_slice %12 {offsets = [0, 96], sizes = [8, 32], strides = [1, 1]} : vector<8x128xf32> to vector<8x32xf32>
    %cst_30 = arith.constant dense<0.000000e+00> : vector<8x8xf32>
    %87 = tpu.matmul %84, %85, %cst_30 {dimension_numbers = #tpu.dot_dimension_numbers<[1], [1], [0], [0], [0, 0, 1, 0], [], []>} : vector<8x32xf32>, vector<8x32xf32>, vector<8x8xf32> -> vector<8x8xf32>
    %cst_31 = arith.constant 0.176776692 : f32
    %88 = vector.broadcast %cst_31 : f32 to vector<8x8xf32>
    %89 = arith.mulf %87, %88 : vector<8x8xf32>
    %90 = vector.broadcast %4 : vector<1x8xf32> to vector<8x8xf32>
    %91 = arith.addf %89, %90 : vector<8x8xf32>
    %cst_32 = arith.constant dense<0xFF800000> : vector<8xf32>
    %92 = vector.multi_reduction <maximumf>, %91, %cst_32 [1] : vector<8x8xf32> to vector<8xf32>
    %93 = vector.shape_cast %92 : vector<8xf32> to vector<8x1xf32>
    %94 = vector.broadcast %93 : vector<8x1xf32> to vector<8x8xf32>
    %95 = arith.subf %91, %94 : vector<8x8xf32>
    %96 = math.exp %95 : vector<8x8xf32>
    %cst_33 = arith.constant dense<0.000000e+00> : vector<8xf32>
    %97 = vector.multi_reduction <add>, %96, %cst_33 [1] : vector<8x8xf32> to vector<8xf32>
    %98 = vector.shape_cast %97 : vector<8xf32> to vector<8x1xf32>
    %99 = tpu.reciprocal %98 {approx = true} : vector<8x1xf32> -> vector<8x1xf32>
    %100 = vector.broadcast %99 : vector<8x1xf32> to vector<8x8xf32>
    %101 = arith.mulf %96, %100 : vector<8x8xf32>
    %cst_34 = arith.constant dense<0.000000e+00> : vector<8x32xf32>
    %102 = tpu.matmul %101, %86, %cst_34 {dimension_numbers = #tpu.dot_dimension_numbers<[1], [0], [0], [1], [0, 0, 1, 1], [], []>} : vector<8x8xf32>, vector<8x32xf32>, vector<8x32xf32> -> vector<8x32xf32>
    %103 = arith.truncf %102 : vector<8x32xf32> to vector<8x32xbf16>
    %104 = vector.extract_strided_slice %13 {offsets = [96, 0], sizes = [32, 128], strides = [1, 1]} : vector<128x128xbf16> to vector<32x128xbf16>
    %cst_35 = arith.constant dense<0.000000e+00> : vector<8x128xf32>
    %105 = tpu.matmul %103, %104, %cst_35 {dimension_numbers = #tpu.dot_dimension_numbers<[1], [0], [0], [1], [0, 0, 1, 1], [], []>} : vector<8x32xbf16>, vector<32x128xbf16>, vector<8x128xf32> -> vector<8x128xf32>
    %106 = arith.addf %83, %105 : vector<8x128xf32>
    %c0_36 = arith.constant 0 : index
    %c0_37 = arith.constant 0 : index
    %107 = vector.load %arg6[%c0_36, %c0_37] : memref<1x128xf32, #tpu.memory_space<vmem>>, vector<1x128xf32>
    %108 = vector.broadcast %107 : vector<1x128xf32> to vector<8x128xf32>
    %109 = arith.addf %106, %108 : vector<8x128xf32>
    %110 = arith.addf %2, %109 : vector<8x128xf32>
    %c0_38 = arith.constant 0 : index
    %c0_39 = arith.constant 0 : index
    %111 = vector.load %arg7[%c0_38, %c0_39] : memref<1x128xf32, #tpu.memory_space<vmem>>, vector<1x128xf32>
    %c0_40 = arith.constant 0 : index
    %c0_41 = arith.constant 0 : index
    %112 = vector.load %arg8[%c0_40, %c0_41] : memref<1x128xf32, #tpu.memory_space<vmem>>, vector<1x128xf32>
    %cst_42 = arith.constant dense<0.000000e+00> : vector<8xf32>
    %113 = vector.multi_reduction <add>, %110, %cst_42 [1] : vector<8x128xf32> to vector<8xf32>
    %114 = vector.shape_cast %113 : vector<8xf32> to vector<8x1xf32>
    %cst_43 = arith.constant 1.280000e+02 : f32
    %115 = vector.broadcast %cst_43 : f32 to vector<8x1xf32>
    %116 = arith.divf %114, %115 : vector<8x1xf32>
    %117 = vector.broadcast %116 : vector<8x1xf32> to vector<8x128xf32>
    %118 = arith.subf %110, %117 : vector<8x128xf32>
    %119 = arith.mulf %118, %118 : vector<8x128xf32>
    %cst_44 = arith.constant dense<0.000000e+00> : vector<8xf32>
    %120 = vector.multi_reduction <add>, %119, %cst_44 [1] : vector<8x128xf32> to vector<8xf32>
    %121 = vector.shape_cast %120 : vector<8xf32> to vector<8x1xf32>
    %cst_45 = arith.constant 1.280000e+02 : f32
    %122 = vector.broadcast %cst_45 : f32 to vector<8x1xf32>
    %123 = arith.divf %121, %122 : vector<8x1xf32>
    %124 = vector.broadcast %116 : vector<8x1xf32> to vector<8x128xf32>
    %125 = arith.subf %110, %124 : vector<8x128xf32>
    %cst_46 = arith.constant 9.99999996E-13 : f32
    %126 = vector.broadcast %cst_46 : f32 to vector<8x1xf32>
    %127 = arith.addf %123, %126 : vector<8x1xf32>
    %128 = math.rsqrt %127 : vector<8x1xf32>
    %129 = vector.broadcast %128 : vector<8x1xf32> to vector<8x128xf32>
    %130 = arith.mulf %125, %129 : vector<8x128xf32>
    %131 = vector.broadcast %111 : vector<1x128xf32> to vector<8x128xf32>
    %132 = arith.mulf %130, %131 : vector<8x128xf32>
    %133 = vector.broadcast %112 : vector<1x128xf32> to vector<8x128xf32>
    %134 = arith.addf %132, %133 : vector<8x128xf32>
    %135 = arith.truncf %134 : vector<8x128xf32> to vector<8x128xbf16>
    %c0_47 = arith.constant 0 : index
    %c0_48 = arith.constant 0 : index
    %136 = vector.load %arg9[%c0_47, %c0_48] : memref<128x256xbf16, #tpu.memory_space<vmem>>, vector<128x256xbf16>
    %cst_49 = arith.constant dense<0.000000e+00> : vector<8x256xf32>
    %137 = tpu.matmul %135, %136, %cst_49 {dimension_numbers = #tpu.dot_dimension_numbers<[1], [0], [0], [1], [0, 0, 1, 1], [], []>} : vector<8x128xbf16>, vector<128x256xbf16>, vector<8x256xf32> -> vector<8x256xf32>
    %c0_50 = arith.constant 0 : index
    %c0_51 = arith.constant 0 : index
    %138 = vector.load %arg10[%c0_50, %c0_51] : memref<1x256xf32, #tpu.memory_space<vmem>>, vector<1x256xf32>
    %139 = vector.broadcast %138 : vector<1x256xf32> to vector<8x256xf32>
    %140 = arith.addf %137, %139 : vector<8x256xf32>
    %cst_52 = arith.constant 5.000000e-01 : f32
    %141 = vector.broadcast %cst_52 : f32 to vector<8x256xf32>
    %142 = arith.mulf %141, %140 : vector<8x256xf32>
    %cst_53 = arith.constant 4.471500e-02 : f32
    %143 = vector.broadcast %cst_53 : f32 to vector<8x256xf32>
    %144 = arith.mulf %143, %140 : vector<8x256xf32>
    %145 = arith.mulf %144, %140 : vector<8x256xf32>
    %146 = arith.mulf %145, %140 : vector<8x256xf32>
    %147 = arith.addf %140, %146 : vector<8x256xf32>
    %cst_54 = arith.constant 0.797884583 : f32
    %148 = vector.broadcast %cst_54 : f32 to vector<8x256xf32>
    %149 = arith.mulf %148, %147 : vector<8x256xf32>
    %150 = math.tanh %149 : vector<8x256xf32>
    %cst_55 = arith.constant 1.000000e+00 : f32
    %151 = vector.broadcast %cst_55 : f32 to vector<8x256xf32>
    %152 = arith.addf %151, %150 : vector<8x256xf32>
    %153 = arith.mulf %142, %152 : vector<8x256xf32>
    %154 = arith.truncf %153 : vector<8x256xf32> to vector<8x256xbf16>
    %c0_56 = arith.constant 0 : index
    %c0_57 = arith.constant 0 : index
    %155 = vector.load %arg11[%c0_56, %c0_57] : memref<256x128xbf16, #tpu.memory_space<vmem>>, vector<256x128xbf16>
    %cst_58 = arith.constant dense<0.000000e+00> : vector<8x128xf32>
    %156 = tpu.matmul %154, %155, %cst_58 {dimension_numbers = #tpu.dot_dimension_numbers<[1], [0], [0], [1], [0, 0, 1, 1], [], []>} : vector<8x256xbf16>, vector<256x128xbf16>, vector<8x128xf32> -> vector<8x128xf32>
    %c0_59 = arith.constant 0 : index
    %c0_60 = arith.constant 0 : index
    %157 = vector.load %arg12[%c0_59, %c0_60] : memref<1x128xf32, #tpu.memory_space<vmem>>, vector<1x128xf32>
    %158 = vector.broadcast %157 : vector<1x128xf32> to vector<8x128xf32>
    %159 = arith.addf %156, %158 : vector<8x128xf32>
    %160 = arith.addf %134, %159 : vector<8x128xf32>
    %c0_61 = arith.constant 0 : index
    %c0_62 = arith.constant 0 : index
    %161 = vector.load %arg13[%c0_61, %c0_62] : memref<1x128xf32, #tpu.memory_space<vmem>>, vector<1x128xf32>
    %c0_63 = arith.constant 0 : index
    %c0_64 = arith.constant 0 : index
    %162 = vector.load %arg14[%c0_63, %c0_64] : memref<1x128xf32, #tpu.memory_space<vmem>>, vector<1x128xf32>
    %cst_65 = arith.constant dense<0.000000e+00> : vector<8xf32>
    %163 = vector.multi_reduction <add>, %160, %cst_65 [1] : vector<8x128xf32> to vector<8xf32>
    %164 = vector.shape_cast %163 : vector<8xf32> to vector<8x1xf32>
    %cst_66 = arith.constant 1.280000e+02 : f32
    %165 = vector.broadcast %cst_66 : f32 to vector<8x1xf32>
    %166 = arith.divf %164, %165 : vector<8x1xf32>
    %167 = vector.broadcast %166 : vector<8x1xf32> to vector<8x128xf32>
    %168 = arith.subf %160, %167 : vector<8x128xf32>
    %169 = arith.mulf %168, %168 : vector<8x128xf32>
    %cst_67 = arith.constant dense<0.000000e+00> : vector<8xf32>
    %170 = vector.multi_reduction <add>, %169, %cst_67 [1] : vector<8x128xf32> to vector<8xf32>
    %171 = vector.shape_cast %170 : vector<8xf32> to vector<8x1xf32>
    %cst_68 = arith.constant 1.280000e+02 : f32
    %172 = vector.broadcast %cst_68 : f32 to vector<8x1xf32>
    %173 = arith.divf %171, %172 : vector<8x1xf32>
    %174 = vector.broadcast %166 : vector<8x1xf32> to vector<8x128xf32>
    %175 = arith.subf %160, %174 : vector<8x128xf32>
    %cst_69 = arith.constant 9.99999996E-13 : f32
    %176 = vector.broadcast %cst_69 : f32 to vector<8x1xf32>
    %177 = arith.addf %173, %176 : vector<8x1xf32>
    %178 = math.rsqrt %177 : vector<8x1xf32>
    %179 = vector.broadcast %178 : vector<8x1xf32> to vector<8x128xf32>
    %180 = arith.mulf %175, %179 : vector<8x128xf32>
    %181 = vector.broadcast %161 : vector<1x128xf32> to vector<8x128xf32>
    %182 = arith.mulf %180, %181 : vector<8x128xf32>
    %183 = vector.broadcast %162 : vector<1x128xf32> to vector<8x128xf32>
    %184 = arith.addf %182, %183 : vector<8x128xf32>
    %185 = arith.truncf %184 : vector<8x128xf32> to vector<8x128xbf16>
    %186 = vector.shape_cast %185 : vector<8x128xbf16> to vector<1x8x128xbf16>
    %c0_70 = arith.constant 0 : index
    %c0_71 = arith.constant 0 : index
    %c0_72 = arith.constant 0 : index
    %187 = vector.load %arg15[%c0_70, %c0_71, %c0_72] : memref<1x8x128xbf16, #tpu.memory_space<vmem>>, vector<1x8x128xbf16>
    tpu.vector_store %arg15[%c0_70, %c0_71, %c0_72], %186 {strides = array<i32>} : memref<1x8x128xbf16, #tpu.memory_space<vmem>>, vector<1x8x128xbf16>,
    return
  }
  func.func @transform_0(%arg0: i32) -> (i32, i32, i32) {
    %c0_i32 = arith.constant 0 : i32
    %c0_i32_0 = arith.constant 0 : i32
    %c0_i32_1 = arith.constant 0 : i32
    return %arg0, %c0_i32, %c0_i32_0 : i32, i32, i32
  }
  func.func @transform_1(%arg0: i32) -> (i32, i32, i32) {
    %c0_i32 = arith.constant 0 : i32
    %c0_i32_0 = arith.constant 0 : i32
    %c0_i32_1 = arith.constant 0 : i32
    return %arg0, %c0_i32, %c0_i32_0 : i32, i32, i32
  }
  func.func @transform_2(%arg0: i32) -> (i32, i32) {
    %c0_i32 = arith.constant 0 : i32
    %c0_i32_0 = arith.constant 0 : i32
    %c0_i32_1 = arith.constant 0 : i32
    return %c0_i32, %c0_i32_0 : i32, i32
  }
  func.func @transform_3(%arg0: i32) -> (i32, i32) {
    %c0_i32 = arith.constant 0 : i32
    %c0_i32_0 = arith.constant 0 : i32
    %c0_i32_1 = arith.constant 0 : i32
    return %c0_i32, %c0_i32_0 : i32, i32
  }
  func.func @transform_4(%arg0: i32) -> (i32, i32) {
    %c0_i32 = arith.constant 0 : i32
    %c0_i32_0 = arith.constant 0 : i32
    %c0_i32_1 = arith.constant 0 : i32
    return %c0_i32, %c0_i32_0 : i32, i32
  }
  func.func @transform_5(%arg0: i32) -> (i32, i32) {
    %c0_i32 = arith.constant 0 : i32
    %c0_i32_0 = arith.constant 0 : i32
    %c0_i32_1 = arith.constant 0 : i32
    return %c0_i32, %c0_i32_0 : i32, i32
  }
  func.func @transform_6(%arg0: i32) -> (i32, i32) {
    %c0_i32 = arith.constant 0 : i32
    %c0_i32_0 = arith.constant 0 : i32
    %c0_i32_1 = arith.constant 0 : i32
    return %c0_i32, %c0_i32_0 : i32, i32
  }
  func.func @transform_7(%arg0: i32) -> (i32, i32) {
    %c0_i32 = arith.constant 0 : i32
    %c0_i32_0 = arith.constant 0 : i32
    %c0_i32_1 = arith.constant 0 : i32
    return %c0_i32, %c0_i32_0 : i32, i32
  }
  func.func @transform_8(%arg0: i32) -> (i32, i32) {
    %c0_i32 = arith.constant 0 : i32
    %c0_i32_0 = arith.constant 0 : i32
    %c0_i32_1 = arith.constant 0 : i32
    return %c0_i32, %c0_i32_0 : i32, i32
  }
  func.func @transform_9(%arg0: i32) -> (i32, i32) {
    %c0_i32 = arith.constant 0 : i32
    %c0_i32_0 = arith.constant 0 : i32
    %c0_i32_1 = arith.constant 0 : i32
    return %c0_i32, %c0_i32_0 : i32, i32
  }
  func.func @transform_10(%arg0: i32) -> (i32, i32) {
    %c0_i32 = arith.constant 0 : i32
    %c0_i32_0 = arith.constant 0 : i32
    %c0_i32_1 = arith.constant 0 : i32
    return %c0_i32, %c0_i32_0 : i32, i32
  }
  func.func @transform_11(%arg0: i32) -> (i32, i32) {
    %c0_i32 = arith.constant 0 : i32
    %c0_i32_0 = arith.constant 0 : i32
    %c0_i32_1 = arith.constant 0 : i32
    return %c0_i32, %c0_i32_0 : i32, i32
  }
  func.func @transform_12(%arg0: i32) -> (i32, i32) {
    %c0_i32 = arith.constant 0 : i32
    %c0_i32_0 = arith.constant 0 : i32
    %c0_i32_1 = arith.constant 0 : i32
    return %c0_i32, %c0_i32_0 : i32, i32
  }
  func.func @transform_13(%arg0: i32) -> (i32, i32) {
    %c0_i32 = arith.constant 0 : i32
    %c0_i32_0 = arith.constant 0 : i32
    %c0_i32_1 = arith.constant 0 : i32
    return %c0_i32, %c0_i32_0 : i32, i32
  }
  func.func @transform_14(%arg0: i32) -> (i32, i32, i32) {
    %c0_i32 = arith.constant 0 : i32
    %c0_i32_0 = arith.constant 0 : i32
    %c0_i32_1 = arith.constant 0 : i32
    return %arg0, %c0_i32, %c0_i32_0 : i32, i32, i32
  }
}

module attributes {stable_mosaic.version = 11 : i64} {
  func.func @_encoder_layer_kernel(%arg0: i32, %arg1: memref<1x8x128xbf16, #tpu.memory_space<vmem>>, %arg2: memref<1x1x8xf32, #tpu.memory_space<vmem>>, %arg3: memref<128x384xbf16, #tpu.memory_space<vmem>>, %arg4: memref<1x384xf32, #tpu.memory_space<vmem>>, %arg5: memref<128x128xbf16, #tpu.memory_space<vmem>>, %arg6: memref<1x128xf32, #tpu.memory_space<vmem>>, %arg7: memref<1x128xf32, #tpu.memory_space<vmem>>, %arg8: memref<1x128xf32, #tpu.memory_space<vmem>>, %arg9: memref<128x256xbf16, #tpu.memory_space<vmem>>, %arg10: memref<1x256xf32, #tpu.memory_space<vmem>>, %arg11: memref<256x128xbf16, #tpu.memory_space<vmem>>, %arg12: memref<1x128xf32, #tpu.memory_space<vmem>>, %arg13: memref<1x128xf32, #tpu.memory_space<vmem>>, %arg14: memref<1x128xf32, #tpu.memory_space<vmem>>, %arg15: memref<1x8x128xbf16, #tpu.memory_space<vmem>>) attributes {dimension_semantics = [#tpu.dimension_semantics<parallel>], iteration_bounds = array<i64: 2>, scalar_prefetch = 0 : i64, scratch_operands = 0 : i64, tpu.core_type = #tpu.core_type<tc>, window_params = [{transform_indices = @transform_0, window_bounds = array<i64: 1, 8, 128>}, {transform_indices = @transform_1, window_bounds = array<i64: 1, 1, 8>}, {pipeline_mode = #tpu.pipeline_mode<synchronous>, transform_indices = @transform_2, window_bounds = array<i64: 128, 384>}, {pipeline_mode = #tpu.pipeline_mode<synchronous>, transform_indices = @transform_3, window_bounds = array<i64: 1, 384>}, {pipeline_mode = #tpu.pipeline_mode<synchronous>, transform_indices = @transform_4, window_bounds = array<i64: 128, 128>}, {pipeline_mode = #tpu.pipeline_mode<synchronous>, transform_indices = @transform_5, window_bounds = array<i64: 1, 128>}, {pipeline_mode = #tpu.pipeline_mode<synchronous>, transform_indices = @transform_6, window_bounds = array<i64: 1, 128>}, {pipeline_mode = #tpu.pipeline_mode<synchronous>, transform_indices = @transform_7, window_bounds = array<i64: 1, 128>}, {pipeline_mode = #tpu.pipeline_mode<synchronous>, transform_indices = @transform_8, window_bounds = array<i64: 128, 256>}, {pipeline_mode = #tpu.pipeline_mode<synchronous>, transform_indices = @transform_9, window_bounds = array<i64: 1, 256>}, {pipeline_mode = #tpu.pipeline_mode<synchronous>, transform_indices = @transform_10, window_bounds = array<i64: 256, 128>}, {pipeline_mode = #tpu.pipeline_mode<synchronous>, transform_indices = @transform_11, window_bounds = array<i64: 1, 128>}, {pipeline_mode = #tpu.pipeline_mode<synchronous>, transform_indices = @transform_12, window_bounds = array<i64: 1, 128>}, {pipeline_mode = #tpu.pipeline_mode<synchronous>, transform_indices = @transform_13, window_bounds = array<i64: 1, 128>}, {transform_indices = @transform_14, window_bounds = array<i64: 1, 8, 128>}]} {
    %c0 = arith.constant 0 : index
    %c0_0 = arith.constant 0 : index
    %c0_1 = arith.constant 0 : index
    %0 = vector.load %arg1[%c0, %c0_0, %c0_1] : memref<1x8x128xbf16, #tpu.memory_space<vmem>>, vector<1x8x128xbf16>
    %1 = vector.shape_cast %0 : vector<1x8x128xbf16> to vector<8x128xbf16>
    %2 = arith.extf %1 : vector<8x128xbf16> to vector<8x128xf32>
    %c0_2 = arith.constant 0 : index
    %c0_3 = arith.constant 0 : index
    %c0_4 = arith.constant 0 : index
    %3 = vector.load %arg2[%c0_2, %c0_3, %c0_4] : memref<1x1x8xf32, #tpu.memory_space<vmem>>, vector<1x1x8xf32>
    %4 = vector.shape_cast %3 : vector<1x1x8xf32> to vector<1x8xf32>
    %c0_5 = arith.constant 0 : index
    %c0_6 = arith.constant 0 : index
    %5 = vector.load %arg3[%c0_5, %c0_6] : memref<128x384xbf16, #tpu.memory_space<vmem>>, vector<128x384xbf16>
    %cst = arith.constant dense<0.000000e+00> : vector<8x384xf32>
    %6 = tpu.matmul %1, %5, %cst {dimension_numbers = #tpu.dot_dimension_numbers<[1], [0], [0], [1], [0, 0, 1, 1], [], []>} : vector<8x128xbf16>, vector<128x384xbf16>, vector<8x384xf32> -> vector<8x384xf32>
    %c0_7 = arith.constant 0 : index
    %c0_8 = arith.constant 0 : index
    %7 = vector.load %arg4[%c0_7, %c0_8] : memref<1x384xf32, #tpu.memory_space<vmem>>, vector<1x384xf32>
    %8 = vector.broadcast %7 : vector<1x384xf32> to vector<8x384xf32>
    %9 = arith.addf %6, %8 : vector<8x384xf32>
    %10 = vector.extract_strided_slice %9 {offsets = [0, 0], sizes = [8, 128], strides = [1, 1]} : vector<8x384xf32> to vector<8x128xf32>
    %11 = vector.extract_strided_slice %9 {offsets = [0, 128], sizes = [8, 128], strides = [1, 1]} : vector<8x384xf32> to vector<8x128xf32>
    %12 = vector.extract_strided_slice %9 {offsets = [0, 256], sizes = [8, 128], strides = [1, 1]} : vector<8x384xf32> to vector<8x128xf32>
    %c0_9 = arith.constant 0 : index
    %c0_10 = arith.constant 0 : index
    %13 = vector.load %arg5[%c0_9, %c0_10] : memref<128x128xbf16, #tpu.memory_space<vmem>>, vector<128x128xbf16>
    %cst_11 = arith.constant 0.000000e+00 : f32
    %14 = vector.broadcast %cst_11 : f32 to vector<8x128xf32>
    %15 = vector.extract_strided_slice %10 {offsets = [0, 0], sizes = [8, 32], strides = [1, 1]} : vector<8x128xf32> to vector<8x32xf32>
    %16 = vector.extract_strided_slice %11 {offsets = [0, 0], sizes = [8, 32], strides = [1, 1]} : vector<8x128xf32> to vector<8x32xf32>
    %17 = vector.extract_strided_slice %12 {offsets = [0, 0], sizes = [8, 32], strides = [1, 1]} : vector<8x128xf32> to vector<8x32xf32>
    %cst_12 = arith.constant dense<0.000000e+00> : vector<8x8xf32>
    %18 = tpu.matmul %15, %16, %cst_12 {dimension_numbers = #tpu.dot_dimension_numbers<[1], [1], [0], [0], [0, 0, 1, 0], [], []>} : vector<8x32xf32>, vector<8x32xf32>, vector<8x8xf32> -> vector<8x8xf32>
    %cst_13 = arith.constant 0.176776692 : f32
    %19 = vector.broadcast %cst_13 : f32 to vector<8x8xf32>
    %20 = arith.mulf %18, %19 : vector<8x8xf32>
    %21 = vector.broadcast %4 : vector<1x8xf32> to vector<8x8xf32>
    %22 = arith.addf %20, %21 : vector<8x8xf32>
    %cst_14 = arith.constant dense<0xFF800000> : vector<8xf32>
    %23 = vector.multi_reduction <maximumf>, %22, %cst_14 [1] : vector<8x8xf32> to vector<8xf32>
    %24 = vector.shape_cast %23 : vector<8xf32> to vector<8x1xf32>
    %25 = vector.broadcast %24 : vector<8x1xf32> to vector<8x8xf32>
    %26 = arith.subf %22, %25 : vector<8x8xf32>
    %27 = math.exp %26 : vector<8x8xf32>
    %cst_15 = arith.constant dense<0.000000e+00> : vector<8xf32>
    %28 = vector.multi_reduction <add>, %27, %cst_15 [1] : vector<8x8xf32> to vector<8xf32>
    %29 = vector.shape_cast %28 : vector<8xf32> to vector<8x1xf32>
    %30 = tpu.reciprocal %29 {approx = true} : vector<8x1xf32> -> vector<8x1xf32>
    %31 = vector.broadcast %30 : vector<8x1xf32> to vector<8x8xf32>
    %32 = arith.mulf %27, %31 : vector<8x8xf32>
    %cst_16 = arith.constant dense<0.000000e+00> : vector<8x32xf32>
    %33 = tpu.matmul %32, %17, %cst_16 {dimension_numbers = #tpu.dot_dimension_numbers<[1], [0], [0], [1], [0, 0, 1, 1], [], []>} : vector<8x8xf32>, vector<8x32xf32>, vector<8x32xf32> -> vector<8x32xf32>
    %34 = arith.truncf %33 : vector<8x32xf32> to vector<8x32xbf16>
    %35 = vector.extract_strided_slice %13 {offsets = [0, 0], sizes = [32, 128], strides = [1, 1]} : vector<128x128xbf16> to vector<32x128xbf16>
    %cst_17 = arith.constant dense<0.000000e+00> : vector<8x128xf32>
    %36 = tpu.matmul %34, %35, %cst_17 {dimension_numbers = #tpu.dot_dimension_numbers<[1], [0], [0], [1], [0, 0, 1, 1], [], []>} : vector<8x32xbf16>, vector<32x128xbf16>, vector<8x128xf32> -> vector<8x128xf32>
    %37 = arith.addf %14, %36 : vector<8x128xf32>
    %38 = vector.extract_strided_slice %10 {offsets = [0, 32], sizes = [8, 32], strides = [1, 1]} : vector<8x128xf32> to vector<8x32xf32>
    %39 = vector.extract_strided_slice %11 {offsets = [0, 32], sizes = [8, 32], strides = [1, 1]} : vector<8x128xf32> to vector<8x32xf32>
    %40 = vector.extract_strided_slice %12 {offsets = [0, 32], sizes = [8, 32], strides = [1, 1]} : vector<8x128xf32> to vector<8x32xf32>
    %cst_18 = arith.constant dense<0.000000e+00> : vector<8x8xf32>
    %41 = tpu.matmul %38, %39, %cst_18 {dimension_numbers = #tpu.dot_dimension_numbers<[1], [1], [0], [0], [0, 0, 1, 0], [], []>} : vector<8x32xf32>, vector<8x32xf32>, vector<8x8xf32> -> vector<8x8xf32>
    %cst_19 = arith.constant 0.176776692 : f32
    %42 = vector.broadcast %cst_19 : f32 to vector<8x8xf32>
    %43 = arith.mulf %41, %42 : vector<8x8xf32>
    %44 = vector.broadcast %4 : vector<1x8xf32> to vector<8x8xf32>
    %45 = arith.addf %43, %44 : vector<8x8xf32>
    %cst_20 = arith.constant dense<0xFF800000> : vector<8xf32>
    %46 = vector.multi_reduction <maximumf>, %45, %cst_20 [1] : vector<8x8xf32> to vector<8xf32>
    %47 = vector.shape_cast %46 : vector<8xf32> to vector<8x1xf32>
    %48 = vector.broadcast %47 : vector<8x1xf32> to vector<8x8xf32>
    %49 = arith.subf %45, %48 : vector<8x8xf32>
    %50 = math.exp %49 : vector<8x8xf32>
    %cst_21 = arith.constant dense<0.000000e+00> : vector<8xf32>
    %51 = vector.multi_reduction <add>, %50, %cst_21 [1] : vector<8x8xf32> to vector<8xf32>
    %52 = vector.shape_cast %51 : vector<8xf32> to vector<8x1xf32>
    %53 = tpu.reciprocal %52 {approx = true} : vector<8x1xf32> -> vector<8x1xf32>
    %54 = vector.broadcast %53 : vector<8x1xf32> to vector<8x8xf32>
    %55 = arith.mulf %50, %54 : vector<8x8xf32>
    %cst_22 = arith.constant dense<0.000000e+00> : vector<8x32xf32>
    %56 = tpu.matmul %55, %40, %cst_22 {dimension_numbers = #tpu.dot_dimension_numbers<[1], [0], [0], [1], [0, 0, 1, 1], [], []>} : vector<8x8xf32>, vector<8x32xf32>, vector<8x32xf32> -> vector<8x32xf32>
    %57 = arith.truncf %56 : vector<8x32xf32> to vector<8x32xbf16>
    %58 = vector.extract_strided_slice %13 {offsets = [32, 0], sizes = [32, 128], strides = [1, 1]} : vector<128x128xbf16> to vector<32x128xbf16>
    %cst_23 = arith.constant dense<0.000000e+00> : vector<8x128xf32>
    %59 = tpu.matmul %57, %58, %cst_23 {dimension_numbers = #tpu.dot_dimension_numbers<[1], [0], [0], [1], [0, 0, 1, 1], [], []>} : vector<8x32xbf16>, vector<32x128xbf16>, vector<8x128xf32> -> vector<8x128xf32>
    %60 = arith.addf %37, %59 : vector<8x128xf32>
    %61 = vector.extract_strided_slice %10 {offsets = [0, 64], sizes = [8, 32], strides = [1, 1]} : vector<8x128xf32> to vector<8x32xf32>
    %62 = vector.extract_strided_slice %11 {offsets = [0, 64], sizes = [8, 32], strides = [1, 1]} : vector<8x128xf32> to vector<8x32xf32>
    %63 = vector.extract_strided_slice %12 {offsets = [0, 64], sizes = [8, 32], strides = [1, 1]} : vector<8x128xf32> to vector<8x32xf32>
    %cst_24 = arith.constant dense<0.000000e+00> : vector<8x8xf32>
    %64 = tpu.matmul %61, %62, %cst_24 {dimension_numbers = #tpu.dot_dimension_numbers<[1], [1], [0], [0], [0, 0, 1, 0], [], []>} : vector<8x32xf32>, vector<8x32xf32>, vector<8x8xf32> -> vector<8x8xf32>
    %cst_25 = arith.constant 0.176776692 : f32
    %65 = vector.broadcast %cst_25 : f32 to vector<8x8xf32>
    %66 = arith.mulf %64, %65 : vector<8x8xf32>
    %67 = vector.broadcast %4 : vector<1x8xf32> to vector<8x8xf32>
    %68 = arith.addf %66, %67 : vector<8x8xf32>
    %cst_26 = arith.constant dense<0xFF800000> : vector<8xf32>
    %69 = vector.multi_reduction <maximumf>, %68, %cst_26 [1] : vector<8x8xf32> to vector<8xf32>
    %70 = vector.shape_cast %69 : vector<8xf32> to vector<8x1xf32>
    %71 = vector.broadcast %70 : vector<8x1xf32> to vector<8x8xf32>
    %72 = arith.subf %68, %71 : vector<8x8xf32>
    %73 = math.exp %72 : vector<8x8xf32>
    %cst_27 = arith.constant dense<0.000000e+00> : vector<8xf32>
    %74 = vector.multi_reduction <add>, %73, %cst_27 [1] : vector<8x8xf32> to vector<8xf32>
    %75 = vector.shape_cast %74 : vector<8xf32> to vector<8x1xf32>
    %76 = tpu.reciprocal %75 {approx = true} : vector<8x1xf32> -> vector<8x1xf32>
    %77 = vector.broadcast %76 : vector<8x1xf32> to vector<8x8xf32>
    %78 = arith.mulf %73, %77 : vector<8x8xf32>
    %cst_28 = arith.constant dense<0.000000e+00> : vector<8x32xf32>
    %79 = tpu.matmul %78, %63, %cst_28 {dimension_numbers = #tpu.dot_dimension_numbers<[1], [0], [0], [1], [0, 0, 1, 1], [], []>} : vector<8x8xf32>, vector<8x32xf32>, vector<8x32xf32> -> vector<8x32xf32>
    %80 = arith.truncf %79 : vector<8x32xf32> to vector<8x32xbf16>
    %81 = vector.extract_strided_slice %13 {offsets = [64, 0], sizes = [32, 128], strides = [1, 1]} : vector<128x128xbf16> to vector<32x128xbf16>
    %cst_29 = arith.constant dense<0.000000e+00> : vector<8x128xf32>
    %82 = tpu.matmul %80, %81, %cst_29 {dimension_numbers = #tpu.dot_dimension_numbers<[1], [0], [0], [1], [0, 0, 1, 1], [], []>} : vector<8x32xbf16>, vector<32x128xbf16>, vector<8x128xf32> -> vector<8x128xf32>
    %83 = arith.addf %60, %82 : vector<8x128xf32>
    %84 = vector.extract_strided_slice %10 {offsets = [0, 96], sizes = [8, 32], strides = [1, 1]} : vector<8x128xf32> to vector<8x32xf32>
    %85 = vector.extract_strided_slice %11 {offsets = [0, 96], sizes = [8, 32], strides = [1, 1]} : vector<8x128xf32> to vector<8x32xf32>
    %86 = vector.extract_strided_slice %12 {offsets = [0, 96], sizes = [8, 32], strides = [1, 1]} : vector<8x128xf32> to vector<8x32xf32>
    %cst_30 = arith.constant dense<0.000000e+00> : vector<8x8xf32>
    %87 = tpu.matmul %84, %85, %cst_30 {dimension_numbers = #tpu.dot_dimension_numbers<[1], [1], [0], [0], [0, 0, 1, 0], [], []>} : vector<8x32xf32>, vector<8x32xf32>, vector<8x8xf32> -> vector<8x8xf32>
    %cst_31 = arith.constant 0.176776692 : f32
    %88 = vector.broadcast %cst_31 : f32 to vector<8x8xf32>
    %89 = arith.mulf %87, %88 : vector<8x8xf32>
    %90 = vector.broadcast %4 : vector<1x8xf32> to vector<8x8xf32>
    %91 = arith.addf %89, %90 : vector<8x8xf32>
    %cst_32 = arith.constant dense<0xFF800000> : vector<8xf32>
    %92 = vector.multi_reduction <maximumf>, %91, %cst_32 [1] : vector<8x8xf32> to vector<8xf32>
    %93 = vector.shape_cast %92 : vector<8xf32> to vector<8x1xf32>
    %94 = vector.broadcast %93 : vector<8x1xf32> to vector<8x8xf32>
    %95 = arith.subf %91, %94 : vector<8x8xf32>
    %96 = math.exp %95 : vector<8x8xf32>
    %cst_33 = arith.constant dense<0.000000e+00> : vector<8xf32>
    %97 = vector.multi_reduction <add>, %96, %cst_33 [1] : vector<8x8xf32> to vector<8xf32>
    %98 = vector.shape_cast %97 : vector<8xf32> to vector<8x1xf32>
    %99 = tpu.reciprocal %98 {approx = true} : vector<8x1xf32> -> vector<8x1xf32>
    %100 = vector.broadcast %99 : vector<8x1xf32> to vector<8x8xf32>
    %101 = arith.mulf %96, %100 : vector<8x8xf32>
    %cst_34 = arith.constant dense<0.000000e+00> : vector<8x32xf32>
    %102 = tpu.matmul %101, %86, %cst_34 {dimension_numbers = #tpu.dot_dimension_numbers<[1], [0], [0], [1], [0, 0, 1, 1], [], []>} : vector<8x8xf32>, vector<8x32xf32>, vector<8x32xf32> -> vector<8x32xf32>
    %103 = arith.truncf %102 : vector<8x32xf32> to vector<8x32xbf16>
    %104 = vector.extract_strided_slice %13 {offsets = [96, 0], sizes = [32, 128], strides = [1, 1]} : vector<128x128xbf16> to vector<32x128xbf16>
    %cst_35 = arith.constant dense<0.000000e+00> : vector<8x128xf32>
    %105 = tpu.matmul %103, %104, %cst_35 {dimension_numbers = #tpu.dot_dimension_numbers<[1], [0], [0], [1], [0, 0, 1, 1], [], []>} : vector<8x32xbf16>, vector<32x128xbf16>, vector<8x128xf32> -> vector<8x128xf32>
    %106 = arith.addf %83, %105 : vector<8x128xf32>
    %c0_36 = arith.constant 0 : index
    %c0_37 = arith.constant 0 : index
    %107 = vector.load %arg6[%c0_36, %c0_37] : memref<1x128xf32, #tpu.memory_space<vmem>>, vector<1x128xf32>
    %108 = vector.broadcast %107 : vector<1x128xf32> to vector<8x128xf32>
    %109 = arith.addf %106, %108 : vector<8x128xf32>
    %110 = arith.addf %2, %109 : vector<8x128xf32>
    %c0_38 = arith.constant 0 : index
    %c0_39 = arith.constant 0 : index
    %111 = vector.load %arg7[%c0_38, %c0_39] : memref<1x128xf32, #tpu.memory_space<vmem>>, vector<1x128xf32>
    %c0_40 = arith.constant 0 : index
    %c0_41 = arith.constant 0 : index
    %112 = vector.load %arg8[%c0_40, %c0_41] : memref<1x128xf32, #tpu.memory_space<vmem>>, vector<1x128xf32>
    %cst_42 = arith.constant dense<0.000000e+00> : vector<8xf32>
    %113 = vector.multi_reduction <add>, %110, %cst_42 [1] : vector<8x128xf32> to vector<8xf32>
    %114 = vector.shape_cast %113 : vector<8xf32> to vector<8x1xf32>
    %cst_43 = arith.constant 1.280000e+02 : f32
    %115 = vector.broadcast %cst_43 : f32 to vector<8x1xf32>
    %116 = arith.divf %114, %115 : vector<8x1xf32>
    %117 = vector.broadcast %116 : vector<8x1xf32> to vector<8x128xf32>
    %118 = arith.subf %110, %117 : vector<8x128xf32>
    %119 = arith.mulf %118, %118 : vector<8x128xf32>
    %cst_44 = arith.constant dense<0.000000e+00> : vector<8xf32>
    %120 = vector.multi_reduction <add>, %119, %cst_44 [1] : vector<8x128xf32> to vector<8xf32>
    %121 = vector.shape_cast %120 : vector<8xf32> to vector<8x1xf32>
    %cst_45 = arith.constant 1.280000e+02 : f32
    %122 = vector.broadcast %cst_45 : f32 to vector<8x1xf32>
    %123 = arith.divf %121, %122 : vector<8x1xf32>
    %124 = vector.broadcast %116 : vector<8x1xf32> to vector<8x128xf32>
    %125 = arith.subf %110, %124 : vector<8x128xf32>
    %cst_46 = arith.constant 9.99999996E-13 : f32
    %126 = vector.broadcast %cst_46 : f32 to vector<8x1xf32>
    %127 = arith.addf %123, %126 : vector<8x1xf32>
    %128 = math.rsqrt %127 : vector<8x1xf32>
    %129 = vector.broadcast %128 : vector<8x1xf32> to vector<8x128xf32>
    %130 = arith.mulf %125, %129 : vector<8x128xf32>
    %131 = vector.broadcast %111 : vector<1x128xf32> to vector<8x128xf32>
    %132 = arith.mulf %130, %131 : vector<8x128xf32>
    %133 = vector.broadcast %112 : vector<1x128xf32> to vector<8x128xf32>
    %134 = arith.addf %132, %133 : vector<8x128xf32>
    %135 = arith.truncf %134 : vector<8x128xf32> to vector<8x128xbf16>
    %c0_47 = arith.constant 0 : index
    %c0_48 = arith.constant 0 : index
    %136 = vector.load %arg9[%c0_47, %c0_48] : memref<128x256xbf16, #tpu.memory_space<vmem>>, vector<128x256xbf16>
    %cst_49 = arith.constant dense<0.000000e+00> : vector<8x256xf32>
    %137 = tpu.matmul %135, %136, %cst_49 {dimension_numbers = #tpu.dot_dimension_numbers<[1], [0], [0], [1], [0, 0, 1, 1], [], []>} : vector<8x128xbf16>, vector<128x256xbf16>, vector<8x256xf32> -> vector<8x256xf32>
    %c0_50 = arith.constant 0 : index
    %c0_51 = arith.constant 0 : index
    %138 = vector.load %arg10[%c0_50, %c0_51] : memref<1x256xf32, #tpu.memory_space<vmem>>, vector<1x256xf32>
    %139 = vector.broadcast %138 : vector<1x256xf32> to vector<8x256xf32>
    %140 = arith.addf %137, %139 : vector<8x256xf32>
    %cst_52 = arith.constant 5.000000e-01 : f32
    %141 = vector.broadcast %cst_52 : f32 to vector<8x256xf32>
    %142 = arith.mulf %141, %140 : vector<8x256xf32>
    %cst_53 = arith.constant 4.471500e-02 : f32
    %143 = vector.broadcast %cst_53 : f32 to vector<8x256xf32>
    %144 = arith.mulf %143, %140 : vector<8x256xf32>
    %145 = arith.mulf %144, %140 : vector<8x256xf32>
    %146 = arith.mulf %145, %140 : vector<8x256xf32>
    %147 = arith.addf %140, %146 : vector<8x256xf32>
    %cst_54 = arith.constant 0.797884583 : f32
    %148 = vector.broadcast %cst_54 : f32 to vector<8x256xf32>
    %149 = arith.mulf %148, %147 : vector<8x256xf32>
    %150 = math.tanh %149 : vector<8x256xf32>
    %cst_55 = arith.constant 1.000000e+00 : f32
    %151 = vector.broadcast %cst_55 : f32 to vector<8x256xf32>
    %152 = arith.addf %151, %150 : vector<8x256xf32>
    %153 = arith.mulf %142, %152 : vector<8x256xf32>
    %154 = arith.truncf %153 : vector<8x256xf32> to vector<8x256xbf16>
    %c0_56 = arith.constant 0 : index
    %c0_57 = arith.constant 0 : index
    %155 = vector.load %arg11[%c0_56, %c0_57] : memref<256x128xbf16, #tpu.memory_space<vmem>>, vector<256x128xbf16>
    %cst_58 = arith.constant dense<0.000000e+00> : vector<8x128xf32>
    %156 = tpu.matmul %154, %155, %cst_58 {dimension_numbers = #tpu.dot_dimension_numbers<[1], [0], [0], [1], [0, 0, 1, 1], [], []>} : vector<8x256xbf16>, vector<256x128xbf16>, vector<8x128xf32> -> vector<8x128xf32>
    %c0_59 = arith.constant 0 : index
    %c0_60 = arith.constant 0 : index
    %157 = vector.load %arg12[%c0_59, %c0_60] : memref<1x128xf32, #tpu.memory_space<vmem>>, vector<1x128xf32>
    %158 = vector.broadcast %157 : vector<1x128xf32> to vector<8x128xf32>
    %159 = arith.addf %156, %158 : vector<8x128xf32>
    %160 = arith.addf %134, %159 : vector<8x128xf32>
    %c0_61 = arith.constant 0 : index
    %c0_62 = arith.constant 0 : index
    %161 = vector.load %arg13[%c0_61, %c0_62] : memref<1x128xf32, #tpu.memory_space<vmem>>, vector<1x128xf32>
    %c0_63 = arith.constant 0 : index
    %c0_64 = arith.constant 0 : index
    %162 = vector.load %arg14[%c0_63, %c0_64] : memref<1x128xf32, #tpu.memory_space<vmem>>, vector<1x128xf32>
    %cst_65 = arith.constant dense<0.000000e+00> : vector<8xf32>
    %163 = vector.multi_reduction <add>, %160, %cst_65 [1] : vector<8x128xf32> to vector<8xf32>
    %164 = vector.shape_cast %163 : vector<8xf32> to vector<8x1xf32>
    %cst_66 = arith.constant 1.280000e+02 : f32
    %165 = vector.broadcast %cst_66 : f32 to vector<8x1xf32>
    %166 = arith.divf %164, %165 : vector<8x1xf32>
    %167 = vector.broadcast %166 : vector<8x1xf32> to vector<8x128xf32>
    %168 = arith.subf %160, %167 : vector<8x128xf32>
    %169 = arith.mulf %168, %168 : vector<8x128xf32>
    %cst_67 = arith.constant dense<0.000000e+00> : vector<8xf32>
    %170 = vector.multi_reduction <add>, %169, %cst_67 [1] : vector<8x128xf32> to vector<8xf32>
    %171 = vector.shape_cast %170 : vector<8xf32> to vector<8x1xf32>
    %cst_68 = arith.constant 1.280000e+02 : f32
    %172 = vector.broadcast %cst_68 : f32 to vector<8x1xf32>
    %173 = arith.divf %171, %172 : vector<8x1xf32>
    %174 = vector.broadcast %166 : vector<8x1xf32> to vector<8x128xf32>
    %175 = arith.subf %160, %174 : vector<8x128xf32>
    %cst_69 = arith.constant 9.99999996E-13 : f32
    %176 = vector.broadcast %cst_69 : f32 to vector<8x1xf32>
    %177 = arith.addf %173, %176 : vector<8x1xf32>
    %178 = math.rsqrt %177 : vector<8x1xf32>
    %179 = vector.broadcast %178 : vector<8x1xf32> to vector<8x128xf32>
    %180 = arith.mulf %175, %179 : vector<8x128xf32>
    %181 = vector.broadcast %161 : vector<1x128xf32> to vector<8x128xf32>
    %182 = arith.mulf %180, %181 : vector<8x128xf32>
    %183 = vector.broadcast %162 : vector<1x128xf32> to vector<8x128xf32>
    %184 = arith.addf %182, %183 : vector<8x128xf32>
    %185 = arith.truncf %184 : vector<8x128xf32> to vector<8x128xbf16>
    %186 = vector.shape_cast %185 : vector<8x128xbf16> to vector<1x8x128xbf16>
    %c0_70 = arith.constant 0 : index
    %c0_71 = arith.constant 0 : index
    %c0_72 = arith.constant 0 : index
    %187 = vector.load %arg15[%c0_70, %c0_71, %c0_72] : memref<1x8x128xbf16, #tpu.memory_space<vmem>>, vector<1x8x128xbf16>
    tpu.vector_store %arg15[%c0_70, %c0_71, %c0_72], %186 {strides = array<i32>} : memref<1x8x128xbf16, #tpu.memory_space<vmem>>, vector<1x8x128xbf16>,
    return
  }
  func.func @transform_0(%arg0: i32) -> (i32, i32, i32) {
    %c0_i32 = arith.constant 0 : i32
    %c0_i32_0 = arith.constant 0 : i32
    %c0_i32_1 = arith.constant 0 : i32
    return %arg0, %c0_i32, %c0_i32_0 : i32, i32, i32
  }
  func.func @transform_1(%arg0: i32) -> (i32, i32, i32) {
    %c0_i32 = arith.constant 0 : i32
    %c0_i32_0 = arith.constant 0 : i32
    %c0_i32_1 = arith.constant 0 : i32
    return %arg0, %c0_i32, %c0_i32_0 : i32, i32, i32
  }
  func.func @transform_2(%arg0: i32) -> (i32, i32) {
    %c0_i32 = arith.constant 0 : i32
    %c0_i32_0 = arith.constant 0 : i32
    %c0_i32_1 = arith.constant 0 : i32
    return %c0_i32, %c0_i32_0 : i32, i32
  }
  func.func @transform_3(%arg0: i32) -> (i32, i32) {
    %c0_i32 = arith.constant 0 : i32
    %c0_i32_0 = arith.constant 0 : i32
    %c0_i32_1 = arith.constant 0 : i32
    return %c0_i32, %c0_i32_0 : i32, i32
  }
  func.func @transform_4(%arg0: i32) -> (i32, i32) {
    %c0_i32 = arith.constant 0 : i32
    %c0_i32_0 = arith.constant 0 : i32
    %c0_i32_1 = arith.constant 0 : i32
    return %c0_i32, %c0_i32_0 : i32, i32
  }
  func.func @transform_5(%arg0: i32) -> (i32, i32) {
    %c0_i32 = arith.constant 0 : i32
    %c0_i32_0 = arith.constant 0 : i32
    %c0_i32_1 = arith.constant 0 : i32
    return %c0_i32, %c0_i32_0 : i32, i32
  }
  func.func @transform_6(%arg0: i32) -> (i32, i32) {
    %c0_i32 = arith.constant 0 : i32
    %c0_i32_0 = arith.constant 0 : i32
    %c0_i32_1 = arith.constant 0 : i32
    return %c0_i32, %c0_i32_0 : i32, i32
  }
  func.func @transform_7(%arg0: i32) -> (i32, i32) {
    %c0_i32 = arith.constant 0 : i32
    %c0_i32_0 = arith.constant 0 : i32
    %c0_i32_1 = arith.constant 0 : i32
    return %c0_i32, %c0_i32_0 : i32, i32
  }
  func.func @transform_8(%arg0: i32) -> (i32, i32) {
    %c0_i32 = arith.constant 0 : i32
    %c0_i32_0 = arith.constant 0 : i32
    %c0_i32_1 = arith.constant 0 : i32
    return %c0_i32, %c0_i32_0 : i32, i32
  }
  func.func @transform_9(%arg0: i32) -> (i32, i32) {
    %c0_i32 = arith.constant 0 : i32
    %c0_i32_0 = arith.constant 0 : i32
    %c0_i32_1 = arith.constant 0 : i32
    return %c0_i32, %c0_i32_0 : i32, i32
  }
  func.func @transform_10(%arg0: i32) -> (i32, i32) {
    %c0_i32 = arith.constant 0 : i32
    %c0_i32_0 = arith.constant 0 : i32
    %c0_i32_1 = arith.constant 0 : i32
    return %c0_i32, %c0_i32_0 : i32, i32
  }
  func.func @transform_11(%arg0: i32) -> (i32, i32) {
    %c0_i32 = arith.constant 0 : i32
    %c0_i32_0 = arith.constant 0 : i32
    %c0_i32_1 = arith.constant 0 : i32
    return %c0_i32, %c0_i32_0 : i32, i32
  }
  func.func @transform_12(%arg0: i32) -> (i32, i32) {
    %c0_i32 = arith.constant 0 : i32
    %c0_i32_0 = arith.constant 0 : i32
    %c0_i32_1 = arith.constant 0 : i32
    return %c0_i32, %c0_i32_0 : i32, i32
  }
  func.func @transform_13(%arg0: i32) -> (i32, i32) {
    %c0_i32 = arith.constant 0 : i32
    %c0_i32_0 = arith.constant 0 : i32
    %c0_i32_1 = arith.constant 0 : i32
    return %c0_i32, %c0_i32_0 : i32, i32
  }
  func.func @transform_14(%arg0: i32) -> (i32, i32, i32) {
    %c0_i32 = arith.constant 0 : i32
    %c0_i32_0 = arith.constant 0 : i32
    %c0_i32_1 = arith.constant 0 : i32
    return %arg0, %c0_i32, %c0_i32_0 : i32, i32, i32
  }
}

</mosaic_0001>

<bundles_post_ra>
// kernel: bert_base_uncased_forward.7
= control target key start
LH: loop header
LB: loop body
LE: loop exit
PB: predicated region body
PF: predicated region fallthrough
CT: control target
= control target key end

     0   :  { %v401_v1 = vmov 0.0   ;;  %vm402_vm0 = vmmov 0   ;;  %s506_s0 = inlined_call_operand.vmem [shape: bf16[2,8,128], index: 0, kind: input, shape index: {}]   ;;  %s507_s1 = inlined_call_operand.vmem [shape: bf16[128,128], index: 1, kind: input, shape index: {}]   ;;  %s508_s2 = inlined_call_operand.vmem [shape: f32[1,128], index: 2, kind: input, shape index: {}]   ;;  %s509_s3 = inlined_call_operand.vmem [shape: bf16[128,128], index: 3, kind: input, shape index: {}]   ;;  %s510_s4 = inlined_call_operand.vmem [shape: f32[1,128], index: 4, kind: input, shape index: {}]   ;;  %s511_s5 = inlined_call_operand.hbm [shape: f32[2,128], index: 5, kind: output, shape index: {}]  }
   0x1   :  { %v357_v0 = vld [vmem:[%s507_s1] sm:$0xff]   ;;  %314 = vmatprep.subr.bf16.mxu0 %v401_v1  ;;  %334 = vmatprep.subr.bf16.mxu1 %v401_v1  ;;  %v358_v2 = vld [vmem:[%s507_s1 + $0x8] sm:$0xff]   ;;  %v359_v3 = vld [vmem:[%s507_s1 + $0x10] sm:$0xff]  }
   0x2   :  { %315 = vmatpush3.bf16.msra.mxu0 %v357_v0  ;;  %330 = vmatprep.mubr.msk.bf16.mxu0 %vm402_vm0, %v401_v1  ;;  %v360_v4 = vld [vmem:[%s507_s1 + $0x18] sm:$0xff]   ;;  %v367_v5 = vld [vmem:[%s509_s3] sm:$0xff]   ;;  %v368_v6 = vld [vmem:[%s509_s3 + $0x8] sm:$0xff]  }
   0x3   :  { %316 = vmatprep.subr.bf16.mxu0 %v401_v1  ;;  %350 = vmatprep.mubr.msk.bf16.mxu1 %vm402_vm0, %v401_v1  ;;  %v361_v7 = vld [vmem:[%s507_s1 + $0x20] sm:$0xff]   ;;  %v369_v9 = vld [vmem:[%s509_s3 + $0x10] sm:$0xff]  }
   0x4   :  { %335 = vmatpush3.bf16.msra.mxu1 %v367_v5  ;;  %v366_v8 = vld [vmem:[%s506_s0 + $0x4] ss:$0 sps:$4 sm:$0xff]  }
   0x5   :  { %336 = vmatprep.subr.bf16.mxu1 %v401_v1 }
   0x6   :  { %317 = vmatpush3.bf16.msra.mxu0 %v358_v2 }
   0x7   :  { %318 = vmatprep.subr.bf16.mxu0 %v401_v1 }
   0x8   :  { %337 = vmatpush3.bf16.msra.mxu1 %v368_v6 }
   0xa   :  { %319 = vmatpush3.bf16.msra.mxu0 %v359_v3 }
   0xb   :  { %320 = vmatprep.subr.bf16.mxu0 %v401_v1 }
   0xe   :  { %321 = vmatpush3.bf16.msra.mxu0 %v360_v4 }
   0xf   :  { %322 = vmatprep.subr.bf16.mxu0 %v401_v1 }
  0x10   :  { %10 = vsyncpa [#allocation3], 0  ;;  %338 = vmatprep.subr.bf16.mxu1 %v401_v1  ;;  %v362_v10 = vld [vmem:[%s507_s1 + $0x28] sm:$0xff]   ;;  %v365_v11 = vld [vmem:[%s506_s0] ss:$0 sps:$4 sm:$0xff]   ;;  %v54_v12 = vunpack.c.l.b16 %v366_v8  ;;  %vm56_vm1 = vcmask 1041409  }
  0x11   :  { %339 = vmatpush3.bf16.msra.mxu1 %v369_v9  ;;  %v370_v13 = vld [vmem:[%s509_s3 + $0x18] sm:$0xff]   ;;  %v363_v14 = vld [vmem:[%s507_s1 + $0x30] sm:$0xff]   ;;  %v53_v15 = vunpack.c.l.b16 %v365_v11  ;;  %v371_v20 = vld [vmem:[%s509_s3 + $0x20] sm:$0xff]   ;;  %s403_s6 = smov [#allocation2]  }
  0x12   :  { %323 = vmatpush3.bf16.msra.mxu0 %v361_v7  ;;  %340 = vmatprep.subr.bf16.mxu1 %v401_v1  ;;  %v55_v16 = vrot.slane %v54_v12, 7  ;;  %v364_v17 = vld [vmem:[%s507_s1 + $0x38] sm:$0xff]   ;;  %v372_v21 = vld [vmem:[%s509_s3 + $0x28] sm:$0xff]   ;;  %v373_v22 = vld [vmem:[%s509_s3 + $0x30] sm:$0xff]  }
  0x13   :  { %324 = vmatprep.subr.bf16.mxu0 %v401_v1  ;;  %v374_v23 = vld [vmem:[%s509_s3 + $0x38] sm:$0xff]   ;;  %v276_v24 = vld [vmem:[%s508_s2] ss:$0 sm:$0xff]  ;;  %s268_s3 = sshll.u32 %s403_s6, 4  ;;  %s269_s3 = int_to_ptr.vmem [resolvable:$true] %s268_s3 }
  0x14   :  { %v57_v18 = vsel %vm56_vm1, %v55_v16, %v53_v15  ;;  %v287_v32 = vld [vmem:[%s510_s4] ss:$0 sm:$0xff]  ;;  %s377_s2 = scalar_lea.vmem %s269_s3, 32  ;;  %p382_p1 = scmp.lt.s32.totalorder %s269_s3, %s269_s3 }
  0x15   :  { %341 = vmatpush3.bf16.msra.mxu1 %v370_v13  ;;  %v58_v19 = vpack.c.b16 %v57_v18, %v57_v18  ;;  %p378_p0 = scmp.ne.s32.totalorder %s269_s3, %s377_s2  ;;  %p383_p2 = scmp.lt.s32.totalorder %s377_s2, %s377_s2 }
  0x16   :  { %325 = vmatpush3.bf16.msra.mxu0 %v362_v10  ;;  %342 = vmatprep.subr.bf16.mxu1 %v401_v1 }
  0x17   :  { %326 = vmatprep.subr.bf16.mxu0 %v401_v1  ;;  %p384_p3 = por %p383_p2, %p382_p1 }
  0x19   :  { %343 = vmatpush3.bf16.msra.mxu1 %v371_v20  ;;  %p385_p4 = pnand %p384_p3, %p378_p0 }
  0x1a   :  { %327 = vmatpush3.bf16.msra.mxu0 %v363_v14  ;;  %344 = vmatprep.subr.bf16.mxu1 %v401_v1 }
  0x1b   :  { %328 = vmatprep.subr.bf16.mxu0 %v401_v1 }
  0x1d   :  { %345 = vmatpush3.bf16.msra.mxu1 %v372_v21 }
  0x1e   :  { %329 = vmatpush3.bf16.msra.mxu0 %v364_v17  ;;  %346 = vmatprep.subr.bf16.mxu1 %v401_v1 }
  0x21   :  { %331 = vmatmul.mubr.bf16.vlgmr.msra.gmra.mrb[0].mxu0 %v58_v19  ;;  %347 = vmatpush3.bf16.msra.mxu1 %v373_v22 }
  0x22   :  { %348 = vmatprep.subr.bf16.mxu1 %v401_v1 }
  0x25   :  { %349 = vmatpush3.bf16.msra.mxu1 %v374_v23 }
  0xf4   :  { %v142_v25 = vpop.f32.mrb[0].mxu0 }
  0xf5   :  { %v143_v26 = vadd.f32 %v276_v24, %v142_v25  ;;  %v332_v27 = vpop.f32.mrb[1].mxu0 }
  0xf6   :  { %v145_v28 = vpop.f32.mrb[2].mxu0 }
  0xf7   :  { %375 = vtanh.f32 %v143_v26  ;;  %v333_v29 = vpop.f32.mrb[3].mxu0 }
 0x101   :  { %v376_v30 = vpop.eup %375 }
 0x102   :  { %v149_v31 = vpack.c.bf16 %v376_v30, %v376_v30 }
 0x104   :  { %351 = vmatmul.mubr.bf16.vlgmr.msra.gmra.mrb[0].mxu1 %v149_v31 }
 0x1d7   :  { %v255_v33 = vpop.f32.mrb[0].mxu1 }
 0x1d8   :  { %v256_v34 = vadd.f32 %v287_v32, %v255_v33  ;;  %v352_v35 = vpop.f32.mrb[1].mxu1 }
 0x1d9   :  { %v258_v36 = vpop.f32.mrb[2].mxu1 }
 0x1da   :  { %261 = vst [vmem:[#allocation2] sm:$0x3] %v256_v34  ;;  %v353_v37 = vpop.f32.mrb[3].mxu1 }
 0x1db   :  { %388 = shalt.err (!%p385_p4)
}
 0x1dc   :  { %s389_s4 = scalar_lea.hbm %s511_s5, 32 }
 0x1dd   :  { %p390_p5 = scmp.ne.s32.totalorder %s511_s5, %s389_s4  ;;  %p393_p6 = scmp.lt.u32.totalorder %s389_s4, %s511_s5 }
 0x1df   :  { %p395_p7 = pnand %p393_p6, %p390_p5 }
 0x1e1   :  { %398 = shalt.err (!%p395_p7)
}
 0x1e2   :  { %271 = dma.vmem_to_hbm [thread:$0]  %s269_s3, 32, %s511_s5, [#allocation3]  }
 0x1e3   :  { %399 = dma.done.wait [#allocation3], 32  }
 0x1e4   :  { %400 = vsyncadd [#allocation3], 4294967264 }
 0x1e5   :  { %275 = vsyncpa [#allocation3], 1 }

// kernel: bert_base_uncased_forward.4
= control target key start
LH: loop header
LB: loop body
LE: loop exit
PB: predicated region body
PF: predicated region fallthrough
CT: control target
= control target key end

     0   :  { %s299_s12 = smov 0   ;;  %s322_s0 = inlined_call_operand.vmem [shape: f32[2,8,128], index: 0, kind: input, shape index: {}]   ;;  %s323_s1 = inlined_call_operand.vmem [shape: f32[1,128], index: 1, kind: input, shape index: {}]   ;;  %s324_s2 = inlined_call_operand.vmem [shape: f32[1,128], index: 2, kind: input, shape index: {}]   ;;  %s325_s3 = inlined_call_operand.vmem [shape: bf16[2,8,128], index: 3, kind: output, shape index: {}]  }
   0x1 LB: > { %s250_s13 = sadd.s32 4294967295, %s277_s12   ;;  %p254_p0 = scmp.ge.s32.totalorder %s277_s12, 1  ;;  %s277_s12 = sphi %s299_s12, %s13_s12  }
   0x2   : > { %p136_p1 = scmp.lt.s32.totalorder %s277_s12, 3 }
   0x4   : > { %p137_p2 = pnand %p254_p0, %p136_p1 }
   0x5   : > { %p158_p3 = scmp.lt.s32.totalorder (!%p137_p2), %s250_s13, 1  ;;  %v257_v9 = vld [vmem:[%s323_s1] ss:$0 sm:$0xff] (!%p137_p2) }
   0x6   : > { %140 = sbr.rel (%p137_p2) target bundleno = 331 (0x14b), region = 32  ;;  %v258_v11 = vld [vmem:[%s324_s2] ss:$0 sm:$0xff] (!%p137_p2) }
   0xd   : > { %s327_s13 = smov (!%p158_p3, %s250_s13), 1 }
   0xe   : > { %s255_s14 = sshll.u32 %s327_s13, 3  ;;  %s256_s22 = sshll.u32 %s327_s13, 2 }
   0xf   : > { %s161_s17 = scalar_lea.vmem %s322_s0, %s255_s14  ;;  %s165_s25 = scalar_lea.vmem %s325_s3, %s256_s22 }
  0x10   : > { %v166_v0 = vld [vmem:[%s161_s17] sm:$0xff] }
  0x11   : > { %169 = vadd.xlane.f32.xlu0 %v166_v0 }
  0x9e   : > { %v170_v1 = vpop.xlane.xlu0 %169 }
  0x9f   : > { %v172_v2 = vmul.f32 0.0078125, %v170_v1 }
  0xa1   : > { %v173_v3 = vsub.f32 %v166_v0, %v172_v2 }
  0xa3   : > { %v174_v4 = vmul.f32 %v173_v3, %v173_v3 }
  0xa5   : > { %175 = vadd.xlane.f32.xlu0 %v174_v4 }
 0x132   : > { %v176_v5 = vpop.xlane.xlu0 %175 }
 0x133   : > { %v177_v6 = vmul.f32 0.0078125, %v176_v5 }
 0x135   : > { %v178_v7 = vadd.f32 1e-12, %v177_v6 }
 0x137   : > { %269 = vrsqrt.f32 %v178_v7 }
 0x141   : > { %v270_v8 = vpop.eup %269 }
 0x142   : > { %v180_v10 = vmul.f32 %v270_v8, %v173_v3 }
 0x144   : > { %v187_v12 = vmul.f32 %v257_v9, %v180_v10 }
 0x146   : > { %v194_v13 = vadd.f32 %v258_v11, %v187_v12 }
 0x148   : > { %v195_v14 = vpack.c.bf16 %v194_v13, %v194_v13 }
 0x14a   : > { %196 = vst [vmem:[%s165_s25] sm:$0xf] %v195_v14 }
 0x14b PF: > { %s13_s12 = sadd.s32 1, %s277_s12  }
 0x14c   : > { %p10_p4 = scmp.ge.s32.totalorder %s13_s12, 4  }
 0x14e   :  { %12 = sbr.rel (!%p10_p4) target bundleno = 1 (0x1), region = 62 }

// kernel: bert_base_uncased_forward.5
= control target key start
LH: loop header
LB: loop body
LE: loop exit
PB: predicated region body
PF: predicated region fallthrough
CT: control target
= control target key end

     0   :  { %19 = vsyncpa [#allocation3], 0  ;;  %s3158_s0 = inlined_call_operand.vmem [shape: bf16[2,8,128], index: 0, kind: input, shape index: {}]   ;;  %s3159_s1 = inlined_call_operand.vmem [shape: f32[2,1,8], index: 1, kind: input, shape index: {}]   ;;  %s3160_s2 = inlined_call_operand.vmem [shape: bf16[128,384], index: 2, kind: input, shape index: {}]   ;;  %s3161_s3 = inlined_call_operand.vmem [shape: f32[1,384], index: 3, kind: input, shape index: {}]   ;;  %s3162_s4 = inlined_call_operand.vmem [shape: bf16[128,128], index: 4, kind: input, shape index: {}]   ;;  %s3163_s5 = inlined_call_operand.vmem [shape: f32[1,128], index: 5, kind: input, shape index: {}]   ;;  %s3164_s6 = inlined_call_operand.vmem [shape: f32[1,128], index: 6, kind: input, shape index: {}]   ;;  %s3165_s7 = inlined_call_operand.vmem [shape: f32[1,128], index: 7, kind: input, shape index: {}]   ;;  %s3166_s8 = inlined_call_operand.vmem [shape: bf16[128,256], index: 8, kind: input, shape index: {}]   ;;  %s3167_s9 = inlined_call_operand.vmem [shape: f32[1,256], index: 9, kind: input, shape index: {}]   ;;  %s3168_s10 = inlined_call_operand.vmem [shape: bf16[256,128], index: 10, kind: input, shape index: {}]   ;;  %s3169_s11 = inlined_call_operand.vmem [shape: f32[1,128], index: 11, kind: input, shape index: {}]   ;;  %s3170_s12 = inlined_call_operand.hbm [shape: f32[1,128], index: 12, kind: input, shape index: {}]   ;;  %s3171_s13 = inlined_call_operand.hbm [shape: f32[1,128], index: 13, kind: input, shape index: {}]   ;;  %s3172_s14 = inlined_call_operand.vmem [shape: bf16[2,8,128], index: 14, kind: output, shape index: {}]  }
   0x1   :  { %20 = vsyncpa [#allocation5], 0  ;;  %s2720_s29 = smov 0  }
   0x2 LB: > { %s2726_s30 = sadd.s32 4294967295, %s2635_s29   ;;  %p2177_p0 = scmp.ge.s32.totalorder %s2635_s29, 1  ;;  %s2635_s29 = sphi %s2720_s29, %s26_s29  }
   0x3   : > { %p361_p1 = scmp.lt.s32.totalorder %s2635_s29, 3  ;;  %p3173_p2 = scmp.eq.s32.totalorder %s2726_s30, 0 }
   0x4   : > { %s2637_s16 = smov [#allocation2]   ;;  %s2638_s18 = smov [#allocation4]  }
   0x5   : > { %p2731_p3 = pnand %p2177_p0, %p361_p1  ;;  %s404_s17 = sshll.u32 %s2637_s16, 4  ;;  %s405_s17 = int_to_ptr.vmem [resolvable:$true] %s404_s17 }
   0x6   : > { %s415_s19 = sshll.u32 %s2638_s18, 4  ;;  %s2565_s23 = scalar_lea.hbm %s3170_s12, 16  ;;  %s2743_s19 = int_to_ptr.vmem [resolvable:$true] %s415_s19 }
   0x7   : > { %s3175_s15 = scalar_select %p2731_p3, 1, 0 }
   0x8   : > { %p2434_p4 = pneg %p2731_p3  ;;  %p2566_p6 = scmp.ne.s32.totalorder %s3170_s12, %s2565_s23 }
   0x9   : > { %p2572_p10 = scmp.lt.u32.totalorder %s2565_s23, %s3170_s12 }
   0xa   : > { %p2739_p5 = pnand %p3173_p2, %p2434_p4 }
   0xc   : > { %p2567_p7 = pneg %p2739_p5 }
   0xe   : > { %p2568_p8 = pnand %p2567_p7, %p2566_p6 }
  0x10   : > { %p2569_p9 = pneg %p2568_p8 }
  0x12   : > { %p2574_p11 = pnand %p2572_p10, %p2569_p9 }
  0x14   : > { %2577 = shalt.err (!%p2574_p11)
}
  0x15   : > { %s2578_s28 = scalar_lea.vmem %s405_s17, 16  ;;  %s2585_s16 = scalar_lea.vmem %s405_s17, 32 }
  0x16   : > { %p2579_p12 = scmp.ne.s32.totalorder %s405_s17, %s2578_s28  ;;  %p2586_p1 = scmp.lt.s32.totalorder %s405_s17, %s405_s17 }
  0x17   : > { %p2587_p4 = scmp.lt.s32.totalorder %s2585_s16, %s2578_s28 }
  0x18   : > { %p2581_p13 = pnand %p2579_p12, %p2567_p7 }
  0x19   : > { %p2588_p2 = por %p2587_p4, %p2586_p1 }
  0x1a   : > { %p2582_p0 = pneg %p2581_p13 }
  0x1c   : > { %p2589_p3 = pnand %p2588_p2, %p2582_p0 }
  0x1e   : > { %2592 = shalt.err (!%p2589_p3)
}
  0x1f   : > { %2437 = dma.hbm_to_vmem [thread:$0]  (!%p2739_p5), %s3170_s12, 16, %s405_s17, [#allocation3]  }
  0x20   : > { %s2593_s24 = scalar_lea.hbm %s3171_s13, 16 }
  0x21   : > { %p2594_p6 = scmp.ne.s32.totalorder %s3171_s13, %s2593_s24  ;;  %p2600_p3 = scmp.lt.u32.totalorder %s2593_s24, %s3171_s13 }
  0x23   : > { %p2596_p8 = pnand %p2594_p6, %p2567_p7 }
  0x25   : > { %p2597_p2 = pneg %p2596_p8 }
  0x27   : > { %p2602_p9 = pnand %p2600_p3, %p2597_p2 }
  0x29   : > { %2605 = shalt.err (!%p2602_p9)
}
  0x2a   : > { %s2606_s17 = scalar_lea.vmem %s2743_s19, 16  ;;  %s2613_s16 = scalar_lea.vmem %s2743_s19, 32 }
  0x2b   : > { %p2607_p10 = scmp.ne.s32.totalorder %s2743_s19, %s2606_s17  ;;  %p2614_p13 = scmp.lt.s32.totalorder %s2743_s19, %s2743_s19 }
  0x2c   : > { %p2615_p0 = scmp.lt.s32.totalorder %s2613_s16, %s2606_s17 }
  0x2d   : > { %p2609_p11 = pnand %p2607_p10, %p2567_p7 }
  0x2e   : > { %p2616_p1 = por %p2615_p0, %p2614_p13 }
  0x2f   : > { %p2610_p12 = pneg %p2609_p11 }
  0x31   : > { %p2617_p4 = pnand %p2616_p1, %p2610_p12 }
  0x33   : > { %2620 = shalt.err (!%p2617_p4)
}
  0x34   : > { %2440 = dma.hbm_to_vmem [thread:$0]  (!%p2739_p5), %s3171_s13, 16, %s2743_s19, [#allocation5]  }
  0x35   : > { %p3177_p6 = scmp.ne.s32.totalorder %s3175_s15, 0 }
  0x36   : > { %p3178_p7 = scmp.eq.s32.totalorder (!%p3177_p6), %s2726_s30, 0 }
  0x37   : > { %441 = sbr.rel (%p3177_p6) target bundleno = 3771 (0xebb), region = 76 }
  0x3e   : > { %2626 = dma.done.wait (%p3178_p7), [#allocation3], 16   ;;  %p3179_p8 = pmov %p3178_p7 }
  0x3f   : > { %p3180_p2 = pmov %p3178_p7 }
  0x40   : > { %2628 = vsyncadd (%p3179_p8), [#allocation3], 4294967280 }
  0x41   : > { %2630 = dma.done.wait (%p3180_p2), [#allocation5], 16   ;;  %p3181_p3 = pmov %p3180_p2 }
  0x42   : > { %v2639_v0 = vmov 0   ;;  %v2640_v1 = vmov 0.0   ;;  %vm2641_vm0 = vmmov 0   ;;  %v2461_v2 = vld [vmem:[%s3160_s2 + $0x4] ss:$12 sps:$4 sm:$0xff]   ;;  %p492_p5 = scmp.lt.s32.totalorder %s2726_s30, 1  ;;  %v541_v27 = vlaneseq }
  0x43   : > { %2632 = vsyncadd (%p3181_p3), [#allocation5], 4294967280  ;;  %716 = vmatprep.mubr.bf16.mxu0 %v2639_v0  ;;  %2334 = vmatprep.subr.bf16.mxu1 %v2640_v1  ;;  %v2463_v3 = vld [vmem:[%s3160_s2] ss:$12 sps:$4 sm:$0xff]   ;;  %v2464_v4 = vld [vmem:[%s3160_s2 + $0x1c] ss:$12 sps:$4 sm:$0xff]  }
  0x44   : > { %2350 = vmatprep.mubr.msk.bf16.mxu1 %vm2641_vm0, %v2640_v1  ;;  %684 = vmatprep.subr.bf16.mxu0 %v2461_v2  ;;  %v2466_v5 = vld [vmem:[%s3160_s2 + $0x18] ss:$12 sps:$4 sm:$0xff]   ;;  %v2467_v6 = vld [vmem:[%s3160_s2 + $0x34] ss:$12 sps:$4 sm:$0xff]   ;;  %v2469_v7 = vld [vmem:[%s3160_s2 + $0x30] ss:$12 sps:$4 sm:$0xff]  }
  0x45   : > { %685 = vmatpush1.bf16.msra.mxu0 %v2463_v3  ;;  %v2470_v8 = vld [vmem:[%s3160_s2 + $0x4c] ss:$12 sps:$4 sm:$0xff]   ;;  %v2472_v9 = vld [vmem:[%s3160_s2 + $0x48] ss:$12 sps:$4 sm:$0xff]   ;;  %s3183_s30 = smov (!%p492_p5, %s2726_s30), 1  ;;  %v2906_v28 = vshrl.u32 %v541_v27, 7 }
  0x46   : > { %686 = vmatprep.subr.bf16.mxu0 %v2464_v4  ;;  %v2485_v10 = vld [vmem:[%s3160_s2 + $0x8] ss:$12 sps:$4 sm:$0xff]   ;;  %v2473_v11 = vld [vmem:[%s3160_s2 + $0x64] ss:$12 sps:$4 sm:$0xff]   ;;  %v2486_v12 = vld [vmem:[%s3160_s2 + $0x20] ss:$12 sps:$4 sm:$0xff]   ;;  %s498_s22 = scalar_lea.vmem %s3159_s1, %s3183_s30 }
  0x47   : > { %2335 = vmatpush3.bf16.msra.mxu1 %v2485_v10  ;;  %s2184_s27 = sshll.u32 %s3183_s30, 2  ;;  %v2475_v13 = vld [vmem:[%s3160_s2 + $0x60] ss:$12 sps:$4 sm:$0xff]   ;;  %v2476_v14 = vld [vmem:[%s3160_s2 + $0x7c] ss:$12 sps:$4 sm:$0xff]   ;;  %v547_v29 = vsub.s32 1, %v2906_v28 }
  0x48   : > { %2336 = vmatprep.subr.bf16.mxu1 %v2640_v1  ;;  %v2478_v15 = vld [vmem:[%s3160_s2 + $0x78] ss:$12 sps:$4 sm:$0xff]   ;;  %v2479_v17 = vld [vmem:[%s3160_s2 + $0x94] ss:$12 sps:$4 sm:$0xff]   ;;  %v2488_v18 = vld [vmem:[%s3160_s2 + $0x50] ss:$12 sps:$4 sm:$0xff]   ;;  %s495_s23 = scalar_lea.vmem %s3158_s0, %s2184_s27 }
  0x49   : > { %687 = vmatpush1.bf16.msra.mxu0 %v2466_v5  ;;  %v2487_v16 = vld [vmem:[%s3160_s2 + $0x38] ss:$12 sps:$4 sm:$0xff]   ;;  %v2481_v19 = vld [vmem:[%s3160_s2 + $0x90] ss:$12 sps:$4 sm:$0xff]   ;;  %v2489_v21 = vld [vmem:[%s3160_s2 + $0x68] ss:$12 sps:$4 sm:$0xff]  }
  0x4a   : > { %688 = vmatprep.subr.bf16.mxu0 %v2467_v6  ;;  %v2482_v20 = vld [vmem:[%s3160_s2 + $0xac] ss:$12 sps:$4 sm:$0xff]   ;;  %v2484_v22 = vld [vmem:[%s3160_s2 + $0xa8] ss:$12 sps:$4 sm:$0xff]   ;;  %v2887_v24 = vld [vmem:[%s495_s23] sm:$0xf] }
  0x4b   : > { %2337 = vmatpush3.bf16.msra.mxu1 %v2486_v12  ;;  %v2490_v23 = vld [vmem:[%s3160_s2 + $0x80] ss:$12 sps:$4 sm:$0xff]   ;;  %v2491_v25 = vld [vmem:[%s3160_s2 + $0x98] ss:$12 sps:$4 sm:$0xff]   ;;  %v2492_v26 = vld [vmem:[%s3160_s2 + $0xb0] ss:$12 sps:$4 sm:$0xff]  }
  0x4c   : > { %2338 = vmatprep.subr.bf16.mxu1 %v2640_v1  ;;  %v539_v30 = vld [vmem:[%s3161_s3] sm:$0x7]  ;;  %v543_v31 = vsub.s32 0, %v2906_v28  ;;  %vm781_vm1 = vcmask 261120   ;;  %v551_v39 = vsub.s32 2, %v2906_v28  ;;  %s2642_s15 = smov 96  }
  0x4d   : > { %689 = vmatpush1.bf16.msra.mxu0 %v2469_v7  ;;  %v548_v32 = vrot.slane %v539_v30, %v547_v29  ;;  %v2942_v50 = vld [vmem:[%s498_s22] ss:$0 sm:$0xff]  ;;  %vm866_vm2 = vcmask 64512   ;;  %s2643_s23 = smov 64   ;;  %s2644_s24 = smov 32   ;;  %v2496_v12 = vld [vmem:[%s3162_s4 + $0x18] sm:$0xff]  }
  0x4e   : > { %690 = vmatprep.subr.bf16.mxu0 %v2470_v8  ;;  %v544_v34 = vrot.slane %v539_v30, %v543_v31  ;;  %v552_v41 = vrot.slane %v539_v30, %v551_v39 }
  0x4f   : > { %2339 = vmatpush3.bf16.msra.mxu1 %v2487_v16  ;;  %v2493_v16 = vld [vmem:[%s3162_s4] sm:$0xff]  }
  0x50   : > { %2340 = vmatprep.subr.bf16.mxu1 %v2640_v1 }
  0x51   : > { %691 = vmatpush1.bf16.msra.mxu0 %v2472_v9 }
  0x52   : > { %692 = vmatprep.subr.bf16.mxu0 %v2473_v11  ;;  %v2495_v11 = vld [vmem:[%s3162_s4 + $0x10] sm:$0xff]  }
  0x53   : > { %2341 = vmatpush3.bf16.msra.mxu1 %v2488_v18  ;;  %v2494_v18 = vld [vmem:[%s3162_s4 + $0x8] sm:$0xff]  }
  0x54   : > { %2342 = vmatprep.subr.bf16.mxu1 %v2640_v1 }
  0x55   : > { %693 = vmatpush1.bf16.msra.mxu0 %v2475_v13 }
  0x56   : > { %694 = vmatprep.subr.bf16.mxu0 %v2476_v14 }
  0x57   : > { %2343 = vmatpush3.bf16.msra.mxu1 %v2489_v21 }
  0x58   : > { %2344 = vmatprep.subr.bf16.mxu1 %v2640_v1 }
  0x59   : > { %695 = vmatpush1.bf16.msra.mxu0 %v2478_v15 }
  0x5a   : > { %696 = vmatprep.subr.bf16.mxu0 %v2479_v17 }
  0x5b   : > { %2345 = vmatpush3.bf16.msra.mxu1 %v2490_v23 }
  0x5c   : > { %2346 = vmatprep.subr.bf16.mxu1 %v2640_v1 }
  0x5d   : > { %697 = vmatpush1.bf16.msra.mxu0 %v2481_v19 }
  0x5e   : > { %698 = vmatprep.subr.bf16.mxu0 %v2482_v20 }
  0x5f   : > { %2347 = vmatpush3.bf16.msra.mxu1 %v2491_v25 }
  0x60   : > { %2348 = vmatprep.subr.bf16.mxu1 %v2640_v1 }
  0x61   : > { %699 = vmatpush1.bf16.msra.mxu0 %v2484_v22 }
  0x62   : > { %2364 = vmatprep.subr.mxu0 %v2640_v1 }
  0x63   : > { %2349 = vmatpush3.bf16.msra.mxu1 %v2492_v26 }
  0x64   : > { %717 = vmatmul.mubr.bf16.vlgmr.msra.gmra.mrb[0].mxu0 %v2887_v24  ;;  %2354 = vmatprep.subr.mxu1 %v2640_v1 }
  0x65   : > { %2366 = vmatprep.mubr.msk.f32.mxu0 %vm2641_vm0, %v2640_v1 }
  0x66   : > { %2351 = vmatmul.mubr.bf16.vlgmr.msra.gmra.mrb[0].mxu1 %v2887_v24 }
  0x67   : > { %2356 = vmatprep.mubr.msk.f32.mxu1 %vm2641_vm0, %v2640_v1 }
 0x137   : > { %v718_v33 = vpop.f32.mrb[0].mxu0 }
 0x138   : > { %v720_v35 = vpop.f32.mrb[1].mxu0  ;;  %v2920_v40 = vadd.f32 %v718_v33, %v544_v34 }
 0x139   : > { %v721_v36 = vadd.f32 %v720_v35, %v548_v32  ;;  %v722_v37 = vpop.f32.mrb[2].mxu0  ;;  %v759_v42 = vpop.f32.mrb[0].mxu1 }
 0x13a   : > { %v723_v38 = vpop.f32.mrb[3].mxu0  ;;  %v2929_v43 = vadd.f32 %v759_v42, %v552_v41  ;;  %v2352_v44 = vpop.f32.mrb[1].mxu1 }
 0x13b   : > { %954 = vrot.lane.b32.xlu0 %v721_v36, %s2642_s15  ;;  %2355 = vmatpush3.xpose.msk.msra.mxu1 %vm781_vm1, %v721_v36  ;;  %v762_v45 = vpop.f32.mrb[2].mxu1 }
 0x13c   : > { %2359 = vmatprep.subr.mxu1 %v2640_v1  ;;  %v2353_v46 = vpop.f32.mrb[3].mxu1 }
 0x13e   : > { %2357 = vmatmul.mubr.msk.f32.vlgmr.msra.gmra.mrb[4].mxu1 %vm781_vm1, %v2920_v40 }
 0x13f   : > { %952 = vrot.lane.b32.xlu0 %v2920_v40, %s2642_s15  ;;  %2361 = vmatprep.mubr.msk.f32.mxu1 %vm2641_vm0, %v2640_v1 }
 0x140   : > { %2360 = vmatpush3.msra.mxu1 %v2929_v43 }
 0x141   : > { %2369 = vmatprep.subr.mxu1 %v2640_v1 }
 0x1ad   : > { %v955_v47 = vpop.permute.xlu0 %954 }
 0x1ae   : > { %2365 = vmatpush3.xpose.msk.msra.mxu0 %vm781_vm1, %v955_v47 }
 0x1af   : > { %2374 = vmatprep.subr.bf16.mxu0 %v2640_v1 }
 0x1b1   : > { %v953_v48 = vpop.permute.xlu0 %952 }
 0x1b2   : > { %2367 = vmatmul.mubr.msk.f32.vlgmr.msra.gmra.mrb[4].mxu0 %vm781_vm1, %v953_v48 }
 0x1b3   : > { %2378 = vmatprep.mubr.msk.bf16.mxu0 %vm2641_vm0, %v2640_v1  ;;  %2375 = vmatpush3.bf16.msra.mxu0 %v2495_v11  ;;  %v2499_v11 = vld [vmem:[%s3162_s4 + $0x30] sm:$0xff]  }
 0x1b4   : > { %2376 = vmatprep.subr.bf16.mxu0 %v2640_v1 }
 0x1b7   : > { %2377 = vmatpush3.bf16.msra.mxu0 %v2496_v12 }
 0x1b8   : > { %2390 = vmatprep.subr.mxu0 %v2640_v1 }
 0x211   : > { %v854_v49 = vpop.f32.mrb[4].mxu1 }
 0x212   : > { %v858_v51 = vmul.f32 0.17677669, %v854_v49  ;;  %v2358_v52 = vpop.f32.mrb[5].mxu1 }
 0x214   : > { %v865_v53 = vadd.f32 %v2942_v50, %v858_v51 }
 0x216   : > { %v867_v54 = vsel %vm866_vm2, %v865_v53, -inf }
 0x217   : > { %868 = vmax.xlane.f32.xlu1 %v867_v54  ;;  %v2497_v54 = vld [vmem:[%s3162_s4 + $0x20] sm:$0xff]  }
 0x285   : > { %v1026_v55 = vpop.f32.mrb[4].mxu0 }
 0x286   : > { %v1030_v56 = vmul.f32 0.17677669, %v1026_v55  ;;  %v2368_v57 = vpop.f32.mrb[5].mxu0 }
 0x288   : > { %v1031_v58 = vadd.f32 %v2942_v50, %v1030_v56 }
 0x28a   : > { %v1032_v59 = vsel %vm866_vm2, %v1031_v58, -inf }
 0x28b   : > { %1033 = vmax.xlane.f32.xlu1 %v1032_v59  ;;  %v2498_v59 = vld [vmem:[%s3162_s4 + $0x28] sm:$0xff]  }
 0x2a4   : > { %v869_v60 = vpop.xlane.xlu1 %868 }
 0x2a5   : > { %v870_v61 = vsub.f32 %v865_v53, %v869_v60 }
 0x2a7   : > { %v871_v62 = vmul.f32 1.442695, %v870_v61 }
 0x2a9   : > { %2541 = vpow2.f32 %v871_v62 }
 0x2b3   : > { %v2542_v63 = vpop.eup %2541 }
 0x2b4   : > { %v873_v2 = vsel %vm866_vm2, %v2542_v63, 0.0 }
 0x2b5   : > { %874 = vadd.xlane.f32.xlu0 %v873_v2 }
 0x2cb   : > { %1322 = vrot.lane.b32.xlu0 %v2929_v43, %s2643_s23 }
 0x2cf   : > { %1457 = vrot.lane.b32.xlu0 %v721_v36, %s2644_s24 }
 0x318   : > { %v1034_v3 = vpop.xlane.xlu1 %1033 }
 0x319   : > { %v1035_v4 = vsub.f32 %v1031_v58, %v1034_v3 }
 0x31b   : > { %v1036_v5 = vmul.f32 1.442695, %v1035_v4 }
 0x31d   : > { %2543 = vpow2.f32 %v1036_v5 }
 0x327   : > { %v2544_v6 = vpop.eup %2543 }
 0x328   : > { %v1038_v7 = vsel %vm866_vm2, %v2544_v6, 0.0 }
 0x329   : > { %1039 = vadd.xlane.f32.xlu1 %v1038_v7 }
 0x33a   : > { %1044 = vrot.lane.b32.xlu1 %v2929_v43, %s2642_s15 }
 0x33e   : > { %1233 = vrot.lane.b32.xlu1 %v721_v36, %s2643_s23 }
 0x342   : > { %v875_v8 = vpop.xlane.xlu0 %874  ;;  %1231 = vrot.lane.b32.xlu1 %v2920_v40, %s2643_s23 }
 0x343   : > { %2545 = vrcp.f32 %v875_v8 }
 0x346   : > { %v1323_v22 = vpop.permute.xlu0 %1322 }
 0x34a   : > { %v1458_v55 = vpop.permute.xlu0 %1457 }
 0x34d   : > { %v2546_v9 = vpop.eup %2545 }
 0x34e   : > { %v877_v10 = vmul.f32 %v2546_v9, %v2542_v63 }
 0x350   : > { %2362 = vmatmul.mubr.msk.f32.vlgmr.msra.gmra.mrb[6].mxu1 %vm866_vm2, %v877_v10 }
 0x351   : > { %2371 = vmatprep.mubr.msk.f32.mxu1 %vm2641_vm0, %v2640_v1 }
 0x3b6   : > { %v1040_v13 = vpop.xlane.xlu1 %1039 }
 0x3b7   : > { %2547 = vrcp.f32 %v1040_v13 }
 0x3ba   : > { %v1045_v14 = vpop.permute.xlu1 %1044 }
 0x3bb   : > { %2370 = vmatpush3.msra.mxu1 %v1045_v14 }
 0x3bc   : > { %2382 = vmatprep.subr.bf16.mxu1 %v2640_v1 }
 0x3be   : > { %v1234_v27 = vpop.permute.xlu1 %1233 }
 0x3c1   : > { %v2548_v15 = vpop.eup %2547 }
 0x3c2   : > { %v1042_v17 = vmul.f32 %v2548_v15, %v2544_v6  ;;  %v1232_v30 = vpop.permute.xlu1 %1231 }
 0x3c4   : > { %2372 = vmatmul.mubr.msk.f32.vlgmr.msra.gmra.mrb[8].mxu1 %vm866_vm2, %v1042_v17 }
 0x3c5   : > { %2383 = vmatpush3.bf16.msra.mxu1 %v2493_v16  ;;  %2386 = vmatprep.mubr.msk.bf16.mxu1 %vm2641_vm0, %v2640_v1 }
 0x3c6   : > { %2384 = vmatprep.subr.bf16.mxu1 %v2640_v1 }
 0x3c9   : > { %2385 = vmatpush3.bf16.msra.mxu1 %v2494_v18 }
 0x3ca   : > { %2395 = vmatprep.subr.mxu1 %v2640_v1 }
 0x423   : > { %v947_v19 = vpop.f32.mrb[6].mxu1 }
 0x424   : > { %v951_v20 = vpack.c.bf16 %v947_v19, %v947_v19  ;;  %v2363_v21 = vpop.f32.mrb[7].mxu1 }
 0x426   : > { %2387 = vmatmul.mubr.msk.bf16.vlgmr.msra.gmra.mrb[12].mxu1 %vm781_vm1, %v951_v20 }
 0x427   : > { %2396 = vmatpush3.msra.mxu1 %v1323_v22  ;;  %2397 = vmatprep.mubr.msk.f32.mxu1 %vm2641_vm0, %v2640_v1 }
 0x428   : > { %2408 = vmatprep.subr.mxu1 %v2640_v1 }
 0x497   : > { %v1116_v23 = vpop.f32.mrb[8].mxu1 }
 0x498   : > { %v1120_v25 = vpack.c.bf16 %v1116_v23, %v1116_v23  ;;  %v2373_v26 = vpop.f32.mrb[9].mxu1  ;;  %v2235_v23 = vld [vmem:[%s3163_s5] ss:$0 sm:$0xff] }
 0x49a   : > { %2379 = vmatmul.mubr.msk.bf16.vlgmr.msra.gmra.mrb[8].mxu0 %vm781_vm1, %v1120_v25 }
 0x49b   : > { %2391 = vmatpush3.xpose.msk.msra.mxu0 %vm781_vm1, %v1234_v27  ;;  %2392 = vmatprep.mubr.msk.f32.mxu0 %vm2641_vm0, %v2640_v1  ;;  %v505_v27 = vunpack.c.l.bf16 %v2887_v24  ;;  %v2504_v24 = vld [vmem:[%s3166_s8 + $0x10] ss:$8 sps:$4 sm:$0xff]  }
 0x49c   : > { %2400 = vmatprep.subr.bf16.mxu0 %v2640_v1 }
 0x4a2   : > { %2393 = vmatmul.mubr.msk.f32.vlgmr.msra.gmra.mrb[6].mxu0 %vm781_vm1, %v1232_v30 }
 0x4a3   : > { %2404 = vmatprep.mubr.msk.bf16.mxu0 %vm2641_vm0, %v2640_v1  ;;  %2401 = vmatpush3.bf16.msra.mxu0 %v2497_v54  ;;  %v2524_v54 = vld [vmem:[%s3166_s8 + $0x74] ss:$8 sps:$4 sm:$0xff]  }
 0x4a4   : > { %2402 = vmatprep.subr.bf16.mxu0 %v2640_v1 }
 0x4a7   : > { %2403 = vmatpush3.bf16.msra.mxu0 %v2498_v59  ;;  %v2236_v59 = vld [vmem:[%s3164_s6] ss:$0 sm:$0xff] }
 0x4a8   : > { %2418 = vmatprep.subr.bf16.mxu0 %v2640_v1 }
 0x4f9   : > { %v1225_v32 = vpop.f32.mrb[12].mxu1 }
 0x4fa   : > { %v2388_v33 = vpop.f32.mrb[13].mxu1 }
 0x4fb   : > { %v1228_v34 = vpop.f32.mrb[14].mxu1 }
 0x4fc   : > { %v2389_v35 = vpop.f32.mrb[15].mxu1  ;;  %v2501_v34 = vld [vmem:[%s3166_s8] ss:$8 sps:$4 sm:$0xff]  }
 0x4fd   : > { %v2503_v35 = vld [vmem:[%s3166_s8 + $0x4] ss:$8 sps:$4 sm:$0xff]  }
 0x56d   : > { %v1170_v36 = vpop.f32.mrb[8].mxu0 }
 0x56e   : > { %v1226_v37 = vadd.f32 %v1225_v32, %v1170_v36  ;;  %v2380_v38 = vpop.f32.mrb[9].mxu0  ;;  %v2506_v36 = vld [vmem:[%s3166_s8 + $0x14] ss:$8 sps:$4 sm:$0xff]  }
 0x56f   : > { %v1173_v39 = vpop.f32.mrb[10].mxu0  ;;  %v2507_v38 = vld [vmem:[%s3166_s8 + $0x20] ss:$8 sps:$4 sm:$0xff]  }
 0x570   : > { %v2381_v41 = vpop.f32.mrb[11].mxu0 }
 0x575   : > { %v1305_v42 = vpop.f32.mrb[6].mxu0 }
 0x576   : > { %v1309_v44 = vmul.f32 0.17677669, %v1305_v42  ;;  %v2394_v45 = vpop.f32.mrb[7].mxu0 }
 0x577   : > { %v2512_v45 = vld [vmem:[%s3166_s8 + $0x34] ss:$8 sps:$4 sm:$0xff]  }
 0x578   : > { %v1310_v46 = vadd.f32 %v2942_v50, %v1309_v44 }
 0x57a   : > { %v1311_v47 = vsel %vm866_vm2, %v1310_v46, -inf }
 0x57b   : > { %1312 = vmax.xlane.f32.xlu1 %v1311_v47  ;;  %v2515_v47 = vld [vmem:[%s3166_s8 + $0x44] ss:$8 sps:$4 sm:$0xff]  }
 0x608   : > { %v1313_v48 = vpop.xlane.xlu1 %1312 }
 0x609   : > { %v1314_v49 = vsub.f32 %v1310_v46, %v1313_v48  ;;  %v2510_v46 = vld [vmem:[%s3166_s8 + $0x30] ss:$8 sps:$4 sm:$0xff]   ;;  %v2513_v48 = vld [vmem:[%s3166_s8 + $0x40] ss:$8 sps:$4 sm:$0xff]  }
 0x60b   : > { %v1315_v51 = vmul.f32 1.442695, %v1314_v49  ;;  %v2518_v49 = vld [vmem:[%s3166_s8 + $0x54] ss:$8 sps:$4 sm:$0xff]  }
 0x60d   : > { %2549 = vpow2.f32 %v1315_v51  ;;  %v2516_v51 = vld [vmem:[%s3166_s8 + $0x50] ss:$8 sps:$4 sm:$0xff]  }
 0x617   : > { %v2550_v52 = vpop.eup %2549 }
 0x618   : > { %v1317_v53 = vsel %vm866_vm2, %v2550_v52, 0.0 }
 0x619   : > { %1318 = vadd.xlane.f32.xlu0 %v1317_v53  ;;  %v2519_v53 = vld [vmem:[%s3166_s8 + $0x60] ss:$8 sps:$4 sm:$0xff]  }
 0x62f   : > { %1455 = vrot.lane.b32.xlu0 %v2920_v40, %s2644_s24 }
 0x6a6   : > { %v1319_v56 = vpop.xlane.xlu0 %1318 }
 0x6a7   : > { %2551 = vrcp.f32 %v1319_v56 }
 0x6aa   : > { %v1456_v40 = vpop.permute.xlu0 %1455 }
 0x6b1   : > { %v2552_v57 = vpop.eup %2551 }
 0x6b2   : > { %v1321_v58 = vmul.f32 %v2552_v57, %v2550_v52  ;;  %v2521_v52 = vld [vmem:[%s3166_s8 + $0x64] ss:$8 sps:$4 sm:$0xff]  }
 0x6b4   : > { %2398 = vmatmul.mubr.msk.f32.vlgmr.msra.gmra.mrb[10].mxu1 %vm866_vm2, %v1321_v58 }
 0x6b5   : > { %2409 = vmatpush3.xpose.msk.msra.mxu1 %vm781_vm1, %v1458_v55  ;;  %2410 = vmatprep.mubr.msk.f32.mxu1 %vm2641_vm0, %v2640_v1  ;;  %v2522_v55 = vld [vmem:[%s3166_s8 + $0x70] ss:$8 sps:$4 sm:$0xff]  }
 0x6b6   : > { %2413 = vmatprep.subr.mxu1 %v2640_v1 }
 0x6b8   : > { %2411 = vmatmul.mubr.msk.f32.vlgmr.msra.gmra.mrb[16].mxu1 %vm781_vm1, %v1456_v40 }
 0x6b9   : > { %2415 = vmatprep.mubr.msk.f32.mxu1 %vm2641_vm0, %v2640_v1 }
 0x787   : > { %v1394_v60 = vpop.f32.mrb[10].mxu1 }
 0x788   : > { %v1398_v61 = vpack.c.bf16 %v1394_v60, %v1394_v60  ;;  %v2399_v62 = vpop.f32.mrb[11].mxu1 }
 0x78a   : > { %2405 = vmatmul.mubr.msk.bf16.vlgmr.msra.gmra.mrb[12].mxu0 %vm781_vm1, %v1398_v61  ;;  %v2237_v61 = vld [vmem:[%s3165_s7] ss:$0 sm:$0xff] }
 0x78b   : > { %v1529_v63 = vpop.f32.mrb[16].mxu1  ;;  %2422 = vmatprep.mubr.msk.bf16.mxu0 %vm2641_vm0, %v2640_v1  ;;  %2419 = vmatpush3.bf16.msra.mxu0 %v2499_v11  ;;  %v2533_v11 = vld [vmem:[%s3168_s10 + $0x60] sm:$0xff]  }
 0x78c   : > { %v1533_v2 = vmul.f32 0.17677669, %v1529_v63  ;;  %v2412_v3 = vpop.f32.mrb[17].mxu1  ;;  %2420 = vmatprep.subr.bf16.mxu0 %v2640_v1 }
 0x78d   : > { %v2525_v3 = vld [vmem:[%s3168_s10 + $0x40] sm:$0xff]  }
 0x78e   : > { %v1534_v4 = vadd.f32 %v2942_v50, %v1533_v2 }
 0x790   : > { %v1535_v5 = vsel %vm866_vm2, %v1534_v4, -inf }
 0x791   : > { %1536 = vmax.xlane.f32.xlu0 %v1535_v5  ;;  %v2527_v5 = vld [vmem:[%s3168_s10 + $0x48] sm:$0xff]  }
 0x81e   : > { %v1537_v6 = vpop.xlane.xlu0 %1536 }
 0x81f   : > { %v1538_v7 = vsub.f32 %v1534_v4, %v1537_v6  ;;  %v2526_v4 = vld [vmem:[%s3168_s10] sm:$0xff]   ;;  %v2528_v6 = vld [vmem:[%s3168_s10 + $0x8] sm:$0xff]  }
 0x821   : > { %v1539_v8 = vmul.f32 1.442695, %v1538_v7  ;;  %v2529_v7 = vld [vmem:[%s3168_s10 + $0x50] sm:$0xff]  }
 0x823   : > { %2553 = vpow2.f32 %v1539_v8  ;;  %v2530_v8 = vld [vmem:[%s3168_s10 + $0x10] sm:$0xff]  }
 0x82d   : > { %v2554_v9 = vpop.eup %2553 }
 0x82e   : > { %v1541_v10 = vsel %vm866_vm2, %v2554_v9, 0.0 }
 0x82f   : > { %1542 = vadd.xlane.f32.xlu1 %v1541_v10  ;;  %v2532_v10 = vld [vmem:[%s3168_s10 + $0x18] sm:$0xff]  }
 0x840   : > { %1546 = vrot.lane.b32.xlu1 %v2929_v43, %s2644_s24  ;;  %v2500_v43 = vld [vmem:[%s3162_s4 + $0x38] sm:$0xff]   ;;  %s502_s24 = scalar_lea.vmem %s3172_s14, %s2184_s27 }
 0x841   : > { %2421 = vmatpush3.bf16.msra.mxu0 %v2500_v43 }
 0x842   : > { %2312 = vmatprep.subr.bf16.mxu0 %v2525_v3  ;;  %v2272_v3 = vld [vmem:[#allocation4] ss:$0 sm:$0xff] }
 0x85d   : > { %v1448_v50 = vpop.f32.mrb[12].mxu0 }
 0x85e   : > { %v1454_v12 = vadd.f32 %v1448_v50, %v1226_v37  ;;  %v2406_v13 = vpop.f32.mrb[13].mxu0  ;;  %v2509_v37 = vld [vmem:[%s3166_s8 + $0x24] ss:$8 sps:$4 sm:$0xff]  }
 0x85f   : > { %v1451_v14 = vpop.f32.mrb[14].mxu0  ;;  %v2534_v50 = vld [vmem:[%s3168_s10 + $0x20] sm:$0xff]   ;;  %v2536_v13 = vld [vmem:[%s3168_s10 + $0x28] sm:$0xff]  }
 0x860   : > { %v2407_v15 = vpop.f32.mrb[15].mxu0  ;;  %v2537_v14 = vld [vmem:[%s3168_s10 + $0x70] sm:$0xff]  }
 0x861   : > { %v2538_v15 = vld [vmem:[%s3168_s10 + $0x30] sm:$0xff]  }
 0x8bc   : > { %v1543_v16 = vpop.xlane.xlu1 %1542 }
 0x8bd   : > { %2555 = vrcp.f32 %v1543_v16  ;;  %v2539_v16 = vld [vmem:[%s3168_s10 + $0x78] sm:$0xff]  }
 0x8c0   : > { %v1547_v17 = vpop.permute.xlu1 %1546 }
 0x8c1   : > { %2414 = vmatpush3.msra.mxu1 %v1547_v17  ;;  %v2540_v17 = vld [vmem:[%s3168_s10 + $0x38] sm:$0xff]  }
 0x8c2   : > { %1825 = vmatprep.subr.bf16.mxu1 %v2503_v35 }
 0x8c7   : > { %v2556_v18 = vpop.eup %2555 }
 0x8c8   : > { %v1545_v19 = vmul.f32 %v2556_v18, %v2554_v9  ;;  %v2531_v9 = vld [vmem:[%s3168_s10 + $0x58] sm:$0xff]   ;;  %v1733_v18 = vld [vmem:[%s3167_s9] sm:$0x3] }
 0x8c9   : > { %v1742_v43 = vrot.slane %v1733_v18, %v547_v29 }
 0x8ca   : > { %2416 = vmatmul.mubr.msk.f32.vlgmr.msra.gmra.mrb[18].mxu1 %vm866_vm2, %v1545_v19  ;;  %v1738_v19 = vrot.slane %v1733_v18, %v543_v31 }
 0x8cb   : > { %1857 = vmatprep.mubr.bf16.mxu1 %v2639_v0  ;;  %1826 = vmatpush1.bf16.msra.mxu1 %v2501_v34 }
 0x8cc   : > { %1827 = vmatprep.subr.bf16.mxu1 %v2506_v36 }
 0x8cf   : > { %1828 = vmatpush1.bf16.msra.mxu1 %v2504_v24 }
 0x8d0   : > { %1829 = vmatprep.subr.bf16.mxu1 %v2509_v37 }
 0x8d3   : > { %1830 = vmatpush1.bf16.msra.mxu1 %v2507_v38 }
 0x8d4   : > { %1831 = vmatprep.subr.bf16.mxu1 %v2512_v45 }
 0x8d7   : > { %1832 = vmatpush1.bf16.msra.mxu1 %v2510_v46 }
 0x8d8   : > { %1833 = vmatprep.subr.bf16.mxu1 %v2515_v47  ;;  %v2254_v47 = vld [vmem:[%s3169_s11] ss:$0 sm:$0xff] }
 0x8db   : > { %1834 = vmatpush1.bf16.msra.mxu1 %v2513_v48 }
 0x8dc   : > { %1835 = vmatprep.subr.bf16.mxu1 %v2518_v49 }
 0x8df   : > { %1836 = vmatpush1.bf16.msra.mxu1 %v2516_v51 }
 0x8e0   : > { %1837 = vmatprep.subr.bf16.mxu1 %v2521_v52 }
 0x8e3   : > { %1838 = vmatpush1.bf16.msra.mxu1 %v2519_v53 }
 0x8e4   : > { %1839 = vmatprep.subr.bf16.mxu1 %v2524_v54 }
 0x8e7   : > { %1840 = vmatpush1.bf16.msra.mxu1 %v2522_v55 }
 0x99d   : > { %v1618_v1 = vpop.f32.mrb[18].mxu1 }
 0x99e   : > { %v1622_v20 = vpack.c.bf16 %v1618_v1, %v1618_v1  ;;  %v2417_v21 = vpop.f32.mrb[19].mxu1 }
 0x9a0   : > { %2423 = vmatmul.mubr.msk.bf16.vlgmr.msra.gmra.mrb[16].mxu0 %vm781_vm1, %v1622_v20 }
 0x9a1   : > { %2313 = vmatpush3.bf16.msra.mxu0 %v2526_v4 }
 0x9a2   : > { %2314 = vmatprep.subr.bf16.mxu0 %v2527_v5 }
 0x9a5   : > { %2315 = vmatpush3.bf16.msra.mxu0 %v2528_v6 }
 0x9a6   : > { %2316 = vmatprep.subr.bf16.mxu0 %v2529_v7 }
 0x9a9   : > { %2317 = vmatpush3.bf16.msra.mxu0 %v2530_v8 }
 0x9aa   : > { %2318 = vmatprep.subr.bf16.mxu0 %v2531_v9 }
 0x9ad   : > { %2319 = vmatpush3.bf16.msra.mxu0 %v2532_v10 }
 0x9ae   : > { %2320 = vmatprep.subr.bf16.mxu0 %v2533_v11 }
 0x9b1   : > { %2321 = vmatpush3.bf16.msra.mxu0 %v2534_v50 }
 0xa73   : > { %v1672_v22 = vpop.f32.mrb[16].mxu0 }
 0xa74   : > { %v1678_v25 = vadd.f32 %v1672_v22, %v1454_v12  ;;  %v2424_v26 = vpop.f32.mrb[17].mxu0  ;;  %v2535_v12 = vld [vmem:[%s3168_s10 + $0x68] sm:$0xff]  }
 0xa75   : > { %v1675_v0 = vpop.f32.mrb[18].mxu0  ;;  %2322 = vmatprep.subr.bf16.mxu0 %v2535_v12 }
 0xa76   : > { %v1686_v30 = vadd.f32 %v2235_v23, %v1678_v25  ;;  %v2425_v32 = vpop.f32.mrb[19].mxu0  ;;  %2323 = vmatpush3.bf16.msra.mxu0 %v2536_v13 }
 0xa77   : > { %2324 = vmatprep.subr.bf16.mxu0 %v2537_v14 }
 0xa78   : > { %v1687_v33 = vadd.f32 %v1686_v30, %v505_v27 }
 0xa7a   : > { %1690 = vadd.xlane.f32.xlu1 %v1687_v33  ;;  %2325 = vmatpush3.bf16.msra.mxu0 %v2538_v15 }
 0xa7b   : > { %2326 = vmatprep.subr.bf16.mxu0 %v2539_v16 }
 0xa7e   : > { %2327 = vmatpush3.bf16.msra.mxu0 %v2540_v17 }
 0xb07   : > { %v1691_v39 = vpop.xlane.xlu1 %1690 }
 0xb08   : > { %v1693_v41 = vmul.f32 0.0078125, %v1691_v39 }
 0xb0a   : > { %v1694_v42 = vsub.f32 %v1687_v33, %v1693_v41 }
 0xb0c   : > { %v1695_v44 = vmul.f32 %v1694_v42, %v1694_v42 }
 0xb0e   : > { %1696 = vadd.xlane.f32.xlu0 %v1695_v44 }
 0xb9b   : > { %v1697_v56 = vpop.xlane.xlu0 %1696 }
 0xb9c   : > { %v1698_v57 = vmul.f32 0.0078125, %v1697_v56 }
 0xb9e   : > { %v1699_v58 = vadd.f32 1e-12, %v1698_v57 }
 0xba0   : > { %2557 = vrsqrt.f32 %v1699_v58 }
 0xbaa   : > { %v2558_v40 = vpop.eup %2557 }
 0xbab   : > { %v1701_v60 = vmul.f32 %v2558_v40, %v1694_v42 }
 0xbad   : > { %v1708_v62 = vmul.f32 %v2236_v59, %v1701_v60 }
 0xbaf   : > { %v3087_v63 = vadd.f32 %v2237_v61, %v1708_v62  ;;  %v2271_v62 = vld [vmem:[#allocation2] ss:$0 sm:$0xff] }
 0xbb1   : > { %v1716_v2 = vpack.c.bf16 %v3087_v63, %v3087_v63 }
 0xbb3   : > { %1858 = vmatmul.mubr.bf16.vlgmr.msra.gmra.mrb[20].mxu1 %v1716_v2 }
 0xc86   : > { %v1859_v1 = vpop.f32.mrb[20].mxu1 }
 0xc87   : > { %v1860_v20 = vadd.f32 %v1859_v1, %v1738_v19  ;;  %v1861_v21 = vpop.f32.mrb[21].mxu1 }
 0xc88   : > { %v1862_v22 = vadd.f32 %v1861_v21, %v1742_v43  ;;  %v1863_v23 = vpop.f32.mrb[22].mxu1 }
 0xc89   : > { %v1868_v25 = vmul.f32 0.044715, %v1860_v20  ;;  %v1864_v26 = vpop.f32.mrb[23].mxu1  ;;  %v1866_v31 = vmul.f32 0.5, %v1860_v20 }
 0xc8a   : > { %v1869_v27 = vmul.f32 0.044715, %v1862_v22  ;;  %v1867_v38 = vmul.f32 0.5, %v1862_v22 }
 0xc8b   : > { %v1870_v0 = vmul.f32 %v1868_v25, %v1860_v20 }
 0xc8c   : > { %v1871_v30 = vmul.f32 %v1869_v27, %v1862_v22 }
 0xc8d   : > { %v1872_v32 = vmul.f32 %v1870_v0, %v1860_v20 }
 0xc8e   : > { %v1873_v33 = vmul.f32 %v1871_v30, %v1862_v22 }
 0xc8f   : > { %v1874_v34 = vadd.f32 %v1872_v32, %v1860_v20 }
 0xc90   : > { %v1875_v35 = vadd.f32 %v1873_v33, %v1862_v22 }
 0xc91   : > { %v1876_v36 = vmul.f32 0.7978846, %v1874_v34 }
 0xc92   : > { %v1877_v24 = vmul.f32 0.7978846, %v1875_v35 }
 0xc93   : > { %2559 = vtanh.f32 %v1876_v36 }
 0xc94   : > { %2561 = vtanh.f32 %v1877_v24 }
 0xc9d   : > { %v2560_v28 = vpop.eup %2559 }
 0xc9e   : > { %v2562_v29 = vpop.eup %2561  ;;  %v1880_v37 = vadd.f32 1.0, %v2560_v28 }
 0xc9f   : > { %v1881_v39 = vadd.f32 1.0, %v2562_v29 }
 0xca0   : > { %v1882_v41 = vmul.f32 %v1880_v37, %v1866_v31 }
 0xca1   : > { %v1883_v42 = vmul.f32 %v1881_v39, %v1867_v38 }
 0xca2   : > { %v1884_v45 = vpack.c.bf16 %v1882_v41, %v1882_v41 }
 0xca3   : > { %v1885_v44 = vpack.c.bf16 %v1883_v42, %v1883_v42 }
 0xca5   : > { %2053 = vmatprep.mubr.bf16.mxu0 %v1885_v44 }
 0xca6   : > { %2054 = vmatmul.mubr.bf16.vlgmr.msra.gmra.mrb[20].mxu0 %v1884_v45 }
 0xd79   : > { %v2328_v46 = vpop.f32.mrb[20].mxu0 }
 0xd7a   : > { %v2329_v48 = vpop.f32.mrb[21].mxu0 }
 0xd7b   : > { %v2330_v49 = vadd.f32 %v2329_v48, %v2328_v46  ;;  %v2331_v51 = vpop.f32.mrb[22].mxu0 }
 0xd7c   : > { %v2332_v52 = vpop.f32.mrb[23].mxu0 }
 0xd7d   : > { %v2056_v53 = vadd.f32 %v2330_v49, %v2254_v47 }
 0xd7f   : > { %v2061_v54 = vadd.f32 %v2056_v53, %v3087_v63 }
 0xd81   : > { %2064 = vadd.xlane.f32.xlu0 %v2061_v54 }
 0xe0e   : > { %v2065_v55 = vpop.xlane.xlu0 %2064 }
 0xe0f   : > { %v2066_v56 = vmul.f32 0.0078125, %v2065_v55 }
 0xe11   : > { %v2067_v57 = vsub.f32 %v2061_v54, %v2066_v56 }
 0xe13   : > { %v2068_v58 = vmul.f32 %v2067_v57, %v2067_v57 }
 0xe15   : > { %2069 = vadd.xlane.f32.xlu0 %v2068_v58 }
 0xea2   : > { %v2070_v40 = vpop.xlane.xlu0 %2069 }
 0xea3   : > { %v2071_v59 = vmul.f32 0.0078125, %v2070_v40 }
 0xea5   : > { %v2072_v60 = vadd.f32 1e-12, %v2071_v59 }
 0xea7   : > { %2563 = vrsqrt.f32 %v2072_v60 }
 0xeb1   : > { %v2564_v61 = vpop.eup %2563 }
 0xeb2   : > { %v2074_v2 = vmul.f32 %v2564_v61, %v2067_v57 }
 0xeb4   : > { %v2081_v4 = vmul.f32 %v2271_v62, %v2074_v2 }
 0xeb6   : > { %v2088_v5 = vadd.f32 %v2272_v3, %v2081_v4 }
 0xeb8   : > { %v2089_v63 = vpack.c.bf16 %v2088_v5, %v2088_v5 }
 0xeba   : > { %2090 = vst [vmem:[%s502_s24] sm:$0xf] %v2089_v63 }
 0xebb PF: > { %s26_s29 = sadd.s32 1, %s2635_s29  }
 0xebc   : > { %p23_p9 = scmp.ge.s32.totalorder %s26_s29, 4  }
 0xebe   :  { %25 = sbr.rel (!%p23_p9) target bundleno = 2 (0x2), region = 118 }
 0xec5   :  { %2110 = vsyncpa [#allocation3], 1 }
 0xec6   :  { %2112 = vsyncpa [#allocation3 + $0x1], 1 }
 0xec7   :  { %2113 = vsyncpa [#allocation5], 1 }

// kernel: bert_base_uncased_forward.6
= control target key start
LH: loop header
LB: loop body
LE: loop exit
PB: predicated region body
PF: predicated region fallthrough
CT: control target
= control target key end

     0   :  { %s2581_s29 = smov 0   ;;  %s2948_s0 = inlined_call_operand.vmem [shape: bf16[2,8,128], index: 0, kind: input, shape index: {}]   ;;  %s2949_s1 = inlined_call_operand.vmem [shape: f32[2,1,8], index: 1, kind: input, shape index: {}]   ;;  %s2950_s2 = inlined_call_operand.vmem [shape: bf16[128,384], index: 2, kind: input, shape index: {}]   ;;  %s2951_s3 = inlined_call_operand.vmem [shape: f32[1,384], index: 3, kind: input, shape index: {}]   ;;  %s2952_s4 = inlined_call_operand.vmem [shape: bf16[128,128], index: 4, kind: input, shape index: {}]   ;;  %s2953_s5 = inlined_call_operand.vmem [shape: f32[1,128], index: 5, kind: input, shape index: {}]   ;;  %s2954_s6 = inlined_call_operand.vmem [shape: f32[1,128], index: 6, kind: input, shape index: {}]   ;;  %s2955_s7 = inlined_call_operand.vmem [shape: f32[1,128], index: 7, kind: input, shape index: {}]   ;;  %s2956_s8 = inlined_call_operand.vmem [shape: bf16[128,256], index: 8, kind: input, shape index: {}]   ;;  %s2957_s9 = inlined_call_operand.vmem [shape: f32[1,256], index: 9, kind: input, shape index: {}]   ;;  %s2958_s10 = inlined_call_operand.vmem [shape: bf16[256,128], index: 10, kind: input, shape index: {}]   ;;  %s2959_s11 = inlined_call_operand.vmem [shape: f32[1,128], index: 11, kind: input, shape index: {}]   ;;  %s2960_s12 = inlined_call_operand.vmem [shape: f32[1,128], index: 12, kind: input, shape index: {}]   ;;  %s2961_s13 = inlined_call_operand.vmem [shape: f32[1,128], index: 13, kind: input, shape index: {}]   ;;  %s2962_s14 = inlined_call_operand.vmem [shape: bf16[2,8,128], index: 14, kind: output, shape index: {}]  }
   0x1 LB: > { %s2127_s30 = sadd.s32 4294967295, %s2498_s29   ;;  %p2131_p0 = scmp.ge.s32.totalorder %s2498_s29, 1  ;;  %s2498_s29 = sphi %s2581_s29, %s24_s29  }
   0x2   : > { %p419_p1 = scmp.lt.s32.totalorder %s2498_s29, 3 }
   0x4   : > { %p420_p2 = pnand %p2131_p0, %p419_p1 }
   0x5   : > { %v2388_v0 = vld [vmem:[%s2950_s2 + $0x4] ss:$12 sps:$4 sm:$0xff] (!%p420_p2)   ;;  %v2390_v1 = vld [vmem:[%s2950_s2] ss:$12 sps:$4 sm:$0xff] (!%p420_p2)   ;;  %v2500_v2 = vmov (!%p420_p2), 0   ;;  %v2501_v4 = vmov (!%p420_p2), 0.0   ;;  %v515_v27 = vlaneseq (!%p420_p2) }
   0x6   : > { %423 = sbr.rel (%p420_p2) target bundleno = 3709 (0xe7d), region = 76  ;;  %690 = vmatprep.mubr.bf16.mxu0 (!%p420_p2), %v2500_v2  ;;  %658 = vmatprep.subr.bf16.mxu0 (!%p420_p2), %v2388_v0  ;;  %v2391_v3 = vld [vmem:[%s2950_s2 + $0x1c] ss:$12 sps:$4 sm:$0xff] (!%p420_p2)   ;;  %v2393_v5 = vld [vmem:[%s2950_s2 + $0x18] ss:$12 sps:$4 sm:$0xff] (!%p420_p2)   ;;  %vm2502_vm0 = vmmov (!%p420_p2), 0  }
   0x7   : > { %2282 = vmatprep.subr.bf16.mxu1 (!%p420_p2), %v2501_v4  ;;  %659 = vmatpush1.bf16.msra.mxu0 (!%p420_p2), %v2390_v1  ;;  %v2394_v6 = vld [vmem:[%s2950_s2 + $0x34] ss:$12 sps:$4 sm:$0xff] (!%p420_p2)   ;;  %p466_p3 = scmp.lt.s32.totalorder (!%p420_p2), %s2127_s30, 1  ;;  %v2396_v7 = vld [vmem:[%s2950_s2 + $0x30] ss:$12 sps:$4 sm:$0xff] (!%p420_p2)   ;;  %v2690_v28 = vshrl.u32 (!%p420_p2), %v515_v27, 7 }
   0x8   : > { %2298 = vmatprep.mubr.msk.bf16.mxu1 (!%p420_p2), %vm2502_vm0, %v2501_v4  ;;  %660 = vmatprep.subr.bf16.mxu0 (!%p420_p2), %v2391_v3  ;;  %v2397_v8 = vld [vmem:[%s2950_s2 + $0x4c] ss:$12 sps:$4 sm:$0xff] (!%p420_p2)   ;;  %v2399_v9 = vld [vmem:[%s2950_s2 + $0x48] ss:$12 sps:$4 sm:$0xff] (!%p420_p2)   ;;  %v2400_v11 = vld [vmem:[%s2950_s2 + $0x64] ss:$12 sps:$4 sm:$0xff] (!%p420_p2)  }
   0x9   : > { %v2412_v10 = vld [vmem:[%s2950_s2 + $0x8] ss:$12 sps:$4 sm:$0xff] (!%p420_p2)   ;;  %v2413_v12 = vld [vmem:[%s2950_s2 + $0x20] ss:$12 sps:$4 sm:$0xff] (!%p420_p2)   ;;  %v2405_v15 = vld [vmem:[%s2950_s2 + $0x78] ss:$12 sps:$4 sm:$0xff] (!%p420_p2)  }
   0xa   : > { %2283 = vmatpush3.bf16.msra.mxu1 (!%p420_p2), %v2412_v10  ;;  %v2402_v13 = vld [vmem:[%s2950_s2 + $0x60] ss:$12 sps:$4 sm:$0xff] (!%p420_p2)   ;;  %v2403_v14 = vld [vmem:[%s2950_s2 + $0x7c] ss:$12 sps:$4 sm:$0xff] (!%p420_p2)   ;;  %v2414_v16 = vld [vmem:[%s2950_s2 + $0x38] ss:$12 sps:$4 sm:$0xff] (!%p420_p2)  }
   0xb   : > { %661 = vmatpush1.bf16.msra.mxu0 (!%p420_p2), %v2393_v5  ;;  %2284 = vmatprep.subr.bf16.mxu1 (!%p420_p2), %v2501_v4  ;;  %v2406_v17 = vld [vmem:[%s2950_s2 + $0x94] ss:$12 sps:$4 sm:$0xff] (!%p420_p2)   ;;  %v2415_v18 = vld [vmem:[%s2950_s2 + $0x50] ss:$12 sps:$4 sm:$0xff] (!%p420_p2)   ;;  %v2409_v20 = vld [vmem:[%s2950_s2 + $0xac] ss:$12 sps:$4 sm:$0xff] (!%p420_p2)  }
   0xc   : > { %662 = vmatprep.subr.bf16.mxu0 (!%p420_p2), %v2394_v6  ;;  %v2408_v19 = vld [vmem:[%s2950_s2 + $0x90] ss:$12 sps:$4 sm:$0xff] (!%p420_p2)   ;;  %v2416_v21 = vld [vmem:[%s2950_s2 + $0x68] ss:$12 sps:$4 sm:$0xff] (!%p420_p2)   ;;  %v2417_v23 = vld [vmem:[%s2950_s2 + $0x80] ss:$12 sps:$4 sm:$0xff] (!%p420_p2)  }
   0xd   : > { %s2964_s30 = smov (!%p466_p3, %s2127_s30), 1  ;;  %v2411_v22 = vld [vmem:[%s2950_s2 + $0xa8] ss:$12 sps:$4 sm:$0xff]   ;;  %v2418_v25 = vld [vmem:[%s2950_s2 + $0x98] ss:$12 sps:$4 sm:$0xff]   ;;  %v521_v29 = vsub.s32 1, %v2690_v28 }
   0xe   : > { %s2132_s23 = sshll.u32 %s2964_s30, 2  ;;  %2285 = vmatpush3.bf16.msra.mxu1 %v2413_v12  ;;  %v2419_v26 = vld [vmem:[%s2950_s2 + $0xb0] ss:$12 sps:$4 sm:$0xff]   ;;  %v513_v30 = vld [vmem:[%s2951_s3] sm:$0x7]  ;;  %v517_v31 = vsub.s32 0, %v2690_v28  ;;  %s472_s18 = scalar_lea.vmem %s2949_s1, %s2964_s30 }
   0xf   : > { %663 = vmatpush1.bf16.msra.mxu0 %v2396_v7  ;;  %2286 = vmatprep.subr.bf16.mxu1 %v2501_v4  ;;  %s469_s19 = scalar_lea.vmem %s2948_s0, %s2132_s23  ;;  %v522_v32 = vrot.slane %v513_v30, %v521_v29  ;;  %vm755_vm1 = vcmask 261120   ;;  %v525_v39 = vsub.s32 2, %v2690_v28  ;;  %s2503_s15 = smov 96   ;;  %v2726_v50 = vld [vmem:[%s472_s18] ss:$0 sm:$0xff]  ;;  %vm840_vm2 = vcmask 64512  }
  0x10   : > { %664 = vmatprep.subr.bf16.mxu0 %v2397_v8  ;;  %v2671_v24 = vld [vmem:[%s469_s19] sm:$0xf]  ;;  %v518_v34 = vrot.slane %v513_v30, %v517_v31  ;;  %s2504_s19 = smov 64   ;;  %s2505_s20 = smov 32   ;;  %v2423_v12 = vld [vmem:[%s2952_s4 + $0x18] sm:$0xff]  }
  0x11   : > { %v526_v41 = vrot.slane %v513_v30, %v525_v39  ;;  %s476_s27 = scalar_lea.vmem %s2962_s14, %s2132_s23 }
  0x12   : > { %2287 = vmatpush3.bf16.msra.mxu1 %v2414_v16  ;;  %v2420_v16 = vld [vmem:[%s2952_s4] sm:$0xff]  }
  0x13   : > { %665 = vmatpush1.bf16.msra.mxu0 %v2399_v9  ;;  %2288 = vmatprep.subr.bf16.mxu1 %v2501_v4 }
  0x14   : > { %666 = vmatprep.subr.bf16.mxu0 %v2400_v11  ;;  %v2422_v11 = vld [vmem:[%s2952_s4 + $0x10] sm:$0xff]  }
  0x16   : > { %2289 = vmatpush3.bf16.msra.mxu1 %v2415_v18  ;;  %v2421_v18 = vld [vmem:[%s2952_s4 + $0x8] sm:$0xff]  }
  0x17   : > { %667 = vmatpush1.bf16.msra.mxu0 %v2402_v13  ;;  %2290 = vmatprep.subr.bf16.mxu1 %v2501_v4 }
  0x18   : > { %668 = vmatprep.subr.bf16.mxu0 %v2403_v14 }
  0x1a   : > { %2291 = vmatpush3.bf16.msra.mxu1 %v2416_v21 }
  0x1b   : > { %669 = vmatpush1.bf16.msra.mxu0 %v2405_v15  ;;  %2292 = vmatprep.subr.bf16.mxu1 %v2501_v4 }
  0x1c   : > { %670 = vmatprep.subr.bf16.mxu0 %v2406_v17 }
  0x1e   : > { %2293 = vmatpush3.bf16.msra.mxu1 %v2417_v23 }
  0x1f   : > { %671 = vmatpush1.bf16.msra.mxu0 %v2408_v19  ;;  %2294 = vmatprep.subr.bf16.mxu1 %v2501_v4 }
  0x20   : > { %672 = vmatprep.subr.bf16.mxu0 %v2409_v20 }
  0x22   : > { %2295 = vmatpush3.bf16.msra.mxu1 %v2418_v25 }
  0x23   : > { %673 = vmatpush1.bf16.msra.mxu0 %v2411_v22  ;;  %2296 = vmatprep.subr.bf16.mxu1 %v2501_v4 }
  0x24   : > { %2312 = vmatprep.subr.mxu0 %v2501_v4 }
  0x26   : > { %691 = vmatmul.mubr.bf16.vlgmr.msra.gmra.mrb[0].mxu0 %v2671_v24  ;;  %2297 = vmatpush3.bf16.msra.mxu1 %v2419_v26 }
  0x27   : > { %2314 = vmatprep.mubr.msk.f32.mxu0 %vm2502_vm0, %v2501_v4  ;;  %2302 = vmatprep.subr.mxu1 %v2501_v4 }
  0x29   : > { %2299 = vmatmul.mubr.bf16.vlgmr.msra.gmra.mrb[0].mxu1 %v2671_v24 }
  0x2a   : > { %2304 = vmatprep.mubr.msk.f32.mxu1 %vm2502_vm0, %v2501_v4 }
  0xf9   : > { %v692_v33 = vpop.f32.mrb[0].mxu0 }
  0xfa   : > { %v694_v35 = vpop.f32.mrb[1].mxu0  ;;  %v2704_v40 = vadd.f32 %v692_v33, %v518_v34 }
  0xfb   : > { %v695_v36 = vadd.f32 %v694_v35, %v522_v32  ;;  %v696_v37 = vpop.f32.mrb[2].mxu0 }
  0xfc   : > { %v697_v38 = vpop.f32.mrb[3].mxu0  ;;  %v733_v42 = vpop.f32.mrb[0].mxu1 }
  0xfd   : > { %928 = vrot.lane.b32.xlu0 %v695_v36, %s2503_s15  ;;  %2303 = vmatpush3.xpose.msk.msra.mxu1 %vm755_vm1, %v695_v36  ;;  %v2713_v43 = vadd.f32 %v733_v42, %v526_v41  ;;  %v2300_v44 = vpop.f32.mrb[1].mxu1 }
  0xfe   : > { %2307 = vmatprep.subr.mxu1 %v2501_v4  ;;  %v736_v45 = vpop.f32.mrb[2].mxu1 }
  0xff   : > { %v2301_v46 = vpop.f32.mrb[3].mxu1 }
 0x100   : > { %2305 = vmatmul.mubr.msk.f32.vlgmr.msra.gmra.mrb[4].mxu1 %vm755_vm1, %v2704_v40 }
 0x101   : > { %926 = vrot.lane.b32.xlu0 %v2704_v40, %s2503_s15  ;;  %2309 = vmatprep.mubr.msk.f32.mxu1 %vm2502_vm0, %v2501_v4 }
 0x102   : > { %2308 = vmatpush3.msra.mxu1 %v2713_v43 }
 0x103   : > { %2317 = vmatprep.subr.mxu1 %v2501_v4 }
 0x16f   : > { %v929_v47 = vpop.permute.xlu0 %928 }
 0x170   : > { %2313 = vmatpush3.xpose.msk.msra.mxu0 %vm755_vm1, %v929_v47 }
 0x171   : > { %2322 = vmatprep.subr.bf16.mxu0 %v2501_v4 }
 0x173   : > { %v927_v48 = vpop.permute.xlu0 %926 }
 0x174   : > { %2315 = vmatmul.mubr.msk.f32.vlgmr.msra.gmra.mrb[4].mxu0 %vm755_vm1, %v927_v48 }
 0x175   : > { %2326 = vmatprep.mubr.msk.bf16.mxu0 %vm2502_vm0, %v2501_v4  ;;  %2323 = vmatpush3.bf16.msra.mxu0 %v2422_v11  ;;  %v2426_v11 = vld [vmem:[%s2952_s4 + $0x30] sm:$0xff]  }
 0x176   : > { %2324 = vmatprep.subr.bf16.mxu0 %v2501_v4 }
 0x179   : > { %2325 = vmatpush3.bf16.msra.mxu0 %v2423_v12 }
 0x17a   : > { %2338 = vmatprep.subr.mxu0 %v2501_v4 }
 0x1d3   : > { %v828_v49 = vpop.f32.mrb[4].mxu1 }
 0x1d4   : > { %v832_v51 = vmul.f32 0.17677669, %v828_v49  ;;  %v2306_v52 = vpop.f32.mrb[5].mxu1 }
 0x1d6   : > { %v839_v53 = vadd.f32 %v2726_v50, %v832_v51 }
 0x1d8   : > { %v841_v54 = vsel %vm840_vm2, %v839_v53, -inf }
 0x1d9   : > { %842 = vmax.xlane.f32.xlu1 %v841_v54  ;;  %v2424_v54 = vld [vmem:[%s2952_s4 + $0x20] sm:$0xff]  }
 0x247   : > { %v1000_v55 = vpop.f32.mrb[4].mxu0 }
 0x248   : > { %v1004_v56 = vmul.f32 0.17677669, %v1000_v55  ;;  %v2316_v57 = vpop.f32.mrb[5].mxu0 }
 0x24a   : > { %v1005_v58 = vadd.f32 %v2726_v50, %v1004_v56 }
 0x24c   : > { %v1006_v59 = vsel %vm840_vm2, %v1005_v58, -inf }
 0x24d   : > { %1007 = vmax.xlane.f32.xlu1 %v1006_v59  ;;  %v2425_v59 = vld [vmem:[%s2952_s4 + $0x28] sm:$0xff]  }
 0x266   : > { %v843_v60 = vpop.xlane.xlu1 %842 }
 0x267   : > { %v844_v61 = vsub.f32 %v839_v53, %v843_v60 }
 0x269   : > { %v845_v62 = vmul.f32 1.442695, %v844_v61 }
 0x26b   : > { %2468 = vpow2.f32 %v845_v62 }
 0x275   : > { %v2469_v63 = vpop.eup %2468 }
 0x276   : > { %v847_v0 = vsel %vm840_vm2, %v2469_v63, 0.0 }
 0x277   : > { %848 = vadd.xlane.f32.xlu0 %v847_v0 }
 0x28d   : > { %1296 = vrot.lane.b32.xlu0 %v2713_v43, %s2504_s19 }
 0x291   : > { %1431 = vrot.lane.b32.xlu0 %v695_v36, %s2505_s20 }
 0x2da   : > { %v1008_v1 = vpop.xlane.xlu1 %1007 }
 0x2db   : > { %v1009_v3 = vsub.f32 %v1005_v58, %v1008_v1 }
 0x2dd   : > { %v1010_v5 = vmul.f32 1.442695, %v1009_v3 }
 0x2df   : > { %2470 = vpow2.f32 %v1010_v5 }
 0x2e9   : > { %v2471_v6 = vpop.eup %2470 }
 0x2ea   : > { %v1012_v7 = vsel %vm840_vm2, %v2471_v6, 0.0 }
 0x2eb   : > { %1013 = vadd.xlane.f32.xlu1 %v1012_v7 }
 0x2fc   : > { %1018 = vrot.lane.b32.xlu1 %v2713_v43, %s2503_s15 }
 0x300   : > { %1207 = vrot.lane.b32.xlu1 %v695_v36, %s2504_s19 }
 0x304   : > { %v849_v8 = vpop.xlane.xlu0 %848  ;;  %1205 = vrot.lane.b32.xlu1 %v2704_v40, %s2504_s19 }
 0x305   : > { %2472 = vrcp.f32 %v849_v8 }
 0x308   : > { %v1297_v22 = vpop.permute.xlu0 %1296 }
 0x30c   : > { %v1432_v55 = vpop.permute.xlu0 %1431 }
 0x30f   : > { %v2473_v9 = vpop.eup %2472 }
 0x310   : > { %v851_v10 = vmul.f32 %v2473_v9, %v2469_v63 }
 0x312   : > { %2310 = vmatmul.mubr.msk.f32.vlgmr.msra.gmra.mrb[6].mxu1 %vm840_vm2, %v851_v10 }
 0x313   : > { %2319 = vmatprep.mubr.msk.f32.mxu1 %vm2502_vm0, %v2501_v4 }
 0x378   : > { %v1014_v13 = vpop.xlane.xlu1 %1013 }
 0x379   : > { %2474 = vrcp.f32 %v1014_v13 }
 0x37c   : > { %v1019_v14 = vpop.permute.xlu1 %1018 }
 0x37d   : > { %2318 = vmatpush3.msra.mxu1 %v1019_v14 }
 0x37e   : > { %2330 = vmatprep.subr.bf16.mxu1 %v2501_v4 }
 0x380   : > { %v1208_v27 = vpop.permute.xlu1 %1207 }
 0x383   : > { %v2475_v15 = vpop.eup %2474 }
 0x384   : > { %v1016_v17 = vmul.f32 %v2475_v15, %v2471_v6  ;;  %v1206_v30 = vpop.permute.xlu1 %1205 }
 0x386   : > { %2320 = vmatmul.mubr.msk.f32.vlgmr.msra.gmra.mrb[8].mxu1 %vm840_vm2, %v1016_v17 }
 0x387   : > { %2331 = vmatpush3.bf16.msra.mxu1 %v2420_v16  ;;  %2334 = vmatprep.mubr.msk.bf16.mxu1 %vm2502_vm0, %v2501_v4 }
 0x388   : > { %2332 = vmatprep.subr.bf16.mxu1 %v2501_v4 }
 0x38b   : > { %2333 = vmatpush3.bf16.msra.mxu1 %v2421_v18 }
 0x38c   : > { %2343 = vmatprep.subr.mxu1 %v2501_v4 }
 0x3e5   : > { %v921_v19 = vpop.f32.mrb[6].mxu1 }
 0x3e6   : > { %v925_v20 = vpack.c.bf16 %v921_v19, %v921_v19  ;;  %v2311_v21 = vpop.f32.mrb[7].mxu1 }
 0x3e8   : > { %2335 = vmatmul.mubr.msk.bf16.vlgmr.msra.gmra.mrb[12].mxu1 %vm755_vm1, %v925_v20 }
 0x3e9   : > { %2344 = vmatpush3.msra.mxu1 %v1297_v22  ;;  %2345 = vmatprep.mubr.msk.f32.mxu1 %vm2502_vm0, %v2501_v4 }
 0x3ea   : > { %2356 = vmatprep.subr.mxu1 %v2501_v4 }
 0x459   : > { %v1090_v23 = vpop.f32.mrb[8].mxu1 }
 0x45a   : > { %v1094_v25 = vpack.c.bf16 %v1090_v23, %v1090_v23  ;;  %v2321_v26 = vpop.f32.mrb[9].mxu1  ;;  %v2183_v23 = vld [vmem:[%s2953_s5] ss:$0 sm:$0xff] }
 0x45c   : > { %2327 = vmatmul.mubr.msk.bf16.vlgmr.msra.gmra.mrb[8].mxu0 %vm755_vm1, %v1094_v25 }
 0x45d   : > { %2339 = vmatpush3.xpose.msk.msra.mxu0 %vm755_vm1, %v1208_v27  ;;  %2340 = vmatprep.mubr.msk.f32.mxu0 %vm2502_vm0, %v2501_v4  ;;  %v479_v27 = vunpack.c.l.bf16 %v2671_v24  ;;  %v2431_v24 = vld [vmem:[%s2956_s8 + $0x10] ss:$8 sps:$4 sm:$0xff]  }
 0x45e   : > { %2348 = vmatprep.subr.bf16.mxu0 %v2501_v4 }
 0x464   : > { %2341 = vmatmul.mubr.msk.f32.vlgmr.msra.gmra.mrb[6].mxu0 %vm755_vm1, %v1206_v30 }
 0x465   : > { %2352 = vmatprep.mubr.msk.bf16.mxu0 %vm2502_vm0, %v2501_v4  ;;  %2349 = vmatpush3.bf16.msra.mxu0 %v2424_v54  ;;  %v2451_v54 = vld [vmem:[%s2956_s8 + $0x74] ss:$8 sps:$4 sm:$0xff]  }
 0x466   : > { %2350 = vmatprep.subr.bf16.mxu0 %v2501_v4 }
 0x469   : > { %2351 = vmatpush3.bf16.msra.mxu0 %v2425_v59  ;;  %v2184_v59 = vld [vmem:[%s2954_s6] ss:$0 sm:$0xff] }
 0x46a   : > { %2366 = vmatprep.subr.bf16.mxu0 %v2501_v4 }
 0x4bb   : > { %v1199_v32 = vpop.f32.mrb[12].mxu1 }
 0x4bc   : > { %v2336_v33 = vpop.f32.mrb[13].mxu1 }
 0x4bd   : > { %v1202_v34 = vpop.f32.mrb[14].mxu1 }
 0x4be   : > { %v2337_v35 = vpop.f32.mrb[15].mxu1  ;;  %v2428_v34 = vld [vmem:[%s2956_s8] ss:$8 sps:$4 sm:$0xff]  }
 0x4bf   : > { %v2430_v35 = vld [vmem:[%s2956_s8 + $0x4] ss:$8 sps:$4 sm:$0xff]  }
 0x52f   : > { %v1144_v36 = vpop.f32.mrb[8].mxu0 }
 0x530   : > { %v1200_v37 = vadd.f32 %v1199_v32, %v1144_v36  ;;  %v2328_v38 = vpop.f32.mrb[9].mxu0  ;;  %v2433_v36 = vld [vmem:[%s2956_s8 + $0x14] ss:$8 sps:$4 sm:$0xff]  }
 0x531   : > { %v1147_v39 = vpop.f32.mrb[10].mxu0  ;;  %v2434_v38 = vld [vmem:[%s2956_s8 + $0x20] ss:$8 sps:$4 sm:$0xff]  }
 0x532   : > { %v2329_v41 = vpop.f32.mrb[11].mxu0 }
 0x537   : > { %v1279_v42 = vpop.f32.mrb[6].mxu0 }
 0x538   : > { %v1283_v44 = vmul.f32 0.17677669, %v1279_v42  ;;  %v2342_v45 = vpop.f32.mrb[7].mxu0 }
 0x539   : > { %v2439_v45 = vld [vmem:[%s2956_s8 + $0x34] ss:$8 sps:$4 sm:$0xff]  }
 0x53a   : > { %v1284_v46 = vadd.f32 %v2726_v50, %v1283_v44 }
 0x53c   : > { %v1285_v47 = vsel %vm840_vm2, %v1284_v46, -inf }
 0x53d   : > { %1286 = vmax.xlane.f32.xlu1 %v1285_v47  ;;  %v2442_v47 = vld [vmem:[%s2956_s8 + $0x44] ss:$8 sps:$4 sm:$0xff]  }
 0x5ca   : > { %v1287_v48 = vpop.xlane.xlu1 %1286 }
 0x5cb   : > { %v1288_v49 = vsub.f32 %v1284_v46, %v1287_v48  ;;  %v2437_v46 = vld [vmem:[%s2956_s8 + $0x30] ss:$8 sps:$4 sm:$0xff]   ;;  %v2440_v48 = vld [vmem:[%s2956_s8 + $0x40] ss:$8 sps:$4 sm:$0xff]  }
 0x5cd   : > { %v1289_v51 = vmul.f32 1.442695, %v1288_v49  ;;  %v2445_v49 = vld [vmem:[%s2956_s8 + $0x54] ss:$8 sps:$4 sm:$0xff]  }
 0x5cf   : > { %2476 = vpow2.f32 %v1289_v51  ;;  %v2443_v51 = vld [vmem:[%s2956_s8 + $0x50] ss:$8 sps:$4 sm:$0xff]  }
 0x5d9   : > { %v2477_v52 = vpop.eup %2476 }
 0x5da   : > { %v1291_v53 = vsel %vm840_vm2, %v2477_v52, 0.0 }
 0x5db   : > { %1292 = vadd.xlane.f32.xlu0 %v1291_v53  ;;  %v2446_v53 = vld [vmem:[%s2956_s8 + $0x60] ss:$8 sps:$4 sm:$0xff]  }
 0x5f1   : > { %1429 = vrot.lane.b32.xlu0 %v2704_v40, %s2505_s20 }
 0x668   : > { %v1293_v56 = vpop.xlane.xlu0 %1292 }
 0x669   : > { %2478 = vrcp.f32 %v1293_v56 }
 0x66c   : > { %v1430_v40 = vpop.permute.xlu0 %1429 }
 0x673   : > { %v2479_v57 = vpop.eup %2478 }
 0x674   : > { %v1295_v58 = vmul.f32 %v2479_v57, %v2477_v52  ;;  %v2448_v52 = vld [vmem:[%s2956_s8 + $0x64] ss:$8 sps:$4 sm:$0xff]  }
 0x676   : > { %2346 = vmatmul.mubr.msk.f32.vlgmr.msra.gmra.mrb[10].mxu1 %vm840_vm2, %v1295_v58 }
 0x677   : > { %2357 = vmatpush3.xpose.msk.msra.mxu1 %vm755_vm1, %v1432_v55  ;;  %2358 = vmatprep.mubr.msk.f32.mxu1 %vm2502_vm0, %v2501_v4  ;;  %v2449_v55 = vld [vmem:[%s2956_s8 + $0x70] ss:$8 sps:$4 sm:$0xff]  }
 0x678   : > { %2361 = vmatprep.subr.mxu1 %v2501_v4 }
 0x67a   : > { %2359 = vmatmul.mubr.msk.f32.vlgmr.msra.gmra.mrb[16].mxu1 %vm755_vm1, %v1430_v40 }
 0x67b   : > { %2363 = vmatprep.mubr.msk.f32.mxu1 %vm2502_vm0, %v2501_v4 }
 0x749   : > { %v1368_v60 = vpop.f32.mrb[10].mxu1 }
 0x74a   : > { %v1372_v61 = vpack.c.bf16 %v1368_v60, %v1368_v60  ;;  %v2347_v62 = vpop.f32.mrb[11].mxu1 }
 0x74c   : > { %2353 = vmatmul.mubr.msk.bf16.vlgmr.msra.gmra.mrb[12].mxu0 %vm755_vm1, %v1372_v61  ;;  %v2185_v61 = vld [vmem:[%s2955_s7] ss:$0 sm:$0xff] }
 0x74d   : > { %v1503_v63 = vpop.f32.mrb[16].mxu1  ;;  %2370 = vmatprep.mubr.msk.bf16.mxu0 %vm2502_vm0, %v2501_v4  ;;  %2367 = vmatpush3.bf16.msra.mxu0 %v2426_v11  ;;  %v2460_v11 = vld [vmem:[%s2958_s10 + $0x60] sm:$0xff]  }
 0x74e   : > { %v1507_v0 = vmul.f32 0.17677669, %v1503_v63  ;;  %v2360_v1 = vpop.f32.mrb[17].mxu1  ;;  %2368 = vmatprep.subr.bf16.mxu0 %v2501_v4 }
 0x74f   : > { %v2452_v1 = vld [vmem:[%s2958_s10 + $0x40] sm:$0xff]  }
 0x750   : > { %v1508_v3 = vadd.f32 %v2726_v50, %v1507_v0 }
 0x752   : > { %v1509_v5 = vsel %vm840_vm2, %v1508_v3, -inf }
 0x753   : > { %1510 = vmax.xlane.f32.xlu0 %v1509_v5  ;;  %v2454_v5 = vld [vmem:[%s2958_s10 + $0x48] sm:$0xff]  }
 0x7e0   : > { %v1511_v6 = vpop.xlane.xlu0 %1510 }
 0x7e1   : > { %v1512_v7 = vsub.f32 %v1508_v3, %v1511_v6  ;;  %v2453_v3 = vld [vmem:[%s2958_s10] sm:$0xff]   ;;  %v2455_v6 = vld [vmem:[%s2958_s10 + $0x8] sm:$0xff]  }
 0x7e3   : > { %v1513_v8 = vmul.f32 1.442695, %v1512_v7  ;;  %v2456_v7 = vld [vmem:[%s2958_s10 + $0x50] sm:$0xff]  }
 0x7e5   : > { %2480 = vpow2.f32 %v1513_v8  ;;  %v2457_v8 = vld [vmem:[%s2958_s10 + $0x10] sm:$0xff]  }
 0x7ef   : > { %v2481_v9 = vpop.eup %2480 }
 0x7f0   : > { %v1515_v10 = vsel %vm840_vm2, %v2481_v9, 0.0 }
 0x7f1   : > { %1516 = vadd.xlane.f32.xlu1 %v1515_v10  ;;  %v2459_v10 = vld [vmem:[%s2958_s10 + $0x18] sm:$0xff]  }
 0x802   : > { %1520 = vrot.lane.b32.xlu1 %v2713_v43, %s2505_s20  ;;  %v2427_v43 = vld [vmem:[%s2952_s4 + $0x38] sm:$0xff]  }
 0x803   : > { %2369 = vmatpush3.bf16.msra.mxu0 %v2427_v43 }
 0x804   : > { %2260 = vmatprep.subr.bf16.mxu0 %v2452_v1 }
 0x81f   : > { %v1422_v50 = vpop.f32.mrb[12].mxu0 }
 0x820   : > { %v1428_v12 = vadd.f32 %v1422_v50, %v1200_v37  ;;  %v2354_v13 = vpop.f32.mrb[13].mxu0  ;;  %v2436_v37 = vld [vmem:[%s2956_s8 + $0x24] ss:$8 sps:$4 sm:$0xff]  }
 0x821   : > { %v1425_v14 = vpop.f32.mrb[14].mxu0  ;;  %v2461_v50 = vld [vmem:[%s2958_s10 + $0x20] sm:$0xff]   ;;  %v2463_v13 = vld [vmem:[%s2958_s10 + $0x28] sm:$0xff]  }
 0x822   : > { %v2355_v15 = vpop.f32.mrb[15].mxu0  ;;  %v2464_v14 = vld [vmem:[%s2958_s10 + $0x70] sm:$0xff]  }
 0x823   : > { %v2465_v15 = vld [vmem:[%s2958_s10 + $0x30] sm:$0xff]  }
 0x87e   : > { %v1517_v16 = vpop.xlane.xlu1 %1516 }
 0x87f   : > { %2482 = vrcp.f32 %v1517_v16  ;;  %v2466_v16 = vld [vmem:[%s2958_s10 + $0x78] sm:$0xff]  }
 0x882   : > { %v1521_v17 = vpop.permute.xlu1 %1520 }
 0x883   : > { %2362 = vmatpush3.msra.mxu1 %v1521_v17  ;;  %v2467_v17 = vld [vmem:[%s2958_s10 + $0x38] sm:$0xff]  }
 0x884   : > { %1799 = vmatprep.subr.bf16.mxu1 %v2430_v35 }
 0x889   : > { %v2483_v18 = vpop.eup %2482 }
 0x88a   : > { %v1519_v19 = vmul.f32 %v2483_v18, %v2481_v9  ;;  %v2458_v9 = vld [vmem:[%s2958_s10 + $0x58] sm:$0xff]   ;;  %v1707_v18 = vld [vmem:[%s2957_s9] sm:$0x3] }
 0x88b   : > { %v1716_v43 = vrot.slane %v1707_v18, %v521_v29 }
 0x88c   : > { %2364 = vmatmul.mubr.msk.f32.vlgmr.msra.gmra.mrb[18].mxu1 %vm840_vm2, %v1519_v19  ;;  %v1712_v19 = vrot.slane %v1707_v18, %v517_v31 }
 0x88d   : > { %1831 = vmatprep.mubr.bf16.mxu1 %v2500_v2  ;;  %1800 = vmatpush1.bf16.msra.mxu1 %v2428_v34 }
 0x88e   : > { %1801 = vmatprep.subr.bf16.mxu1 %v2433_v36 }
 0x891   : > { %1802 = vmatpush1.bf16.msra.mxu1 %v2431_v24 }
 0x892   : > { %1803 = vmatprep.subr.bf16.mxu1 %v2436_v37 }
 0x895   : > { %1804 = vmatpush1.bf16.msra.mxu1 %v2434_v38 }
 0x896   : > { %1805 = vmatprep.subr.bf16.mxu1 %v2439_v45 }
 0x899   : > { %1806 = vmatpush1.bf16.msra.mxu1 %v2437_v46 }
 0x89a   : > { %1807 = vmatprep.subr.bf16.mxu1 %v2442_v47  ;;  %v2202_v47 = vld [vmem:[%s2959_s11] ss:$0 sm:$0xff] }
 0x89d   : > { %1808 = vmatpush1.bf16.msra.mxu1 %v2440_v48 }
 0x89e   : > { %1809 = vmatprep.subr.bf16.mxu1 %v2445_v49 }
 0x8a1   : > { %1810 = vmatpush1.bf16.msra.mxu1 %v2443_v51 }
 0x8a2   : > { %1811 = vmatprep.subr.bf16.mxu1 %v2448_v52 }
 0x8a5   : > { %1812 = vmatpush1.bf16.msra.mxu1 %v2446_v53 }
 0x8a6   : > { %1813 = vmatprep.subr.bf16.mxu1 %v2451_v54 }
 0x8a9   : > { %1814 = vmatpush1.bf16.msra.mxu1 %v2449_v55 }
 0x95f   : > { %v1592_v4 = vpop.f32.mrb[18].mxu1 }
 0x960   : > { %v1596_v20 = vpack.c.bf16 %v1592_v4, %v1592_v4  ;;  %v2365_v21 = vpop.f32.mrb[19].mxu1 }
 0x962   : > { %2371 = vmatmul.mubr.msk.bf16.vlgmr.msra.gmra.mrb[16].mxu0 %vm755_vm1, %v1596_v20 }
 0x963   : > { %2261 = vmatpush3.bf16.msra.mxu0 %v2453_v3 }
 0x964   : > { %2262 = vmatprep.subr.bf16.mxu0 %v2454_v5 }
 0x967   : > { %2263 = vmatpush3.bf16.msra.mxu0 %v2455_v6 }
 0x968   : > { %2264 = vmatprep.subr.bf16.mxu0 %v2456_v7 }
 0x96b   : > { %2265 = vmatpush3.bf16.msra.mxu0 %v2457_v8 }
 0x96c   : > { %2266 = vmatprep.subr.bf16.mxu0 %v2458_v9 }
 0x96f   : > { %2267 = vmatpush3.bf16.msra.mxu0 %v2459_v10 }
 0x970   : > { %2268 = vmatprep.subr.bf16.mxu0 %v2460_v11 }
 0x973   : > { %2269 = vmatpush3.bf16.msra.mxu0 %v2461_v50 }
 0xa35   : > { %v1646_v22 = vpop.f32.mrb[16].mxu0 }
 0xa36   : > { %v1652_v25 = vadd.f32 %v1646_v22, %v1428_v12  ;;  %v2372_v26 = vpop.f32.mrb[17].mxu0  ;;  %v2462_v12 = vld [vmem:[%s2958_s10 + $0x68] sm:$0xff]  }
 0xa37   : > { %v1649_v2 = vpop.f32.mrb[18].mxu0  ;;  %2270 = vmatprep.subr.bf16.mxu0 %v2462_v12 }
 0xa38   : > { %v1660_v30 = vadd.f32 %v2183_v23, %v1652_v25  ;;  %v2373_v32 = vpop.f32.mrb[19].mxu0  ;;  %2271 = vmatpush3.bf16.msra.mxu0 %v2463_v13 }
 0xa39   : > { %2272 = vmatprep.subr.bf16.mxu0 %v2464_v14 }
 0xa3a   : > { %v1661_v33 = vadd.f32 %v1660_v30, %v479_v27 }
 0xa3c   : > { %1664 = vadd.xlane.f32.xlu1 %v1661_v33  ;;  %2273 = vmatpush3.bf16.msra.mxu0 %v2465_v15 }
 0xa3d   : > { %2274 = vmatprep.subr.bf16.mxu0 %v2466_v16 }
 0xa40   : > { %2275 = vmatpush3.bf16.msra.mxu0 %v2467_v17 }
 0xac9   : > { %v1665_v39 = vpop.xlane.xlu1 %1664 }
 0xaca   : > { %v1667_v41 = vmul.f32 0.0078125, %v1665_v39 }
 0xacc   : > { %v1668_v42 = vsub.f32 %v1661_v33, %v1667_v41 }
 0xace   : > { %v1669_v44 = vmul.f32 %v1668_v42, %v1668_v42 }
 0xad0   : > { %1670 = vadd.xlane.f32.xlu0 %v1669_v44 }
 0xb5d   : > { %v1671_v56 = vpop.xlane.xlu0 %1670 }
 0xb5e   : > { %v1672_v57 = vmul.f32 0.0078125, %v1671_v56 }
 0xb60   : > { %v1673_v58 = vadd.f32 1e-12, %v1672_v57 }
 0xb62   : > { %2484 = vrsqrt.f32 %v1673_v58 }
 0xb6c   : > { %v2485_v40 = vpop.eup %2484 }
 0xb6d   : > { %v1675_v60 = vmul.f32 %v2485_v40, %v1668_v42 }
 0xb6f   : > { %v1682_v62 = vmul.f32 %v2184_v59, %v1675_v60 }
 0xb71   : > { %v2871_v63 = vadd.f32 %v2185_v61, %v1682_v62  ;;  %v2219_v62 = vld [vmem:[%s2960_s12] ss:$0 sm:$0xff] }
 0xb73   : > { %v1690_v0 = vpack.c.bf16 %v2871_v63, %v2871_v63 }
 0xb75   : > { %1832 = vmatmul.mubr.bf16.vlgmr.msra.gmra.mrb[20].mxu1 %v1690_v0 }
 0xc48   : > { %v1833_v4 = vpop.f32.mrb[20].mxu1 }
 0xc49   : > { %v1834_v20 = vadd.f32 %v1833_v4, %v1712_v19  ;;  %v1835_v21 = vpop.f32.mrb[21].mxu1 }
 0xc4a   : > { %v1836_v22 = vadd.f32 %v1835_v21, %v1716_v43  ;;  %v1837_v23 = vpop.f32.mrb[22].mxu1 }
 0xc4b   : > { %v1842_v25 = vmul.f32 0.044715, %v1834_v20  ;;  %v1838_v26 = vpop.f32.mrb[23].mxu1  ;;  %v1840_v31 = vmul.f32 0.5, %v1834_v20 }
 0xc4c   : > { %v1843_v27 = vmul.f32 0.044715, %v1836_v22  ;;  %v1841_v38 = vmul.f32 0.5, %v1836_v22 }
 0xc4d   : > { %v1844_v2 = vmul.f32 %v1842_v25, %v1834_v20 }
 0xc4e   : > { %v1845_v30 = vmul.f32 %v1843_v27, %v1836_v22 }
 0xc4f   : > { %v1846_v32 = vmul.f32 %v1844_v2, %v1834_v20 }
 0xc50   : > { %v1847_v33 = vmul.f32 %v1845_v30, %v1836_v22 }
 0xc51   : > { %v1848_v34 = vadd.f32 %v1846_v32, %v1834_v20 }
 0xc52   : > { %v1849_v35 = vadd.f32 %v1847_v33, %v1836_v22 }
 0xc53   : > { %v1850_v36 = vmul.f32 0.7978846, %v1848_v34 }
 0xc54   : > { %v1851_v24 = vmul.f32 0.7978846, %v1849_v35 }
 0xc55   : > { %2486 = vtanh.f32 %v1850_v36 }
 0xc56   : > { %2488 = vtanh.f32 %v1851_v24 }
 0xc5f   : > { %v2487_v28 = vpop.eup %2486 }
 0xc60   : > { %v2489_v29 = vpop.eup %2488  ;;  %v1854_v37 = vadd.f32 1.0, %v2487_v28 }
 0xc61   : > { %v1855_v39 = vadd.f32 1.0, %v2489_v29 }
 0xc62   : > { %v1856_v41 = vmul.f32 %v1854_v37, %v1840_v31 }
 0xc63   : > { %v1857_v42 = vmul.f32 %v1855_v39, %v1841_v38 }
 0xc64   : > { %v1858_v45 = vpack.c.bf16 %v1856_v41, %v1856_v41 }
 0xc65   : > { %v1859_v44 = vpack.c.bf16 %v1857_v42, %v1857_v42 }
 0xc67   : > { %2027 = vmatprep.mubr.bf16.mxu0 %v1859_v44 }
 0xc68   : > { %2028 = vmatmul.mubr.bf16.vlgmr.msra.gmra.mrb[20].mxu0 %v1858_v45 }
 0xd3b   : > { %v2276_v46 = vpop.f32.mrb[20].mxu0 }
 0xd3c   : > { %v2277_v48 = vpop.f32.mrb[21].mxu0 }
 0xd3d   : > { %v2278_v49 = vadd.f32 %v2277_v48, %v2276_v46  ;;  %v2279_v51 = vpop.f32.mrb[22].mxu0 }
 0xd3e   : > { %v2280_v52 = vpop.f32.mrb[23].mxu0 }
 0xd3f   : > { %v2030_v53 = vadd.f32 %v2278_v49, %v2202_v47 }
 0xd41   : > { %v2035_v54 = vadd.f32 %v2030_v53, %v2871_v63  ;;  %v2220_v63 = vld [vmem:[%s2961_s13] ss:$0 sm:$0xff] }
 0xd43   : > { %2038 = vadd.xlane.f32.xlu0 %v2035_v54 }
 0xdd0   : > { %v2039_v55 = vpop.xlane.xlu0 %2038 }
 0xdd1   : > { %v2040_v56 = vmul.f32 0.0078125, %v2039_v55 }
 0xdd3   : > { %v2041_v57 = vsub.f32 %v2035_v54, %v2040_v56 }
 0xdd5   : > { %v2042_v58 = vmul.f32 %v2041_v57, %v2041_v57 }
 0xdd7   : > { %2043 = vadd.xlane.f32.xlu0 %v2042_v58 }
 0xe64   : > { %v2044_v40 = vpop.xlane.xlu0 %2043 }
 0xe65   : > { %v2045_v59 = vmul.f32 0.0078125, %v2044_v40 }
 0xe67   : > { %v2046_v60 = vadd.f32 1e-12, %v2045_v59 }
 0xe69   : > { %2490 = vrsqrt.f32 %v2046_v60 }
 0xe73   : > { %v2491_v61 = vpop.eup %2490 }
 0xe74   : > { %v2048_v0 = vmul.f32 %v2491_v61, %v2041_v57 }
 0xe76   : > { %v2055_v1 = vmul.f32 %v2219_v62, %v2048_v0 }
 0xe78   : > { %v2062_v3 = vadd.f32 %v2220_v63, %v2055_v1 }
 0xe7a   : > { %v2063_v5 = vpack.c.bf16 %v2062_v3, %v2062_v3 }
 0xe7c   : > { %2064 = vst [vmem:[%s476_s27] sm:$0xf] %v2063_v5 }
 0xe7d PF: > { %s24_s29 = sadd.s32 1, %s2498_s29  }
 0xe7e   : > { %p21_p4 = scmp.ge.s32.totalorder %s24_s29, 4  }
 0xe80   :  { %23 = sbr.rel (!%p21_p4) target bundleno = 1 (0x1), region = 109 }

</bundles_post_ra>
